<compile_context>
chip_gen: v7x
topology: tpu7x:2x2x1
jax: 0.10.0
libtpu: 0.0.40
codegen_flags: <defaults>
</compile_context>

<pallas_src>
import functools
import math

import numpy as np

import jax
import jax.numpy as jnp
from jax.experimental import pallas as pl
from jax.experimental.pallas import tpu as pltpu

_LANE = 128


def _round_up(x, m):
    return ((x + m - 1) // m) * m


def _sage_layer_kernel(cols_ref, nnz_ref, adj_ref, xk_ref, xself_ref,
                       scale_ref, wl_ref, wr_ref, b_ref, o_ref,
                       acc_ref, root_ref, *, apply_relu):
    # cols_ref : (n_i, max_nnz) int32 SMEM - nonzero column-block ids per row-block
    # nnz_ref  : (n_i,)         int32 SMEM - number of nonzero blocks per row-block
    # adj_ref  : (tm, tk)       bf16  - binary adjacency block (i, cols[i, k])
    # xk_ref   : (tk, Fin_p)    bf16  - neighbor features for that column block
    # xself_ref: (tm, Fin_p)    bf16  - this row tile's own features (root term)
    # scale_ref: (tm, 1)        f32   - 1/deg row scale
    # wl_ref   : (Fin_p, Fout_p) bf16 - neighbor weight
    # wr_ref   : (Fin_p, Fout_p) bf16 - root weight
    # b_ref    : (1, Fout_p)    f32
    # o_ref    : (tm, Fout_p)   bf16/f32
    # acc_ref  : (tm, Fin_p)    f32 scratch - running neighbor-sum
    # root_ref : (tm, Fout_p)   f32 scratch - xself @ W_r
    i = pl.program_id(0)
    k = pl.program_id(1)

    @pl.when(k == 0)
    def _():
        acc_ref[...] = jnp.zeros_like(acc_ref)
        # Root-term matmul hoisted to the pipeline-fill phase.
        root_ref[...] = jnp.dot(xself_ref[...], wr_ref[...],
                                preferred_element_type=jnp.float32)

    # Ragged tail guard: only the first nnz[i] entries of the block list are
    # real nonzero blocks (the rest are padding that points at block 0).
    @pl.when(k < nnz_ref[i])
    def _():
        acc_ref[...] += jnp.dot(adj_ref[...], xk_ref[...],
                                preferred_element_type=jnp.float32)

    @pl.when(k == pl.num_programs(1) - 1)
    def _():
        agg = (acc_ref[...] * scale_ref[...]).astype(wl_ref.dtype)
        out = jnp.dot(agg, wl_ref[...], preferred_element_type=jnp.float32)
        out = out + root_ref[...] + b_ref[...]
        if apply_relu:
            out = jnp.maximum(out, 0.0)
        o_ref[...] = out.astype(o_ref.dtype)


def sage_conv(adj_bf, scale, cols, nnz, x_bf, wl_bf, wr_bf, bias2d, *,
              apply_relu, out_dtype, tm, tk):
    """One SAGEConv layer (mean aggregation) as a block-CSR Pallas kernel."""
    Np, Fin_p = x_bf.shape
    Fout_p = wl_bf.shape[1]
    assert Np % tm == 0 and Np % tk == 0
    n_i = Np // tm
    max_nnz = cols.shape[1]

    kernel = functools.partial(_sage_layer_kernel, apply_relu=apply_relu)

    nnzb = n_i * max_nnz
    flops = 2 * nnzb * tm * tk * Fin_p + 2 * Np * Fin_p * Fout_p * 2
    bytes_accessed = (nnzb * tm * tk * jnp.dtype(adj_bf.dtype).itemsize
                      + nnzb * tk * Fin_p * 2       # xk re-stream (bf16)
                      + Np * Fin_p * 2              # xself (bf16)
                      + 2 * Fin_p * Fout_p * 2      # weights (bf16)
                      + Np * Fout_p * jnp.dtype(out_dtype).itemsize)

    return pl.pallas_call(
        kernel,
        out_shape=jax.ShapeDtypeStruct((Np, Fout_p), out_dtype),
        grid_spec=pltpu.PrefetchScalarGridSpec(
            num_scalar_prefetch=2,
            grid=(n_i, max_nnz),
            in_specs=[
                # adjacency block (i, cols[i,k]) - zero blocks are never DMA'd
                pl.BlockSpec((tm, tk), lambda i, k, c, z: (i, c[i, k])),
                # neighbor features for that column block
                pl.BlockSpec((tk, Fin_p), lambda i, k, c, z: (c[i, k], 0)),
                # own features (root term)
                pl.BlockSpec((tm, Fin_p), lambda i, k, c, z: (i, 0)),
                # 1/deg row scale
                pl.BlockSpec((tm, 1), lambda i, k, c, z: (i, 0)),
                # weights + bias (resident)
                pl.BlockSpec((Fin_p, Fout_p), lambda i, k, c, z: (0, 0)),
                pl.BlockSpec((Fin_p, Fout_p), lambda i, k, c, z: (0, 0)),
                pl.BlockSpec((1, Fout_p), lambda i, k, c, z: (0, 0)),
            ],
            out_specs=pl.BlockSpec((tm, Fout_p), lambda i, k, c, z: (i, 0)),
            scratch_shapes=[pltpu.VMEM((tm, Fin_p), jnp.float32),
                            pltpu.VMEM((tm, Fout_p), jnp.float32)],
        ),
        compiler_params=pltpu.CompilerParams(
            dimension_semantics=("parallel", "arbitrary")),
        cost_estimate=pl.CostEstimate(flops=flops, transcendentals=0,
                                      bytes_accessed=int(bytes_accessed)),
    )(cols, nnz, adj_bf, x_bf, x_bf, scale, wl_bf, wr_bf, bias2d)


def prepare_graph(adj_bin, *, tm=256, tk=256):
    """One-time graph preprocessing (outside jit, once per graph).

    adj_bin: (N, N) dense 0/1 adjacency (no self-loops).
    Returns padded bf16 binary adjacency, f32 1/deg row scale, and the
    block-CSR (cols, nnz) arrays for scalar prefetch.
    """
    N = adj_bin.shape[0]
    Np = _round_up(N, math.lcm(tm, tk))

    b = jnp.zeros((Np, Np), jnp.float32).at[:N, :N].set(
        (adj_bin != 0).astype(jnp.float32))
    deg = b.sum(axis=1, keepdims=True)
    scale = jnp.where(deg > 0, 1.0 / jnp.maximum(deg, 1.0), 0.0)   # (Np, 1) f32
    adj_bf = b.astype(jnp.bfloat16)   # binary -> exactly representable

    n_i, n_k = Np // tm, Np // tk
    blk = np.asarray(jax.device_get(
        jnp.any(b.reshape(n_i, tm, n_k, tk) != 0, axis=(1, 3))))
    nnz = blk.sum(axis=1).astype(np.int32)            # (n_i,)
    max_nnz = max(1, int(nnz.max()))
    cols = np.zeros((n_i, max_nnz), dtype=np.int32)
    for r in range(n_i):
        idx = np.flatnonzero(blk[r])
        cols[r, :idx.size] = idx

    return {"adj": adj_bf, "scale": scale,
            "cols": jnp.asarray(cols), "nnz": jnp.asarray(nnz)}


def graphsage_forward(x, adj_bf, scale, cols, nnz, params, *, tm, tk):
    """GraphSAGE forward (eval mode). params: list of (w_l, w_r, bias)."""
    N = x.shape[0]
    Np = adj_bf.shape[0]
    n_layers = len(params)

    # Pad features to the 128-lane width; padded rows/cols stay zero through
    # every layer (zero weight rows/cols, zero bias entries).
    fin0 = x.shape[1]
    fin0_p = _round_up(fin0, _LANE)
    h = jnp.zeros((Np, fin0_p), jnp.bfloat16).at[:N, :fin0].set(
        x.astype(jnp.bfloat16))

    for li, (w_l, w_r, b) in enumerate(params):
        fin, fout = w_l.shape
        fin_p = _round_up(fin, _LANE)
        fout_p = _round_up(fout, _LANE)
        assert h.shape[1] == fin_p
        wl_p = jnp.zeros((fin_p, fout_p), jnp.float32).at[:fin, :fout].set(
            w_l).astype(jnp.bfloat16)
        wr_p = jnp.zeros((fin_p, fout_p), jnp.float32).at[:fin, :fout].set(
            w_r).astype(jnp.bfloat16)
        bias_p = jnp.zeros((1, fout_p), jnp.float32).at[0, :fout].set(b)

        last = li == n_layers - 1
        h = sage_conv(adj_bf, scale, cols, nnz, h, wl_p, wr_p, bias_p,
                      apply_relu=not last,
                      out_dtype=jnp.float32 if last else jnp.bfloat16,
                      tm=tm, tk=tk)
        # dropout: identity (eval mode)

    fout_last = params[-1][0].shape[1]
    return h[:N, :fout_last]


def init_params(key, in_channels, hidden_channels, out_channels, num_layers):
    if num_layers == 1:
        dims = [(in_channels, out_channels)]
    else:
        dims = [(in_channels, hidden_channels)]
        dims += [(hidden_channels, hidden_channels)] * (num_layers - 2)
        dims += [(hidden_channels, out_channels)]
    params = []
    for fin, fout in dims:
        key, k1, k2, k3 = jax.random.split(key, 4)
        s = 1.0 / jnp.sqrt(jnp.float32(fin))
        w_l = jax.random.uniform(k1, (fin, fout), jnp.float32, -s, s)
        w_r = jax.random.uniform(k2, (fin, fout), jnp.float32, -s, s)
        b = jax.random.uniform(k3, (fout,), jnp.float32, -s, s)
        params.append((w_l, w_r, b))
    return params


def make_adjacency(key, n_nodes, avg_deg=8):
    """Dense binary adjacency (no self loops), deterministic."""
    p = avg_deg / n_nodes
    a = (jax.random.uniform(key, (n_nodes, n_nodes)) < p).astype(jnp.float32)
    return a * (1.0 - jnp.eye(n_nodes, dtype=jnp.float32))


if __name__ == "__main__":
    key = jax.random.PRNGKey(0)
    k_x, k_adj, k_p = jax.random.split(key, 3)

    # small, TPU-friendly shapes
    n_nodes = 512
    in_channels, hidden_channels, out_channels = 32, 64, 16
    num_layers = 3
    dropout = 0.5  # identity in eval mode
    tm, tk = 256, 256

    x = jax.random.normal(k_x, (n_nodes, in_channels), jnp.float32)
    adj_bin = make_adjacency(k_adj, n_nodes)
    params = init_params(k_p, in_channels, hidden_channels, out_channels,
                         num_layers)

    graph = prepare_graph(adj_bin, tm=tm, tk=tk)   # once per graph

    fwd = jax.jit(graphsage_forward, static_argnames=("tm", "tk"))
    out = jax.block_until_ready(
        fwd(x, graph["adj"], graph["scale"], graph["cols"], graph["nnz"],
            params, tm=tm, tk=tk))
    assert out.shape == (n_nodes, out_channels)

    # pure-JAX reference with matching bf16 quantization points
    def q(a):
        return a.astype(jnp.bfloat16).astype(jnp.float32)

    hp = jax.lax.Precision.HIGHEST
    deg = adj_bin.sum(axis=1, keepdims=True)
    inv_deg = jnp.where(deg > 0, 1.0 / jnp.maximum(deg, 1.0), 0.0)
    h_ref = q(x)
    for li, (w_l, w_r, b) in enumerate(params):
        agg = inv_deg * jnp.dot(adj_bin, h_ref, precision=hp)
        new = (jnp.dot(q(agg), q(w_l), precision=hp)
               + jnp.dot(h_ref, q(w_r), precision=hp) + b)
        if li != num_layers - 1:
            new = q(jnp.maximum(new, 0.0))   # kernel stores bf16 between layers
        h_ref = new

    err = float(jnp.max(jnp.abs(out - h_ref)))
    assert jnp.allclose(out, h_ref, atol=2e-2, rtol=2e-2), err

    print("KERNEL_OK")
</pallas_src>

<mosaic_0001>
module attributes {stable_mosaic.version = 11 : i64} {
  func.func @_sage_layer_kernel(%arg0: i32, %arg1: i32, %arg2: memref<2x2xi32, #tpu.memory_space<smem>>, %arg3: memref<2xi32, #tpu.memory_space<smem>>, %arg4: memref<256x256xbf16, #tpu.memory_space<vmem>>, %arg5: memref<256x128xbf16, #tpu.memory_space<vmem>>, %arg6: memref<256x128xbf16, #tpu.memory_space<vmem>>, %arg7: memref<256x1xf32, #tpu.memory_space<vmem>>, %arg8: memref<128x128xbf16, #tpu.memory_space<vmem>>, %arg9: memref<128x128xbf16, #tpu.memory_space<vmem>>, %arg10: memref<1x128xf32, #tpu.memory_space<vmem>>, %arg11: memref<256x128xbf16, #tpu.memory_space<vmem>>, %arg12: memref<256x128xf32, #tpu.memory_space<vmem>>, %arg13: memref<256x128xf32, #tpu.memory_space<vmem>>) attributes {dimension_semantics = [#tpu.dimension_semantics<parallel>, #tpu.dimension_semantics<arbitrary>], iteration_bounds = array<i64: 2, 2>, scalar_prefetch = 2 : i64, scratch_operands = 2 : i64, tpu.core_type = #tpu.core_type<tc>, window_params = [{transform_indices = @transform_0, window_bounds = array<i64: 256, 256>}, {transform_indices = @transform_1, window_bounds = array<i64: 256, 128>}, {transform_indices = @transform_2, window_bounds = array<i64: 256, 128>}, {transform_indices = @transform_3, window_bounds = array<i64: 256, 1>}, {pipeline_mode = #tpu.pipeline_mode<synchronous>, transform_indices = @transform_4, window_bounds = array<i64: 128, 128>}, {pipeline_mode = #tpu.pipeline_mode<synchronous>, transform_indices = @transform_5, window_bounds = array<i64: 128, 128>}, {pipeline_mode = #tpu.pipeline_mode<synchronous>, transform_indices = @transform_6, window_bounds = array<i64: 1, 128>}, {transform_indices = @transform_7, window_bounds = array<i64: 256, 128>}]} {
    %c0_i32 = arith.constant 0 : i32
    %0 = arith.cmpi eq, %arg1, %c0_i32 : i32
    %1 = arith.extui %0 : i1 to i32
    %c0_i32_0 = arith.constant 0 : i32
    %2 = arith.cmpi ne, %1, %c0_i32_0 : i32
    scf.if %2 {
      %cst = arith.constant 0.000000e+00 : f32
      %11 = vector.broadcast %cst : f32 to vector<256x128xf32>
      %c0 = arith.constant 0 : index
      %c0_3 = arith.constant 0 : index
      %12 = vector.load %arg12[%c0, %c0_3] : memref<256x128xf32, #tpu.memory_space<vmem>>, vector<256x128xf32>
      tpu.vector_store %arg12[%c0, %c0_3], %11 {strides = array<i32>} : memref<256x128xf32, #tpu.memory_space<vmem>>, vector<256x128xf32>,
      %c0_4 = arith.constant 0 : index
      %c0_5 = arith.constant 0 : index
      %13 = vector.load %arg6[%c0_4, %c0_5] : memref<256x128xbf16, #tpu.memory_space<vmem>>, vector<256x128xbf16>
      %c0_6 = arith.constant 0 : index
      %c0_7 = arith.constant 0 : index
      %14 = vector.load %arg9[%c0_6, %c0_7] : memref<128x128xbf16, #tpu.memory_space<vmem>>, vector<128x128xbf16>
      %cst_8 = arith.constant dense<0.000000e+00> : vector<256x128xf32>
      %15 = tpu.matmul %13, %14, %cst_8 {dimension_numbers = #tpu.dot_dimension_numbers<[1], [0], [0], [1], [0, 0, 1, 1], [], []>} : vector<256x128xbf16>, vector<128x128xbf16>, vector<256x128xf32> -> vector<256x128xf32>
      %c0_9 = arith.constant 0 : index
      %c0_10 = arith.constant 0 : index
      %16 = vector.load %arg13[%c0_9, %c0_10] : memref<256x128xf32, #tpu.memory_space<vmem>>, vector<256x128xf32>
      tpu.vector_store %arg13[%c0_9, %c0_10], %15 {strides = array<i32>} : memref<256x128xf32, #tpu.memory_space<vmem>>, vector<256x128xf32>,
    } else {
    }
    %3 = arith.index_cast %arg0 : i32 to index
    %4 = memref.load %arg3[%3] : memref<2xi32, #tpu.memory_space<smem>>
    %5 = arith.cmpi slt, %arg1, %4 : i32
    %6 = arith.extui %5 : i1 to i32
    %c0_i32_1 = arith.constant 0 : i32
    %7 = arith.cmpi ne, %6, %c0_i32_1 : i32
    scf.if %7 {
      %c0 = arith.constant 0 : index
      %c0_3 = arith.constant 0 : index
      %11 = vector.load %arg12[%c0, %c0_3] : memref<256x128xf32, #tpu.memory_space<vmem>>, vector<256x128xf32>
      %c0_4 = arith.constant 0 : index
      %c0_5 = arith.constant 0 : index
      %12 = vector.load %arg4[%c0_4, %c0_5] : memref<256x256xbf16, #tpu.memory_space<vmem>>, vector<256x256xbf16>
      %c0_6 = arith.constant 0 : index
      %c0_7 = arith.constant 0 : index
      %13 = vector.load %arg5[%c0_6, %c0_7] : memref<256x128xbf16, #tpu.memory_space<vmem>>, vector<256x128xbf16>
      %cst = arith.constant dense<0.000000e+00> : vector<256x128xf32>
      %14 = tpu.matmul %12, %13, %cst {dimension_numbers = #tpu.dot_dimension_numbers<[1], [0], [0], [1], [0, 0, 1, 1], [], []>} : vector<256x256xbf16>, vector<256x128xbf16>, vector<256x128xf32> -> vector<256x128xf32>
      %15 = arith.addf %11, %14 : vector<256x128xf32>
      %c0_8 = arith.constant 0 : index
      %c0_9 = arith.constant 0 : index
      %16 = vector.load %arg12[%c0_8, %c0_9] : memref<256x128xf32, #tpu.memory_space<vmem>>, vector<256x128xf32>
      tpu.vector_store %arg12[%c0_8, %c0_9], %15 {strides = array<i32>} : memref<256x128xf32, #tpu.memory_space<vmem>>, vector<256x128xf32>,
    } else {
    }
    %c1_i32 = arith.constant 1 : i32
    %8 = arith.cmpi eq, %arg1, %c1_i32 : i32
    %9 = arith.extui %8 : i1 to i32
    %c0_i32_2 = arith.constant 0 : i32
    %10 = arith.cmpi ne, %9, %c0_i32_2 : i32
    scf.if %10 {
      %c0 = arith.constant 0 : index
      %c0_3 = arith.constant 0 : index
      %11 = vector.load %arg12[%c0, %c0_3] : memref<256x128xf32, #tpu.memory_space<vmem>>, vector<256x128xf32>
      %c0_4 = arith.constant 0 : index
      %c0_5 = arith.constant 0 : index
      %12 = vector.load %arg7[%c0_4, %c0_5] : memref<256x1xf32, #tpu.memory_space<vmem>>, vector<256x1xf32>
      %13 = vector.broadcast %12 : vector<256x1xf32> to vector<256x128xf32>
      %14 = arith.mulf %11, %13 : vector<256x128xf32>
      %15 = arith.truncf %14 : vector<256x128xf32> to vector<256x128xbf16>
      %c0_6 = arith.constant 0 : index
      %c0_7 = arith.constant 0 : index
      %16 = vector.load %arg8[%c0_6, %c0_7] : memref<128x128xbf16, #tpu.memory_space<vmem>>, vector<128x128xbf16>
      %cst = arith.constant dense<0.000000e+00> : vector<256x128xf32>
      %17 = tpu.matmul %15, %16, %cst {dimension_numbers = #tpu.dot_dimension_numbers<[1], [0], [0], [1], [0, 0, 1, 1], [], []>} : vector<256x128xbf16>, vector<128x128xbf16>, vector<256x128xf32> -> vector<256x128xf32>
      %c0_8 = arith.constant 0 : index
      %c0_9 = arith.constant 0 : index
      %18 = vector.load %arg13[%c0_8, %c0_9] : memref<256x128xf32, #tpu.memory_space<vmem>>, vector<256x128xf32>
      %19 = arith.addf %17, %18 : vector<256x128xf32>
      %c0_10 = arith.constant 0 : index
      %c0_11 = arith.constant 0 : index
      %20 = vector.load %arg10[%c0_10, %c0_11] : memref<1x128xf32, #tpu.memory_space<vmem>>, vector<1x128xf32>
      %21 = vector.broadcast %20 : vector<1x128xf32> to vector<256x128xf32>
      %22 = arith.addf %19, %21 : vector<256x128xf32>
      %cst_12 = arith.constant 0.000000e+00 : f32
      %23 = vector.broadcast %cst_12 : f32 to vector<256x128xf32>
      %24 = arith.maximumf %22, %23 : vector<256x128xf32>
      %25 = arith.truncf %24 : vector<256x128xf32> to vector<256x128xbf16>
      %c0_13 = arith.constant 0 : index
      %c0_14 = arith.constant 0 : index
      %26 = vector.load %arg11[%c0_13, %c0_14] : memref<256x128xbf16, #tpu.memory_space<vmem>>, vector<256x128xbf16>
      tpu.vector_store %arg11[%c0_13, %c0_14], %25 {strides = array<i32>} : memref<256x128xbf16, #tpu.memory_space<vmem>>, vector<256x128xbf16>,
    } else {
    }
    return
  }
  func.func @transform_0(%arg0: i32, %arg1: i32, %arg2: memref<2x2xi32, #tpu.memory_space<smem>>, %arg3: memref<2xi32, #tpu.memory_space<smem>>) -> (i32, i32) {
    %0 = arith.index_cast %arg0 : i32 to index
    %1 = arith.index_cast %arg1 : i32 to index
    %2 = memref.load %arg2[%0, %1] : memref<2x2xi32, #tpu.memory_space<smem>>
    %c0_i32 = arith.constant 0 : i32
    return %arg0, %2 : i32, i32
  }
  func.func @transform_1(%arg0: i32, %arg1: i32, %arg2: memref<2x2xi32, #tpu.memory_space<smem>>, %arg3: memref<2xi32, #tpu.memory_space<smem>>) -> (i32, i32) {
    %0 = arith.index_cast %arg0 : i32 to index
    %1 = arith.index_cast %arg1 : i32 to index
    %2 = memref.load %arg2[%0, %1] : memref<2x2xi32, #tpu.memory_space<smem>>
    %c0_i32 = arith.constant 0 : i32
    %c0_i32_0 = arith.constant 0 : i32
    return %2, %c0_i32 : i32, i32
  }
  func.func @transform_2(%arg0: i32, %arg1: i32, %arg2: memref<2x2xi32, #tpu.memory_space<smem>>, %arg3: memref<2xi32, #tpu.memory_space<smem>>) -> (i32, i32) {
    %c0_i32 = arith.constant 0 : i32
    %c0_i32_0 = arith.constant 0 : i32
    return %arg0, %c0_i32 : i32, i32
  }
  func.func @transform_3(%arg0: i32, %arg1: i32, %arg2: memref<2x2xi32, #tpu.memory_space<smem>>, %arg3: memref<2xi32, #tpu.memory_space<smem>>) -> (i32, i32) {
    %c0_i32 = arith.constant 0 : i32
    %c0_i32_0 = arith.constant 0 : i32
    return %arg0, %c0_i32 : i32, i32
  }
  func.func @transform_4(%arg0: i32, %arg1: i32, %arg2: memref<2x2xi32, #tpu.memory_space<smem>>, %arg3: memref<2xi32, #tpu.memory_space<smem>>) -> (i32, i32) {
    %c0_i32 = arith.constant 0 : i32
    %c0_i32_0 = arith.constant 0 : i32
    %c0_i32_1 = arith.constant 0 : i32
    return %c0_i32, %c0_i32_0 : i32, i32
  }
  func.func @transform_5(%arg0: i32, %arg1: i32, %arg2: memref<2x2xi32, #tpu.memory_space<smem>>, %arg3: memref<2xi32, #tpu.memory_space<smem>>) -> (i32, i32) {
    %c0_i32 = arith.constant 0 : i32
    %c0_i32_0 = arith.constant 0 : i32
    %c0_i32_1 = arith.constant 0 : i32
    return %c0_i32, %c0_i32_0 : i32, i32
  }
  func.func @transform_6(%arg0: i32, %arg1: i32, %arg2: memref<2x2xi32, #tpu.memory_space<smem>>, %arg3: memref<2xi32, #tpu.memory_space<smem>>) -> (i32, i32) {
    %c0_i32 = arith.constant 0 : i32
    %c0_i32_0 = arith.constant 0 : i32
    %c0_i32_1 = arith.constant 0 : i32
    return %c0_i32, %c0_i32_0 : i32, i32
  }
  func.func @transform_7(%arg0: i32, %arg1: i32, %arg2: memref<2x2xi32, #tpu.memory_space<smem>>, %arg3: memref<2xi32, #tpu.memory_space<smem>>) -> (i32, i32) {
    %c0_i32 = arith.constant 0 : i32
    %c0_i32_0 = arith.constant 0 : i32
    return %arg0, %c0_i32 : i32, i32
  }
}

module attributes {stable_mosaic.version = 11 : i64} {
  func.func @_sage_layer_kernel(%arg0: i32, %arg1: i32, %arg2: memref<2x2xi32, #tpu.memory_space<smem>>, %arg3: memref<2xi32, #tpu.memory_space<smem>>, %arg4: memref<256x256xbf16, #tpu.memory_space<vmem>>, %arg5: memref<256x128xbf16, #tpu.memory_space<vmem>>, %arg6: memref<256x128xbf16, #tpu.memory_space<vmem>>, %arg7: memref<256x1xf32, #tpu.memory_space<vmem>>, %arg8: memref<128x128xbf16, #tpu.memory_space<vmem>>, %arg9: memref<128x128xbf16, #tpu.memory_space<vmem>>, %arg10: memref<1x128xf32, #tpu.memory_space<vmem>>, %arg11: memref<256x128xf32, #tpu.memory_space<vmem>>, %arg12: memref<256x128xf32, #tpu.memory_space<vmem>>, %arg13: memref<256x128xf32, #tpu.memory_space<vmem>>) attributes {dimension_semantics = [#tpu.dimension_semantics<parallel>, #tpu.dimension_semantics<arbitrary>], iteration_bounds = array<i64: 2, 2>, scalar_prefetch = 2 : i64, scratch_operands = 2 : i64, tpu.core_type = #tpu.core_type<tc>, window_params = [{transform_indices = @transform_0, window_bounds = array<i64: 256, 256>}, {transform_indices = @transform_1, window_bounds = array<i64: 256, 128>}, {transform_indices = @transform_2, window_bounds = array<i64: 256, 128>}, {transform_indices = @transform_3, window_bounds = array<i64: 256, 1>}, {pipeline_mode = #tpu.pipeline_mode<synchronous>, transform_indices = @transform_4, window_bounds = array<i64: 128, 128>}, {pipeline_mode = #tpu.pipeline_mode<synchronous>, transform_indices = @transform_5, window_bounds = array<i64: 128, 128>}, {pipeline_mode = #tpu.pipeline_mode<synchronous>, transform_indices = @transform_6, window_bounds = array<i64: 1, 128>}, {transform_indices = @transform_7, window_bounds = array<i64: 256, 128>}]} {
    %c0_i32 = arith.constant 0 : i32
    %0 = arith.cmpi eq, %arg1, %c0_i32 : i32
    %1 = arith.extui %0 : i1 to i32
    %c0_i32_0 = arith.constant 0 : i32
    %2 = arith.cmpi ne, %1, %c0_i32_0 : i32
    scf.if %2 {
      %cst = arith.constant 0.000000e+00 : f32
      %11 = vector.broadcast %cst : f32 to vector<256x128xf32>
      %c0 = arith.constant 0 : index
      %c0_3 = arith.constant 0 : index
      %12 = vector.load %arg12[%c0, %c0_3] : memref<256x128xf32, #tpu.memory_space<vmem>>, vector<256x128xf32>
      tpu.vector_store %arg12[%c0, %c0_3], %11 {strides = array<i32>} : memref<256x128xf32, #tpu.memory_space<vmem>>, vector<256x128xf32>,
      %c0_4 = arith.constant 0 : index
      %c0_5 = arith.constant 0 : index
      %13 = vector.load %arg6[%c0_4, %c0_5] : memref<256x128xbf16, #tpu.memory_space<vmem>>, vector<256x128xbf16>
      %c0_6 = arith.constant 0 : index
      %c0_7 = arith.constant 0 : index
      %14 = vector.load %arg9[%c0_6, %c0_7] : memref<128x128xbf16, #tpu.memory_space<vmem>>, vector<128x128xbf16>
      %cst_8 = arith.constant dense<0.000000e+00> : vector<256x128xf32>
      %15 = tpu.matmul %13, %14, %cst_8 {dimension_numbers = #tpu.dot_dimension_numbers<[1], [0], [0], [1], [0, 0, 1, 1], [], []>} : vector<256x128xbf16>, vector<128x128xbf16>, vector<256x128xf32> -> vector<256x128xf32>
      %c0_9 = arith.constant 0 : index
      %c0_10 = arith.constant 0 : index
      %16 = vector.load %arg13[%c0_9, %c0_10] : memref<256x128xf32, #tpu.memory_space<vmem>>, vector<256x128xf32>
      tpu.vector_store %arg13[%c0_9, %c0_10], %15 {strides = array<i32>} : memref<256x128xf32, #tpu.memory_space<vmem>>, vector<256x128xf32>,
    } else {
    }
    %3 = arith.index_cast %arg0 : i32 to index
    %4 = memref.load %arg3[%3] : memref<2xi32, #tpu.memory_space<smem>>
    %5 = arith.cmpi slt, %arg1, %4 : i32
    %6 = arith.extui %5 : i1 to i32
    %c0_i32_1 = arith.constant 0 : i32
    %7 = arith.cmpi ne, %6, %c0_i32_1 : i32
    scf.if %7 {
      %c0 = arith.constant 0 : index
      %c0_3 = arith.constant 0 : index
      %11 = vector.load %arg12[%c0, %c0_3] : memref<256x128xf32, #tpu.memory_space<vmem>>, vector<256x128xf32>
      %c0_4 = arith.constant 0 : index
      %c0_5 = arith.constant 0 : index
      %12 = vector.load %arg4[%c0_4, %c0_5] : memref<256x256xbf16, #tpu.memory_space<vmem>>, vector<256x256xbf16>
      %c0_6 = arith.constant 0 : index
      %c0_7 = arith.constant 0 : index
      %13 = vector.load %arg5[%c0_6, %c0_7] : memref<256x128xbf16, #tpu.memory_space<vmem>>, vector<256x128xbf16>
      %cst = arith.constant dense<0.000000e+00> : vector<256x128xf32>
      %14 = tpu.matmul %12, %13, %cst {dimension_numbers = #tpu.dot_dimension_numbers<[1], [0], [0], [1], [0, 0, 1, 1], [], []>} : vector<256x256xbf16>, vector<256x128xbf16>, vector<256x128xf32> -> vector<256x128xf32>
      %15 = arith.addf %11, %14 : vector<256x128xf32>
      %c0_8 = arith.constant 0 : index
      %c0_9 = arith.constant 0 : index
      %16 = vector.load %arg12[%c0_8, %c0_9] : memref<256x128xf32, #tpu.memory_space<vmem>>, vector<256x128xf32>
      tpu.vector_store %arg12[%c0_8, %c0_9], %15 {strides = array<i32>} : memref<256x128xf32, #tpu.memory_space<vmem>>, vector<256x128xf32>,
    } else {
    }
    %c1_i32 = arith.constant 1 : i32
    %8 = arith.cmpi eq, %arg1, %c1_i32 : i32
    %9 = arith.extui %8 : i1 to i32
    %c0_i32_2 = arith.constant 0 : i32
    %10 = arith.cmpi ne, %9, %c0_i32_2 : i32
    scf.if %10 {
      %c0 = arith.constant 0 : index
      %c0_3 = arith.constant 0 : index
      %11 = vector.load %arg12[%c0, %c0_3] : memref<256x128xf32, #tpu.memory_space<vmem>>, vector<256x128xf32>
      %c0_4 = arith.constant 0 : index
      %c0_5 = arith.constant 0 : index
      %12 = vector.load %arg7[%c0_4, %c0_5] : memref<256x1xf32, #tpu.memory_space<vmem>>, vector<256x1xf32>
      %13 = vector.broadcast %12 : vector<256x1xf32> to vector<256x128xf32>
      %14 = arith.mulf %11, %13 : vector<256x128xf32>
      %15 = arith.truncf %14 : vector<256x128xf32> to vector<256x128xbf16>
      %c0_6 = arith.constant 0 : index
      %c0_7 = arith.constant 0 : index
      %16 = vector.load %arg8[%c0_6, %c0_7] : memref<128x128xbf16, #tpu.memory_space<vmem>>, vector<128x128xbf16>
      %cst = arith.constant dense<0.000000e+00> : vector<256x128xf32>
      %17 = tpu.matmul %15, %16, %cst {dimension_numbers = #tpu.dot_dimension_numbers<[1], [0], [0], [1], [0, 0, 1, 1], [], []>} : vector<256x128xbf16>, vector<128x128xbf16>, vector<256x128xf32> -> vector<256x128xf32>
      %c0_8 = arith.constant 0 : index
      %c0_9 = arith.constant 0 : index
      %18 = vector.load %arg13[%c0_8, %c0_9] : memref<256x128xf32, #tpu.memory_space<vmem>>, vector<256x128xf32>
      %19 = arith.addf %17, %18 : vector<256x128xf32>
      %c0_10 = arith.constant 0 : index
      %c0_11 = arith.constant 0 : index
      %20 = vector.load %arg10[%c0_10, %c0_11] : memref<1x128xf32, #tpu.memory_space<vmem>>, vector<1x128xf32>
      %21 = vector.broadcast %20 : vector<1x128xf32> to vector<256x128xf32>
      %22 = arith.addf %19, %21 : vector<256x128xf32>
      %c0_12 = arith.constant 0 : index
      %c0_13 = arith.constant 0 : index
      %23 = vector.load %arg11[%c0_12, %c0_13] : memref<256x128xf32, #tpu.memory_space<vmem>>, vector<256x128xf32>
      tpu.vector_store %arg11[%c0_12, %c0_13], %22 {strides = array<i32>} : memref<256x128xf32, #tpu.memory_space<vmem>>, vector<256x128xf32>,
    } else {
    }
    return
  }
  func.func @transform_0(%arg0: i32, %arg1: i32, %arg2: memref<2x2xi32, #tpu.memory_space<smem>>, %arg3: memref<2xi32, #tpu.memory_space<smem>>) -> (i32, i32) {
    %0 = arith.index_cast %arg0 : i32 to index
    %1 = arith.index_cast %arg1 : i32 to index
    %2 = memref.load %arg2[%0, %1] : memref<2x2xi32, #tpu.memory_space<smem>>
    %c0_i32 = arith.constant 0 : i32
    return %arg0, %2 : i32, i32
  }
  func.func @transform_1(%arg0: i32, %arg1: i32, %arg2: memref<2x2xi32, #tpu.memory_space<smem>>, %arg3: memref<2xi32, #tpu.memory_space<smem>>) -> (i32, i32) {
    %0 = arith.index_cast %arg0 : i32 to index
    %1 = arith.index_cast %arg1 : i32 to index
    %2 = memref.load %arg2[%0, %1] : memref<2x2xi32, #tpu.memory_space<smem>>
    %c0_i32 = arith.constant 0 : i32
    %c0_i32_0 = arith.constant 0 : i32
    return %2, %c0_i32 : i32, i32
  }
  func.func @transform_2(%arg0: i32, %arg1: i32, %arg2: memref<2x2xi32, #tpu.memory_space<smem>>, %arg3: memref<2xi32, #tpu.memory_space<smem>>) -> (i32, i32) {
    %c0_i32 = arith.constant 0 : i32
    %c0_i32_0 = arith.constant 0 : i32
    return %arg0, %c0_i32 : i32, i32
  }
  func.func @transform_3(%arg0: i32, %arg1: i32, %arg2: memref<2x2xi32, #tpu.memory_space<smem>>, %arg3: memref<2xi32, #tpu.memory_space<smem>>) -> (i32, i32) {
    %c0_i32 = arith.constant 0 : i32
    %c0_i32_0 = arith.constant 0 : i32
    return %arg0, %c0_i32 : i32, i32
  }
  func.func @transform_4(%arg0: i32, %arg1: i32, %arg2: memref<2x2xi32, #tpu.memory_space<smem>>, %arg3: memref<2xi32, #tpu.memory_space<smem>>) -> (i32, i32) {
    %c0_i32 = arith.constant 0 : i32
    %c0_i32_0 = arith.constant 0 : i32
    %c0_i32_1 = arith.constant 0 : i32
    return %c0_i32, %c0_i32_0 : i32, i32
  }
  func.func @transform_5(%arg0: i32, %arg1: i32, %arg2: memref<2x2xi32, #tpu.memory_space<smem>>, %arg3: memref<2xi32, #tpu.memory_space<smem>>) -> (i32, i32) {
    %c0_i32 = arith.constant 0 : i32
    %c0_i32_0 = arith.constant 0 : i32
    %c0_i32_1 = arith.constant 0 : i32
    return %c0_i32, %c0_i32_0 : i32, i32
  }
  func.func @transform_6(%arg0: i32, %arg1: i32, %arg2: memref<2x2xi32, #tpu.memory_space<smem>>, %arg3: memref<2xi32, #tpu.memory_space<smem>>) -> (i32, i32) {
    %c0_i32 = arith.constant 0 : i32
    %c0_i32_0 = arith.constant 0 : i32
    %c0_i32_1 = arith.constant 0 : i32
    return %c0_i32, %c0_i32_0 : i32, i32
  }
  func.func @transform_7(%arg0: i32, %arg1: i32, %arg2: memref<2x2xi32, #tpu.memory_space<smem>>, %arg3: memref<2xi32, #tpu.memory_space<smem>>) -> (i32, i32) {
    %c0_i32 = arith.constant 0 : i32
    %c0_i32_0 = arith.constant 0 : i32
    return %arg0, %c0_i32 : i32, i32
  }
}

</mosaic_0001>

<bundles_post_ra>
// kernel: graphsage_forward.5
= control target key start
LH: loop header
LB: loop body
LE: loop exit
PB: predicated region body
PF: predicated region fallthrough
CT: control target
= control target key end

     0   :  { %s3459_s0 = inlined_call_operand.vmem [shape: s32[2,2], index: 0, kind: input, shape index: {}]   ;;  %s3460_s2 = inlined_call_operand.vmem [shape: bf16[512,512], index: 2, kind: input, shape index: {}]   ;;  %s3461_s3 = inlined_call_operand.vmem [shape: bf16[512,128], index: 3, kind: input, shape index: {}, may-alias: {3,4}]   ;;  %s3462_s4 = inlined_call_operand.vmem [shape: bf16[512,128], index: 4, kind: input, shape index: {}, may-alias: {3,4}]   ;;  %s3463_s5 = inlined_call_operand.vmem [shape: f32[512,1], index: 5, kind: input, shape index: {}]   ;;  %s3464_s6 = inlined_call_operand.vmem [shape: bf16[128,128], index: 6, kind: input, shape index: {}]   ;;  %s3465_s7 = inlined_call_operand.vmem [shape: bf16[128,128], index: 7, kind: input, shape index: {}]   ;;  %s3466_s8 = inlined_call_operand.vmem [shape: f32[1,128], index: 8, kind: input, shape index: {}]   ;;  %s3467_s9 = inlined_call_operand.vmem [shape: f32[512,128], index: 9, kind: output, shape index: {}]   ;;  %s3468_s1 = inlined_call_operand.vmem [shape: s32[2], index: 1, kind: input, shape index: {}]  }
   0x1   :  { %3471 = sst [smem:[#allocation11_spill]] %s3460_s2  ;;  %s14_s11 = sshll.u32 %s3459_s0, 4  ;;  %s15_s11 = int_to_ptr.vmem [resolvable:$true] %s14_s11 }
   0x2   :  { %s18_s14 = sshll.u32 %s3468_s1, 4  ;;  %s2919_s15 = scalar_lea.vmem %s15_s11, 32  ;;  %s19_s14 = int_to_ptr.vmem [resolvable:$true] %s18_s14 }
   0x3   :  { %p2920_p0 = scmp.ne.s32.totalorder %s15_s11, %s2919_s15  ;;  %p2924_p1 = scmp.lt.s32.totalorder %s15_s11, %s15_s11 }
   0x4   :  { %p2925_p2 = scmp.lt.s32.totalorder %s2919_s15, %s2919_s15 }
   0x6   :  { %p2926_p3 = por %p2925_p2, %p2924_p1 }
   0x8   :  { %p2927_p4 = pnand %p2926_p3, %p2920_p0 }
   0xa   :  { %2930 = shalt.err (!%p2927_p4)  }
   0xb   :  { %s3001_s16 = smov [#allocation5]   ;;  %s2931_s17 = scalar_lea.vmem %s19_s14, 16 }
   0xc   :  { %17 = dma.vmem_to_smem %s15_s11, 32, %s3001_s16, [#allocation4] }
   0xd   :  { %p2932_p5 = scmp.ne.s32.totalorder %s19_s14, %s2931_s17  ;;  %p2936_p6 = scmp.lt.s32.totalorder %s19_s14, %s19_s14 }
   0xe   :  { %p2937_p7 = scmp.lt.s32.totalorder %s2931_s17, %s2931_s17 }
  0x10   :  { %p2938_p8 = por %p2937_p7, %p2936_p6 }
  0x12   :  { %p2939_p9 = pnand %p2938_p8, %p2932_p5 }
  0x14   :  { %2942 = shalt.err (!%p2939_p9)  }
  0x15   :  { %s3002_s0 = smov [#allocation6]  }
  0x16   :  { %21 = dma.vmem_to_smem %s19_s14, 16, %s3002_s0, [#allocation4] }
  0x17   :  { %2971 = dma.done.wait [#allocation4], 48 }
  0x18   :  { %2972 = vsyncadd [#allocation4], 4294967248 }
  0x19   :  { %23 = sfence }
  0x1a   :  { %s3061_s1 = smov 0   ;;  %s3063_s18 = smov 0  }
  0x1b   :  { %s3065_s19 = smov 0   ;;  %s3067_s20 = smov 0  }
  0x1c   :  { %s3069_s21 = smov 0   ;;  %s3071_s22 = smov 0  }
  0x1d   :  { %s3073_s23 = smov 0  }
  0x1e LB: > { %s38_s24 = sadd.s32 1, %s2991_s21  ;;  %s41_s25 = sadd.s32 1, %s2995_s22  ;;  %s2999_s23 = sphi %s3073_s23, %s29_s23   ;;  %s2995_s22 = sphi %s3071_s22, %s3482_s22   ;;  %s2991_s21 = sphi %s3069_s21, %s3481_s21   ;;  %s2987_s20 = sphi %s3067_s20, %s3480_s20   ;;  %s2983_s19 = sphi %s3065_s19, %s3479_s19   ;;  %s2979_s18 = sphi %s3063_s18, %s3478_s18   ;;  %s2975_s1 = sphi %s3061_s1, %s3477_s1  }
  0x1f   : > { %p39_p10 = scmp.ge.s32.totalorder %s38_s24, 2  ;;  %s45_s26 = sshra.s32 %s2991_s21, 7 }
  0x20   : > { %s47_s27 = sadd.s32 %s2995_s22, %s45_s26  ;;  %s50_s28 = sand.u32 127, %s2991_s21 }
  0x21   : > { %s3484_s24 = smov (%p39_p10, %s38_s24), 0  ;;  %s3486_s25 = smov (!%p39_p10, %s41_s25), %s2995_s22 }
  0x22   : > { %3472 = sst [smem:[#allocation9_spill]] %s3484_s24  ;;  %s2347_s29 = sshll.u32 %s47_s27, 7 }
  0x23   : > { %p43_p11 = scmp.ge.s32.totalorder %s3486_s25, 2  ;;  %s51_s30 = sadd.s32 %s2347_s29, %s50_s28 }
  0x24   : > { %s53_s10 = sshra.s32 %s3484_s24, 7  ;;  %s58_s11 = sand.u32 127, %s3484_s24 }
  0x25   : > { %s3488_s25 = smov (%p43_p11, %s3486_s25), 0  ;;  %p73_p12 = scmp.ne.s32.totalorder %s2979_s18, %s2975_s1 }
  0x26   : > { %3473 = sst [smem:[#allocation10_spill]] %s3488_s25  ;;  %s55_s13 = sadd.s32 %s53_s10, %s3488_s25 }
  0x27   : > { %s52_s12 = sld [smem:[#allocation5 + %s51_s30]]  ;;  %s2348_s14 = sshll.u32 %s55_s13, 7 }
  0x28   : > { %p74_p13 = scmp.eq.s32.totalorder %s2999_s23, 0  ;;  %s59_s15 = sadd.s32 %s2348_s14, %s58_s11 }
  0x29   : > { %s60_s16 = sld [smem:[#allocation5 + %s59_s15]]  ;;  %s61_s17 = ssub.s32 %s2995_s22, %s3488_s25 }
  0x2a   : > { %p75_p0 = por %p74_p13, %p73_p12  ;;  %s66_s27 = sadd.s32 1, %s2979_s18 }
  0x2b   : > { %p2352_p2 = scmp.ge.s32.totalorder %s2999_s23, 4 }
  0x2d   : > { %291 = sbr.rel (%p2352_p2) target bundleno = 79 (0x4f), region = 28 }
  0x2f   : > { %s62_s0 = ssub.s32 %s52_s12, %s60_s16 }
  0x30   : > { %s63_s26 = sor.u32 %s62_s0, %s61_s17 }
  0x31   : > { %p64_p1 = scmp.eq.s32.totalorder %s63_s26, 0 }
  0x33   : > { %s3116_s28 = scalar_select %p64_p1, %s2979_s18, %s66_s27  }
  0x34   : > { %294 = sbr.rel (!%p75_p0) target bundleno = 79 (0x4f), region = 32  ;;  %s306_s29 = sld [smem:[#allocation5 + %s51_s30]] (%p75_p0) }
  0x35   : > { %s296_s10 = sand.u32 (%p75_p0), 1, %s2979_s18   ;;  %s2456_s13 = sshll.u32 (%p75_p0), %s2995_s22, 7 }
  0x36   : > { %s2353_s24 = sshll.u32 (%p75_p0), %s296_s10, 8  ;;  %s3474_s2 = sld [smem:[#allocation11_spill]] (%p75_p0) }
  0x37   : > { %s3129_s30 = scalar_lea.vmem (%p75_p0), [#allocation7], %s2353_s24 }
  0x3a   : > { %s2356_s11 = sshll.u32 (%p75_p0), %s306_s29, 1 }
  0x3b   : > { %s310_s14 = sadd.s32 %s2456_s13, %s2356_s11 }
  0x3c   : > { %s2358_s15 = sshll.u32 %s310_s14, 2 }
  0x3d   : > { %s3124_s16 = scalar_lea.vmem %s3474_s2, %s2358_s15 }
  0x3e   : > { %v402_v0 = vld [vmem:[%s3124_s16] sm:$0xff]  ;;  %v404_v1 = vld [vmem:[%s3124_s16 + $0x10] sm:$0xff] }
  0x3f   : > { %v406_v2 = vld [vmem:[%s3124_s16 + $0x20] sm:$0xff]  ;;  %403 = vst [vmem:[%s3129_s30] sm:$0xff] %v402_v0  ;;  %405 = vst [vmem:[%s3129_s30 + $0x8] sm:$0xff] %v404_v1  ;;  %v408_v3 = vld [vmem:[%s3124_s16 + $0x30] sm:$0xff] }
  0x40   : > { %407 = vst [vmem:[%s3129_s30 + $0x10] sm:$0xff] %v406_v2  ;;  %v410_v4 = vld [vmem:[%s3124_s16 + $0x40] sm:$0xff]  ;;  %v412_v5 = vld [vmem:[%s3124_s16 + $0x50] sm:$0xff]  ;;  %409 = vst [vmem:[%s3129_s30 + $0x18] sm:$0xff] %v408_v3 }
  0x41   : > { %411 = vst [vmem:[%s3129_s30 + $0x20] sm:$0xff] %v410_v4  ;;  %413 = vst [vmem:[%s3129_s30 + $0x28] sm:$0xff] %v412_v5  ;;  %v414_v6 = vld [vmem:[%s3124_s16 + $0x60] sm:$0xff]  ;;  %v416_v7 = vld [vmem:[%s3124_s16 + $0x70] sm:$0xff] }
  0x42   : > { %v418_v8 = vld [vmem:[%s3124_s16 + $0x80] sm:$0xff]  ;;  %415 = vst [vmem:[%s3129_s30 + $0x30] sm:$0xff] %v414_v6  ;;  %417 = vst [vmem:[%s3129_s30 + $0x38] sm:$0xff] %v416_v7  ;;  %v420_v9 = vld [vmem:[%s3124_s16 + $0x90] sm:$0xff] }
  0x43   : > { %419 = vst [vmem:[%s3129_s30 + $0x40] sm:$0xff] %v418_v8  ;;  %v422_v10 = vld [vmem:[%s3124_s16 + $0xa0] sm:$0xff]  ;;  %v424_v11 = vld [vmem:[%s3124_s16 + $0xb0] sm:$0xff]  ;;  %421 = vst [vmem:[%s3129_s30 + $0x48] sm:$0xff] %v420_v9 }
  0x44   : > { %423 = vst [vmem:[%s3129_s30 + $0x50] sm:$0xff] %v422_v10  ;;  %425 = vst [vmem:[%s3129_s30 + $0x58] sm:$0xff] %v424_v11  ;;  %v426_v12 = vld [vmem:[%s3124_s16 + $0xc0] sm:$0xff]  ;;  %v428_v13 = vld [vmem:[%s3124_s16 + $0xd0] sm:$0xff] }
  0x45   : > { %v430_v14 = vld [vmem:[%s3124_s16 + $0xe0] sm:$0xff]  ;;  %427 = vst [vmem:[%s3129_s30 + $0x60] sm:$0xff] %v426_v12  ;;  %429 = vst [vmem:[%s3129_s30 + $0x68] sm:$0xff] %v428_v13  ;;  %v432_v15 = vld [vmem:[%s3124_s16 + $0xf0] sm:$0xff] }
  0x46   : > { %431 = vst [vmem:[%s3129_s30 + $0x70] sm:$0xff] %v430_v14  ;;  %v434_v16 = vld [vmem:[%s3124_s16 + $0x100] sm:$0xff]  ;;  %v436_v17 = vld [vmem:[%s3124_s16 + $0x110] sm:$0xff]  ;;  %433 = vst [vmem:[%s3129_s30 + $0x78] sm:$0xff] %v432_v15 }
  0x47   : > { %435 = vst [vmem:[%s3129_s30 + $0x80] sm:$0xff] %v434_v16  ;;  %437 = vst [vmem:[%s3129_s30 + $0x88] sm:$0xff] %v436_v17  ;;  %v438_v18 = vld [vmem:[%s3124_s16 + $0x120] sm:$0xff]  ;;  %v440_v19 = vld [vmem:[%s3124_s16 + $0x130] sm:$0xff] }
  0x48   : > { %v442_v20 = vld [vmem:[%s3124_s16 + $0x140] sm:$0xff]  ;;  %439 = vst [vmem:[%s3129_s30 + $0x90] sm:$0xff] %v438_v18  ;;  %441 = vst [vmem:[%s3129_s30 + $0x98] sm:$0xff] %v440_v19  ;;  %v444_v21 = vld [vmem:[%s3124_s16 + $0x150] sm:$0xff] }
  0x49   : > { %443 = vst [vmem:[%s3129_s30 + $0xa0] sm:$0xff] %v442_v20  ;;  %v446_v22 = vld [vmem:[%s3124_s16 + $0x160] sm:$0xff]  ;;  %v448_v23 = vld [vmem:[%s3124_s16 + $0x170] sm:$0xff]  ;;  %445 = vst [vmem:[%s3129_s30 + $0xa8] sm:$0xff] %v444_v21 }
  0x4a   : > { %447 = vst [vmem:[%s3129_s30 + $0xb0] sm:$0xff] %v446_v22  ;;  %449 = vst [vmem:[%s3129_s30 + $0xb8] sm:$0xff] %v448_v23  ;;  %v450_v24 = vld [vmem:[%s3124_s16 + $0x180] sm:$0xff]  ;;  %v452_v25 = vld [vmem:[%s3124_s16 + $0x190] sm:$0xff] }
  0x4b   : > { %v454_v26 = vld [vmem:[%s3124_s16 + $0x1a0] sm:$0xff]  ;;  %451 = vst [vmem:[%s3129_s30 + $0xc0] sm:$0xff] %v450_v24  ;;  %453 = vst [vmem:[%s3129_s30 + $0xc8] sm:$0xff] %v452_v25  ;;  %v456_v27 = vld [vmem:[%s3124_s16 + $0x1b0] sm:$0xff] }
  0x4c   : > { %455 = vst [vmem:[%s3129_s30 + $0xd0] sm:$0xff] %v454_v26  ;;  %v458_v28 = vld [vmem:[%s3124_s16 + $0x1c0] sm:$0xff]  ;;  %v460_v29 = vld [vmem:[%s3124_s16 + $0x1d0] sm:$0xff]  ;;  %457 = vst [vmem:[%s3129_s30 + $0xd8] sm:$0xff] %v456_v27 }
  0x4d   : > { %459 = vst [vmem:[%s3129_s30 + $0xe0] sm:$0xff] %v458_v28  ;;  %461 = vst [vmem:[%s3129_s30 + $0xe8] sm:$0xff] %v460_v29  ;;  %v462_v30 = vld [vmem:[%s3124_s16 + $0x1e0] sm:$0xff]  ;;  %v464_v31 = vld [vmem:[%s3124_s16 + $0x1f0] sm:$0xff] }
  0x4e   : > { %463 = vst [vmem:[%s3129_s30 + $0xf0] sm:$0xff] %v462_v30  ;;  %465 = vst [vmem:[%s3129_s30 + $0xf8] sm:$0xff] %v464_v31 }
  0x4f PF: > { %p2359_p3 = scmp.ge.s32.totalorder %s2999_s23, 1  ;;  %p513_p4 = scmp.lt.s32.totalorder %s2999_s23, 5 }
  0x51   : > { %p514_p5 = pnand %p2359_p3, %p513_p4 }
  0x52   : > { %s520_s24 = sand.u32 (!%p514_p5), 1, %s2975_s1   ;;  %s584_s25 = sshra.s32 (!%p514_p5), %s2983_s19, 7 }
  0x53   : > { %517 = sbr.rel (%p514_p5) target bundleno = 1094 (0x446), region = 82  ;;  %s2360_s17 = sshll.u32 (!%p514_p5), %s520_s24, 8 }
  0x54   : > { %s586_s0 = sadd.s32 (!%p514_p5), %s2987_s20, %s584_s25  ;;  %s589_s27 = sand.u32 (!%p514_p5), 127, %s2983_s19 }
  0x55   : > { %s2361_s26 = sshll.u32 (!%p514_p5), %s586_s0, 7  ;;  %s2364_s29 = sshll.u32 (!%p514_p5), %s2987_s20, 5 }
  0x56   : > { %s590_s10 = sadd.s32 (!%p514_p5), %s2361_s26, %s589_s27  ;;  %p607_p6 = scmp.lt.s32.totalorder (!%p514_p5), %s2364_s29, 63 }
  0x57   : > { %s591_s13 = sld [smem:[#allocation5 + %s590_s10]] (!%p514_p5)  ;;  %p2370_p8 = scmp.ne.s32.totalorder (!%p514_p5), %s2983_s19, 0 }
  0x5a   : > { %s3490_s29 = smov (!%p607_p6, %s2364_s29), 63  ;;  %v2821_v32 = vld [vmem:[%s3465_s7] sm:$0xff] (!%p2370_p8)   ;;  %v3003_v33 = vmov (!%p2370_p8), 0.0   ;;  %v2822_v34 = vld [vmem:[%s3465_s7 + $0x8] sm:$0xff] (!%p2370_p8)   ;;  %v2823_v35 = vld [vmem:[%s3465_s7 + $0x10] sm:$0xff] (!%p2370_p8)  }
  0x5b   : > { %s2365_s11 = sshll.u32 %s3490_s29, 2  ;;  %s2367_s14 = sshll.u32 %s3490_s29, 3  ;;  %629 = vst [vmem:[#allocation2] sm:$0xff] (!%p2370_p8), %v3003_v33  ;;  %630 = vst [vmem:[#allocation2 + $0x8] sm:$0xff] (!%p2370_p8), %v3003_v33  ;;  %2617 = vmatprep.subr.bf16.mxu0 (!%p2370_p8), %v2821_v32  ;;  %2713 = vmatprep.subr.bf16.mxu1 (!%p2370_p8), %v2821_v32  ;;  %v2824_v36 = vld [vmem:[%s3465_s7 + $0x18] sm:$0xff] (!%p2370_p8)   ;;  %v2825_v39 = vld [vmem:[%s3465_s7 + $0x20] sm:$0xff] (!%p2370_p8)  }
  0x5c   : > { %s3202_s16 = scalar_lea.vmem %s3462_s4, %s2365_s11  ;;  %s3207_s1 = scalar_lea.vmem %s3463_s5, %s2367_s14  ;;  %631 = vst [vmem:[#allocation2 + $0x10] sm:$0xff] (!%p2370_p8), %v3003_v33  ;;  %632 = vst [vmem:[#allocation2 + $0x18] sm:$0xff] (!%p2370_p8), %v3003_v33  ;;  %2618 = vmatpush3.bf16.msra.mxu0 (!%p2370_p8), %v2821_v32  ;;  %2721 = vmatpush3.bf16.msra.mxu1 (!%p2370_p8), %v2821_v32  ;;  %v2826_v40 = vld [vmem:[%s3465_s7 + $0x28] sm:$0xff] (!%p2370_p8)   ;;  %v2827_v41 = vld [vmem:[%s3465_s7 + $0x30] sm:$0xff] (!%p2370_p8)  }
  0x5d   : > { %s3212_s0 = scalar_lea.vmem %s3467_s9, %s2367_s14  ;;  %s2362_s26 = sshll.u32 %s591_s13, 5  ;;  %633 = vst [vmem:[#allocation2 + $0x20] sm:$0xff] (!%p2370_p8), %v3003_v33  ;;  %634 = vst [vmem:[#allocation2 + $0x28] sm:$0xff] (!%p2370_p8), %v3003_v33  ;;  %2619 = vmatprep.subr.bf16.mxu0 (!%p2370_p8), %v2822_v34  ;;  %2714 = vmatprep.subr.bf16.mxu1 (!%p2370_p8), %v2822_v34  ;;  %v2829_v37 = vld [vmem:[%s3202_s16] sm:$0xff] (!%p2370_p8)   ;;  %v2828_v42 = vld [vmem:[%s3465_s7 + $0x38] sm:$0xff] (!%p2370_p8)  }
  0x5e   : > { %p593_p7 = scmp.lt.s32.totalorder %s2362_s26, 63  ;;  %s3219_s11 = scalar_lea.vmem [#allocation7], %s2360_s17  ;;  %635 = vst [vmem:[#allocation2 + $0x30] sm:$0xff] (!%p2370_p8), %v3003_v33  ;;  %636 = vst [vmem:[#allocation2 + $0x38] sm:$0xff] (!%p2370_p8), %v3003_v33  ;;  %v2830_v38 = vld [vmem:[%s3202_s16 + $0x40] sm:$0xff] (!%p2370_p8)   ;;  %2633 = vmatprep.mubr.bf16.mxu0 (!%p2370_p8), %v2829_v37  ;;  %v2831_v43 = vld [vmem:[%s3202_s16 + $0x8] sm:$0xff] (!%p2370_p8)  }
  0x5f   : > { %628 = sbr.rel (%p2370_p8) target bundleno = 363 (0x16b), region = 90  ;;  %637 = vst [vmem:[#allocation2 + $0x40] sm:$0xff] (!%p2370_p8), %v3003_v33  ;;  %638 = vst [vmem:[#allocation2 + $0x48] sm:$0xff] (!%p2370_p8), %v3003_v33  ;;  %2649 = vmatprep.mubr.bf16.mxu1 (!%p2370_p8), %v2830_v38  ;;  %v2832_v44 = vld [vmem:[%s3202_s16 + $0x48] sm:$0xff] (!%p2370_p8)   ;;  %v2833_v45 = vld [vmem:[%s3202_s16 + $0x10] sm:$0xff] (!%p2370_p8)  }
  0x60   : > { %s3492_s26 = smov (!%p593_p7, %s2362_s26), 63  ;;  %639 = vst [vmem:[#allocation2 + $0x50] sm:$0xff] (!%p2370_p8), %v3003_v33  ;;  %640 = vst [vmem:[#allocation2 + $0x58] sm:$0xff] (!%p2370_p8), %v3003_v33  ;;  %2620 = vmatpush3.bf16.msra.mxu0 (!%p2370_p8), %v2822_v34  ;;  %2722 = vmatpush3.bf16.msra.mxu1 (!%p2370_p8), %v2822_v34  ;;  %v2834_v46 = vld [vmem:[%s3202_s16 + $0x50] sm:$0xff] (!%p2370_p8)   ;;  %v2835_v47 = vld [vmem:[%s3202_s16 + $0x18] sm:$0xff] (!%p2370_p8)  }
  0x61   : > { %s2363_s27 = sshll.u32 %s3492_s26, 2  ;;  %641 = vst [vmem:[#allocation2 + $0x60] sm:$0xff] (!%p2370_p8), %v3003_v33  ;;  %642 = vst [vmem:[#allocation2 + $0x68] sm:$0xff] (!%p2370_p8), %v3003_v33  ;;  %2621 = vmatprep.subr.bf16.mxu0 (!%p2370_p8), %v2823_v35  ;;  %2715 = vmatprep.subr.bf16.mxu1 (!%p2370_p8), %v2823_v35  ;;  %v2836_v48 = vld [vmem:[%s3202_s16 + $0x58] sm:$0xff] (!%p2370_p8)   ;;  %v2837_v49 = vld [vmem:[%s3202_s16 + $0x20] sm:$0xff] (!%p2370_p8)  }
  0x62   : > { %s3217_s15 = scalar_lea.vmem %s3461_s3, %s2363_s27  ;;  %643 = vst [vmem:[#allocation2 + $0x70] sm:$0xff] (!%p2370_p8), %v3003_v33  ;;  %644 = vst [vmem:[#allocation2 + $0x78] sm:$0xff] (!%p2370_p8), %v3003_v33  ;;  %v2838_v50 = vld [vmem:[%s3202_s16 + $0x60] sm:$0xff] (!%p2370_p8)   ;;  %v2839_v51 = vld [vmem:[%s3202_s16 + $0x28] sm:$0xff] (!%p2370_p8)  }
  0x63   : > { %645 = vst [vmem:[#allocation2 + $0x80] sm:$0xff] (!%p2370_p8), %v3003_v33  ;;  %646 = vst [vmem:[#allocation2 + $0x88] sm:$0xff] (!%p2370_p8), %v3003_v33  ;;  %v2840_v52 = vld [vmem:[%s3202_s16 + $0x68] sm:$0xff] (!%p2370_p8)   ;;  %v2841_v53 = vld [vmem:[%s3202_s16 + $0x30] sm:$0xff] (!%p2370_p8)  }
  0x64   : > { %647 = vst [vmem:[#allocation2 + $0x90] sm:$0xff] (!%p2370_p8), %v3003_v33  ;;  %648 = vst [vmem:[#allocation2 + $0x98] sm:$0xff] (!%p2370_p8), %v3003_v33  ;;  %2622 = vmatpush3.bf16.msra.mxu0 (!%p2370_p8), %v2823_v35  ;;  %2723 = vmatpush3.bf16.msra.mxu1 (!%p2370_p8), %v2823_v35  ;;  %v2842_v54 = vld [vmem:[%s3202_s16 + $0x70] sm:$0xff] (!%p2370_p8)   ;;  %v2843_v55 = vld [vmem:[%s3202_s16 + $0x38] sm:$0xff] (!%p2370_p8)  }
  0x65   : > { %649 = vst [vmem:[#allocation2 + $0xa0] sm:$0xff] (!%p2370_p8), %v3003_v33  ;;  %650 = vst [vmem:[#allocation2 + $0xa8] sm:$0xff] (!%p2370_p8), %v3003_v33  ;;  %2623 = vmatprep.subr.bf16.mxu0 (!%p2370_p8), %v2824_v36  ;;  %2716 = vmatprep.subr.bf16.mxu1 (!%p2370_p8), %v2824_v36  ;;  %v2844_v56 = vld [vmem:[%s3202_s16 + $0x78] sm:$0xff] (!%p2370_p8)  }
  0x66   : > { %651 = vst [vmem:[#allocation2 + $0xb0] sm:$0xff] %v3003_v33  ;;  %652 = vst [vmem:[#allocation2 + $0xb8] sm:$0xff] %v3003_v33 }
  0x67   : > { %653 = vst [vmem:[#allocation2 + $0xc0] sm:$0xff] %v3003_v33  ;;  %654 = vst [vmem:[#allocation2 + $0xc8] sm:$0xff] %v3003_v33 }
  0x68   : > { %655 = vst [vmem:[#allocation2 + $0xd0] sm:$0xff] %v3003_v33  ;;  %656 = vst [vmem:[#allocation2 + $0xd8] sm:$0xff] %v3003_v33  ;;  %2624 = vmatpush3.bf16.msra.mxu0 %v2824_v36  ;;  %2724 = vmatpush3.bf16.msra.mxu1 %v2824_v36 }
  0x69   : > { %657 = vst [vmem:[#allocation2 + $0xe0] sm:$0xff] %v3003_v33  ;;  %658 = vst [vmem:[#allocation2 + $0xe8] sm:$0xff] %v3003_v33  ;;  %2625 = vmatprep.subr.bf16.mxu0 %v2825_v39  ;;  %2717 = vmatprep.subr.bf16.mxu1 %v2825_v39 }
  0x6a   : > { %659 = vst [vmem:[#allocation2 + $0xf0] sm:$0xff] %v3003_v33  ;;  %660 = vst [vmem:[#allocation2 + $0xf8] sm:$0xff] %v3003_v33 }
  0x6c   : > { %2626 = vmatpush3.bf16.msra.mxu0 %v2825_v39  ;;  %2725 = vmatpush3.bf16.msra.mxu1 %v2825_v39 }
  0x6d   : > { %2627 = vmatprep.subr.bf16.mxu0 %v2826_v40  ;;  %2718 = vmatprep.subr.bf16.mxu1 %v2826_v40 }
  0x70   : > { %2628 = vmatpush3.bf16.msra.mxu0 %v2826_v40  ;;  %2726 = vmatpush3.bf16.msra.mxu1 %v2826_v40 }
  0x71   : > { %2629 = vmatprep.subr.bf16.mxu0 %v2827_v41  ;;  %2719 = vmatprep.subr.bf16.mxu1 %v2827_v41 }
  0x74   : > { %2630 = vmatpush3.bf16.msra.mxu0 %v2827_v41  ;;  %2727 = vmatpush3.bf16.msra.mxu1 %v2827_v41 }
  0x75   : > { %2631 = vmatprep.subr.bf16.mxu0 %v2828_v42  ;;  %2720 = vmatprep.subr.bf16.mxu1 %v2828_v42 }
  0x78   : > { %2632 = vmatpush3.bf16.msra.mxu0 %v2828_v42  ;;  %2728 = vmatpush3.bf16.msra.mxu1 %v2828_v42 }
  0x7b   : > { %2634 = vmatmul.mubr.bf16.vlgmr.msra.gmra.mrb[0].mxu0 %v2831_v43  ;;  %2650 = vmatmul.mubr.bf16.vlgmr.msra.gmra.mrb[0].mxu1 %v2832_v44 }
  0x7c   : > { %2637 = vmatprep.mubr.bf16.mxu0 %v2833_v45  ;;  %2653 = vmatprep.mubr.bf16.mxu1 %v2834_v46 }
  0x83   : > { %2638 = vmatmul.mubr.bf16.gmra.mrb[4].mxu0 %v2835_v47  ;;  %2654 = vmatmul.mubr.bf16.gmra.mrb[4].mxu1 %v2836_v48 }
  0x84   : > { %2641 = vmatprep.mubr.bf16.mxu0 %v2837_v49  ;;  %2657 = vmatprep.mubr.bf16.mxu1 %v2838_v50 }
  0x8b   : > { %2642 = vmatmul.mubr.bf16.gmra.mrb[8].mxu0 %v2839_v51  ;;  %2658 = vmatmul.mubr.bf16.gmra.mrb[8].mxu1 %v2840_v52 }
  0x8c   : > { %2645 = vmatprep.mubr.bf16.mxu0 %v2841_v53  ;;  %2661 = vmatprep.mubr.bf16.mxu1 %v2842_v54 }
  0x93   : > { %2646 = vmatmul.mubr.bf16.gmra.mrb[12].mxu0 %v2843_v55  ;;  %2662 = vmatmul.mubr.bf16.gmra.mrb[12].mxu1 %v2844_v56 }
 0x14e   : > { %v2635_v57 = vpop.f32.mrb[0].mxu0  ;;  %v2651_v58 = vpop.f32.mrb[0].mxu1 }
 0x14f   : > { %1016 = vst [vmem:[#allocation3 + $0x10] sm:$0xff] %v2635_v57  ;;  %1032 = vst [vmem:[#allocation3 + $0x90] sm:$0xff] %v2651_v58  ;;  %v887_v59 = vpop.f32.mrb[1].mxu0  ;;  %v951_v60 = vpop.f32.mrb[1].mxu1 }
 0x150   : > { %1014 = vst [vmem:[#allocation3] sm:$0xff] %v887_v59  ;;  %1030 = vst [vmem:[#allocation3 + $0x80] sm:$0xff] %v951_v60  ;;  %v2636_v61 = vpop.f32.mrb[2].mxu0  ;;  %v2652_v62 = vpop.f32.mrb[2].mxu1 }
 0x151   : > { %1017 = vst [vmem:[#allocation3 + $0x18] sm:$0xff] %v2636_v61  ;;  %1033 = vst [vmem:[#allocation3 + $0x98] sm:$0xff] %v2652_v62  ;;  %v890_v63 = vpop.f32.mrb[3].mxu0  ;;  %v954_v0 = vpop.f32.mrb[3].mxu1 }
 0x152   : > { %1015 = vst [vmem:[#allocation3 + $0x8] sm:$0xff] %v890_v63  ;;  %1031 = vst [vmem:[#allocation3 + $0x88] sm:$0xff] %v954_v0 }
 0x156   : > { %v2639_v1 = vpop.f32.mrb[4].mxu0  ;;  %v2655_v2 = vpop.f32.mrb[4].mxu1 }
 0x157   : > { %1020 = vst [vmem:[#allocation3 + $0x30] sm:$0xff] %v2639_v1  ;;  %1036 = vst [vmem:[#allocation3 + $0xb0] sm:$0xff] %v2655_v2  ;;  %v903_v3 = vpop.f32.mrb[5].mxu0  ;;  %v967_v4 = vpop.f32.mrb[5].mxu1 }
 0x158   : > { %1018 = vst [vmem:[#allocation3 + $0x20] sm:$0xff] %v903_v3  ;;  %1034 = vst [vmem:[#allocation3 + $0xa0] sm:$0xff] %v967_v4  ;;  %v2640_v5 = vpop.f32.mrb[6].mxu0  ;;  %v2656_v6 = vpop.f32.mrb[6].mxu1 }
 0x159   : > { %1021 = vst [vmem:[#allocation3 + $0x38] sm:$0xff] %v2640_v5  ;;  %1037 = vst [vmem:[#allocation3 + $0xb8] sm:$0xff] %v2656_v6  ;;  %v906_v7 = vpop.f32.mrb[7].mxu0  ;;  %v970_v8 = vpop.f32.mrb[7].mxu1 }
 0x15a   : > { %1019 = vst [vmem:[#allocation3 + $0x28] sm:$0xff] %v906_v7  ;;  %1035 = vst [vmem:[#allocation3 + $0xa8] sm:$0xff] %v970_v8 }
 0x15e   : > { %v2643_v9 = vpop.f32.mrb[8].mxu0  ;;  %v2659_v10 = vpop.f32.mrb[8].mxu1 }
 0x15f   : > { %1024 = vst [vmem:[#allocation3 + $0x50] sm:$0xff] %v2643_v9  ;;  %1040 = vst [vmem:[#allocation3 + $0xd0] sm:$0xff] %v2659_v10  ;;  %v919_v11 = vpop.f32.mrb[9].mxu0  ;;  %v983_v12 = vpop.f32.mrb[9].mxu1 }
 0x160   : > { %1022 = vst [vmem:[#allocation3 + $0x40] sm:$0xff] %v919_v11  ;;  %1038 = vst [vmem:[#allocation3 + $0xc0] sm:$0xff] %v983_v12  ;;  %v2644_v13 = vpop.f32.mrb[10].mxu0  ;;  %v2660_v14 = vpop.f32.mrb[10].mxu1 }
 0x161   : > { %1025 = vst [vmem:[#allocation3 + $0x58] sm:$0xff] %v2644_v13  ;;  %1041 = vst [vmem:[#allocation3 + $0xd8] sm:$0xff] %v2660_v14  ;;  %v922_v15 = vpop.f32.mrb[11].mxu0  ;;  %v986_v16 = vpop.f32.mrb[11].mxu1 }
 0x162   : > { %1023 = vst [vmem:[#allocation3 + $0x48] sm:$0xff] %v922_v15  ;;  %1039 = vst [vmem:[#allocation3 + $0xc8] sm:$0xff] %v986_v16 }
 0x166   : > { %v2647_v17 = vpop.f32.mrb[12].mxu0  ;;  %v2663_v18 = vpop.f32.mrb[12].mxu1 }
 0x167   : > { %1028 = vst [vmem:[#allocation3 + $0x70] sm:$0xff] %v2647_v17  ;;  %1044 = vst [vmem:[#allocation3 + $0xf0] sm:$0xff] %v2663_v18  ;;  %v935_v19 = vpop.f32.mrb[13].mxu0  ;;  %v999_v20 = vpop.f32.mrb[13].mxu1 }
 0x168   : > { %1026 = vst [vmem:[#allocation3 + $0x60] sm:$0xff] %v935_v19  ;;  %1042 = vst [vmem:[#allocation3 + $0xe0] sm:$0xff] %v999_v20  ;;  %v2648_v21 = vpop.f32.mrb[14].mxu0  ;;  %v2664_v22 = vpop.f32.mrb[14].mxu1 }
 0x169   : > { %1029 = vst [vmem:[#allocation3 + $0x78] sm:$0xff] %v2648_v21  ;;  %1045 = vst [vmem:[#allocation3 + $0xf8] sm:$0xff] %v2664_v22  ;;  %v938_v23 = vpop.f32.mrb[15].mxu0  ;;  %v1002_v24 = vpop.f32.mrb[15].mxu1 }
 0x16a   : > { %1027 = vst [vmem:[#allocation3 + $0x68] sm:$0xff] %v938_v23  ;;  %1043 = vst [vmem:[#allocation3 + $0xe8] sm:$0xff] %v1002_v24 }
 0x16b PF: > { %s1046_s16 = sld [smem:[#allocation6 + %s2987_s20]] }
 0x171   : > { %p2395_p9 = scmp.ge.s32.totalorder %s2983_s19, %s1046_s16 }
 0x172   : > { %v2845_v25 = vld [vmem:[%s3217_s15 + $0x40] sm:$0xff] (!%p2395_p9)   ;;  %v2847_v27 = vld [vmem:[%s3217_s15 + $0x48] sm:$0xff] (!%p2395_p9)   ;;  %v2849_v29 = vld [vmem:[%s3217_s15 + $0x50] sm:$0xff] (!%p2395_p9)  }
 0x173   : > { %1050 = sbr.rel (%p2395_p9) target bundleno = 679 (0x2a7), region = 94  ;;  %v2846_v26 = vld [vmem:[%s3217_s15] sm:$0xff] (!%p2395_p9)   ;;  %2481 = vmatprep.subr.bf16.mxu0 (!%p2395_p9), %v2845_v25  ;;  %2729 = vmatprep.subr.bf16.mxu1 (!%p2395_p9), %v2845_v25  ;;  %v2848_v28 = vld [vmem:[%s3217_s15 + $0x8] sm:$0xff] (!%p2395_p9)   ;;  %v2850_v30 = vld [vmem:[%s3217_s15 + $0x10] sm:$0xff] (!%p2395_p9)  }
 0x174   : > { %2482 = vmatpush3.bf16.msra.mxu0 (!%p2395_p9), %v2846_v26  ;;  %2737 = vmatpush3.bf16.msra.mxu1 (!%p2395_p9), %v2846_v26  ;;  %v2851_v31 = vld [vmem:[%s3217_s15 + $0x58] sm:$0xff] (!%p2395_p9)   ;;  %v2853_v33 = vld [vmem:[%s3217_s15 + $0x60] sm:$0xff] (!%p2395_p9)   ;;  %v2855_v35 = vld [vmem:[%s3217_s15 + $0x68] sm:$0xff] (!%p2395_p9)  }
 0x175   : > { %2483 = vmatprep.subr.bf16.mxu0 (!%p2395_p9), %v2847_v27  ;;  %2730 = vmatprep.subr.bf16.mxu1 (!%p2395_p9), %v2847_v27  ;;  %v2852_v32 = vld [vmem:[%s3217_s15 + $0x18] sm:$0xff] (!%p2395_p9)   ;;  %v2854_v34 = vld [vmem:[%s3217_s15 + $0x20] sm:$0xff] (!%p2395_p9)   ;;  %v2856_v38 = vld [vmem:[%s3217_s15 + $0x28] sm:$0xff] (!%p2395_p9)  }
 0x176   : > { %v2863_v36 = vld [vmem:[%s3219_s11 + $0x4] ss:$8 sps:$4 sm:$0xff] (!%p2395_p9)   ;;  %v2857_v39 = vld [vmem:[%s3217_s15 + $0x70] sm:$0xff] (!%p2395_p9)   ;;  %v2859_v41 = vld [vmem:[%s3217_s15 + $0x78] sm:$0xff] (!%p2395_p9)  }
 0x177   : > { %v2866_v37 = vld [vmem:[%s3219_s11 + $0x84] ss:$8 sps:$4 sm:$0xff] (!%p2395_p9)   ;;  %1435 = vmatprep.mubr.bf16.mxu0 (!%p2395_p9), %v2863_v36  ;;  %v2858_v40 = vld [vmem:[%s3217_s15 + $0x30] sm:$0xff] (!%p2395_p9)   ;;  %v2860_v42 = vld [vmem:[%s3217_s15 + $0x38] sm:$0xff] (!%p2395_p9)  }
 0x178   : > { %2484 = vmatpush3.bf16.msra.mxu0 (!%p2395_p9), %v2848_v28  ;;  %2738 = vmatpush3.bf16.msra.mxu1 (!%p2395_p9), %v2848_v28  ;;  %v2861_v43 = vld [vmem:[%s3219_s11] ss:$8 sps:$4 sm:$0xff] (!%p2395_p9)   ;;  %v2867_v45 = vld [vmem:[%s3219_s11 + $0x14] ss:$8 sps:$4 sm:$0xff] (!%p2395_p9)   ;;  %v2871_v47 = vld [vmem:[%s3219_s11 + $0x10] ss:$8 sps:$4 sm:$0xff] (!%p2395_p9)  }
 0x179   : > { %2485 = vmatprep.subr.bf16.mxu0 (!%p2395_p9), %v2849_v29  ;;  %2731 = vmatprep.subr.bf16.mxu1 (!%p2395_p9), %v2849_v29  ;;  %v2864_v44 = vld [vmem:[%s3219_s11 + $0x80] ss:$8 sps:$4 sm:$0xff] (!%p2395_p9)   ;;  %v2869_v46 = vld [vmem:[%s3219_s11 + $0x94] ss:$8 sps:$4 sm:$0xff] (!%p2395_p9)   ;;  %v2872_v48 = vld [vmem:[%s3219_s11 + $0x90] ss:$8 sps:$4 sm:$0xff] (!%p2395_p9)  }
 0x17a   : > { %1499 = vmatprep.mubr.bf16.mxu1 %v2866_v37  ;;  %v2873_v49 = vld [vmem:[%s3219_s11 + $0x24] ss:$8 sps:$4 sm:$0xff]   ;;  %v2877_v51 = vld [vmem:[%s3219_s11 + $0x20] ss:$8 sps:$4 sm:$0xff]   ;;  %v2879_v53 = vld [vmem:[%s3219_s11 + $0x34] ss:$8 sps:$4 sm:$0xff]  }
 0x17b   : > { %v2875_v50 = vld [vmem:[%s3219_s11 + $0xa4] ss:$8 sps:$4 sm:$0xff]   ;;  %v2878_v52 = vld [vmem:[%s3219_s11 + $0xa0] ss:$8 sps:$4 sm:$0xff]   ;;  %v2881_v54 = vld [vmem:[%s3219_s11 + $0xb4] ss:$8 sps:$4 sm:$0xff]  }
 0x17c   : > { %2486 = vmatpush3.bf16.msra.mxu0 %v2850_v30  ;;  %2739 = vmatpush3.bf16.msra.mxu1 %v2850_v30  ;;  %v2883_v55 = vld [vmem:[%s3219_s11 + $0x30] ss:$8 sps:$4 sm:$0xff]   ;;  %v2885_v57 = vld [vmem:[%s3219_s11 + $0x44] ss:$8 sps:$4 sm:$0xff]   ;;  %v2889_v59 = vld [vmem:[%s3219_s11 + $0x40] ss:$8 sps:$4 sm:$0xff]  }
 0x17d   : > { %2487 = vmatprep.subr.bf16.mxu0 %v2851_v31  ;;  %2732 = vmatprep.subr.bf16.mxu1 %v2851_v31  ;;  %v2884_v56 = vld [vmem:[%s3219_s11 + $0xb0] ss:$8 sps:$4 sm:$0xff]   ;;  %v2887_v58 = vld [vmem:[%s3219_s11 + $0xc4] ss:$8 sps:$4 sm:$0xff]   ;;  %v2890_v60 = vld [vmem:[%s3219_s11 + $0xc0] ss:$8 sps:$4 sm:$0xff]  }
 0x17e   : > { %v2891_v61 = vld [vmem:[%s3219_s11 + $0x54] ss:$8 sps:$4 sm:$0xff]   ;;  %v2895_v63 = vld [vmem:[%s3219_s11 + $0x50] ss:$8 sps:$4 sm:$0xff]   ;;  %v2897_v1 = vld [vmem:[%s3219_s11 + $0x64] ss:$8 sps:$4 sm:$0xff]  }
 0x17f   : > { %v2893_v62 = vld [vmem:[%s3219_s11 + $0xd4] ss:$8 sps:$4 sm:$0xff]   ;;  %v2896_v0 = vld [vmem:[%s3219_s11 + $0xd0] ss:$8 sps:$4 sm:$0xff]   ;;  %v2899_v2 = vld [vmem:[%s3219_s11 + $0xe4] ss:$8 sps:$4 sm:$0xff]  }
 0x180   : > { %2488 = vmatpush3.bf16.msra.mxu0 %v2852_v32  ;;  %2740 = vmatpush3.bf16.msra.mxu1 %v2852_v32  ;;  %v2901_v3 = vld [vmem:[%s3219_s11 + $0x60] ss:$8 sps:$4 sm:$0xff]   ;;  %v2903_v5 = vld [vmem:[%s3219_s11 + $0x74] ss:$8 sps:$4 sm:$0xff]   ;;  %v2907_v7 = vld [vmem:[%s3219_s11 + $0x70] ss:$8 sps:$4 sm:$0xff]  }
 0x181   : > { %2489 = vmatprep.subr.bf16.mxu0 %v2853_v33  ;;  %2733 = vmatprep.subr.bf16.mxu1 %v2853_v33  ;;  %v2902_v4 = vld [vmem:[%s3219_s11 + $0xe0] ss:$8 sps:$4 sm:$0xff]   ;;  %v2905_v6 = vld [vmem:[%s3219_s11 + $0xf4] ss:$8 sps:$4 sm:$0xff]   ;;  %v2908_v8 = vld [vmem:[%s3219_s11 + $0xf0] ss:$8 sps:$4 sm:$0xff]  }
 0x182   : > { %v1051_v11 = vld [vmem:[#allocation2] sm:$0xff]  ;;  %v1052_v19 = vld [vmem:[#allocation2 + $0x8] sm:$0xff]  ;;  %v1053_v31 = vld [vmem:[#allocation2 + $0x10] sm:$0xff] }
 0x183   : > { %v1067_v13 = vld [vmem:[#allocation2 + $0x80] sm:$0xff]  ;;  %v1068_v21 = vld [vmem:[#allocation2 + $0x88] sm:$0xff]  ;;  %v1069_v33 = vld [vmem:[#allocation2 + $0x90] sm:$0xff] }
 0x184   : > { %2490 = vmatpush3.bf16.msra.mxu0 %v2854_v34  ;;  %2741 = vmatpush3.bf16.msra.mxu1 %v2854_v34 }
 0x185   : > { %2491 = vmatprep.subr.bf16.mxu0 %v2855_v35  ;;  %2734 = vmatprep.subr.bf16.mxu1 %v2855_v35 }
 0x188   : > { %2492 = vmatpush3.bf16.msra.mxu0 %v2856_v38  ;;  %2742 = vmatpush3.bf16.msra.mxu1 %v2856_v38 }
 0x189   : > { %2493 = vmatprep.subr.bf16.mxu0 %v2857_v39  ;;  %2735 = vmatprep.subr.bf16.mxu1 %v2857_v39  ;;  %v1054_v39 = vld [vmem:[#allocation2 + $0x18] sm:$0xff] }
 0x18c   : > { %2494 = vmatpush3.bf16.msra.mxu0 %v2858_v40  ;;  %2743 = vmatpush3.bf16.msra.mxu1 %v2858_v40 }
 0x18d   : > { %2495 = vmatprep.subr.bf16.mxu0 %v2859_v41  ;;  %2736 = vmatprep.subr.bf16.mxu1 %v2859_v41  ;;  %v1070_v41 = vld [vmem:[#allocation2 + $0x98] sm:$0xff] }
 0x190   : > { %2496 = vmatpush3.bf16.msra.mxu0 %v2860_v42  ;;  %2744 = vmatpush3.bf16.msra.mxu1 %v2860_v42 }
 0x193   : > { %1436 = vmatmul.mubr.bf16.vlgmr.msra.gmra.mrb[0].mxu0 %v2861_v43  ;;  %1500 = vmatmul.mubr.bf16.vlgmr.msra.gmra.mrb[0].mxu1 %v2864_v44 }
 0x194   : > { %1443 = vmatprep.mubr.bf16.mxu0 %v2867_v45  ;;  %1507 = vmatprep.mubr.bf16.mxu1 %v2869_v46 }
 0x19b   : > { %1444 = vmatmul.mubr.bf16.gmra.mrb[4].mxu0 %v2871_v47  ;;  %1508 = vmatmul.mubr.bf16.gmra.mrb[4].mxu1 %v2872_v48 }
 0x19c   : > { %1451 = vmatprep.mubr.bf16.mxu0 %v2873_v49  ;;  %1515 = vmatprep.mubr.bf16.mxu1 %v2875_v50 }
 0x1a3   : > { %1452 = vmatmul.mubr.bf16.gmra.mrb[8].mxu0 %v2877_v51  ;;  %1516 = vmatmul.mubr.bf16.gmra.mrb[8].mxu1 %v2878_v52  ;;  %v1055_v51 = vld [vmem:[#allocation2 + $0x20] sm:$0xff] }
 0x1a4   : > { %1459 = vmatprep.mubr.bf16.mxu0 %v2879_v53  ;;  %1523 = vmatprep.mubr.bf16.mxu1 %v2881_v54  ;;  %v1071_v53 = vld [vmem:[#allocation2 + $0xa0] sm:$0xff] }
 0x1ab   : > { %1460 = vmatmul.mubr.bf16.gmra.mrb[12].mxu0 %v2883_v55  ;;  %1524 = vmatmul.mubr.bf16.gmra.mrb[12].mxu1 %v2884_v56 }
 0x1ac   : > { %1467 = vmatprep.mubr.bf16.mxu0 %v2885_v57  ;;  %1531 = vmatprep.mubr.bf16.mxu1 %v2887_v58 }
 0x1b3   : > { %1468 = vmatmul.mubr.bf16.gmra.mrb[16].mxu0 %v2889_v59  ;;  %1532 = vmatmul.mubr.bf16.gmra.mrb[16].mxu1 %v2890_v60  ;;  %v1056_v59 = vld [vmem:[#allocation2 + $0x28] sm:$0xff] }
 0x1b4   : > { %1475 = vmatprep.mubr.bf16.mxu0 %v2891_v61  ;;  %1539 = vmatprep.mubr.bf16.mxu1 %v2893_v62  ;;  %v1072_v61 = vld [vmem:[#allocation2 + $0xa8] sm:$0xff] }
 0x1bb   : > { %1476 = vmatmul.mubr.bf16.gmra.mrb[20].mxu0 %v2895_v63  ;;  %1540 = vmatmul.mubr.bf16.gmra.mrb[20].mxu1 %v2896_v0 }
 0x1bc   : > { %1483 = vmatprep.mubr.bf16.mxu0 %v2897_v1  ;;  %1547 = vmatprep.mubr.bf16.mxu1 %v2899_v2 }
 0x1c3   : > { %1484 = vmatmul.mubr.bf16.gmra.mrb[24].mxu0 %v2901_v3  ;;  %1548 = vmatmul.mubr.bf16.gmra.mrb[24].mxu1 %v2902_v4 }
 0x1c4   : > { %1491 = vmatprep.mubr.bf16.mxu0 %v2903_v5  ;;  %1555 = vmatprep.mubr.bf16.mxu1 %v2905_v6 }
 0x1cb   : > { %1492 = vmatmul.mubr.bf16.gmra.mrb[28].mxu0 %v2907_v7  ;;  %1556 = vmatmul.mubr.bf16.gmra.mrb[28].mxu1 %v2908_v8  ;;  %v1057_v7 = vld [vmem:[#allocation2 + $0x30] sm:$0xff] }
 0x266   : > { %v2497_v9 = vpop.f32.mrb[0].mxu0  ;;  %v2545_v10 = vpop.f32.mrb[0].mxu1 }
 0x267   : > { %v2498_v12 = vpop.f32.mrb[1].mxu0  ;;  %v2546_v14 = vpop.f32.mrb[1].mxu1 }
 0x268   : > { %v2499_v15 = vadd.f32 %v2498_v12, %v2497_v9  ;;  %v2547_v16 = vadd.f32 %v2546_v14, %v2545_v10  ;;  %v2500_v17 = vpop.f32.mrb[2].mxu0  ;;  %v2548_v18 = vpop.f32.mrb[2].mxu1  ;;  %v1073_v9 = vld [vmem:[#allocation2 + $0xb0] sm:$0xff] }
 0x269   : > { %v2501_v20 = vpop.f32.mrb[3].mxu0  ;;  %v2549_v22 = vpop.f32.mrb[3].mxu1 }
 0x26a   : > { %v1564_v23 = vadd.f32 %v2499_v15, %v1051_v11  ;;  %v1580_v24 = vadd.f32 %v2547_v16, %v1067_v13  ;;  %v2502_v25 = vadd.f32 %v2501_v20, %v2500_v17  ;;  %v2550_v26 = vadd.f32 %v2549_v22, %v2548_v18  ;;  %v1058_v15 = vld [vmem:[#allocation2 + $0x38] sm:$0xff] }
 0x26b   : > { %v1074_v17 = vld [vmem:[#allocation2 + $0xb8] sm:$0xff] }
 0x26c   : > { %1596 = vst [vmem:[#allocation2] sm:$0xff] %v1564_v23  ;;  %1612 = vst [vmem:[#allocation2 + $0x80] sm:$0xff] %v1580_v24  ;;  %v1565_v27 = vadd.f32 %v2502_v25, %v1052_v19  ;;  %v1581_v28 = vadd.f32 %v2550_v26, %v1068_v21 }
 0x26e   : > { %1597 = vst [vmem:[#allocation2 + $0x8] sm:$0xff] %v1565_v27  ;;  %1613 = vst [vmem:[#allocation2 + $0x88] sm:$0xff] %v1581_v28  ;;  %v2503_v29 = vpop.f32.mrb[4].mxu0  ;;  %v2551_v30 = vpop.f32.mrb[4].mxu1  ;;  %v1059_v27 = vld [vmem:[#allocation2 + $0x40] sm:$0xff] }
 0x26f   : > { %v2504_v32 = vpop.f32.mrb[5].mxu0  ;;  %v2552_v34 = vpop.f32.mrb[5].mxu1 }
 0x270   : > { %v2505_v35 = vadd.f32 %v2504_v32, %v2503_v29  ;;  %v2553_v36 = vadd.f32 %v2552_v34, %v2551_v30  ;;  %v2506_v37 = vpop.f32.mrb[6].mxu0  ;;  %v2554_v38 = vpop.f32.mrb[6].mxu1  ;;  %v1075_v29 = vld [vmem:[#allocation2 + $0xc0] sm:$0xff] }
 0x271   : > { %v2507_v40 = vpop.f32.mrb[7].mxu0  ;;  %v2555_v42 = vpop.f32.mrb[7].mxu1 }
 0x272   : > { %v1566_v43 = vadd.f32 %v2505_v35, %v1053_v31  ;;  %v1582_v44 = vadd.f32 %v2553_v36, %v1069_v33  ;;  %v2508_v45 = vadd.f32 %v2507_v40, %v2506_v37  ;;  %v2556_v46 = vadd.f32 %v2555_v42, %v2554_v38  ;;  %v1060_v35 = vld [vmem:[#allocation2 + $0x48] sm:$0xff] }
 0x273   : > { %v1076_v37 = vld [vmem:[#allocation2 + $0xc8] sm:$0xff] }
 0x274   : > { %1598 = vst [vmem:[#allocation2 + $0x10] sm:$0xff] %v1566_v43  ;;  %1614 = vst [vmem:[#allocation2 + $0x90] sm:$0xff] %v1582_v44  ;;  %v1567_v47 = vadd.f32 %v2508_v45, %v1054_v39  ;;  %v1583_v48 = vadd.f32 %v2556_v46, %v1070_v41 }
 0x276   : > { %1599 = vst [vmem:[#allocation2 + $0x18] sm:$0xff] %v1567_v47  ;;  %1615 = vst [vmem:[#allocation2 + $0x98] sm:$0xff] %v1583_v48  ;;  %v2509_v49 = vpop.f32.mrb[8].mxu0  ;;  %v2557_v50 = vpop.f32.mrb[8].mxu1  ;;  %v1061_v47 = vld [vmem:[#allocation2 + $0x50] sm:$0xff] }
 0x277   : > { %v2510_v52 = vpop.f32.mrb[9].mxu0  ;;  %v2558_v54 = vpop.f32.mrb[9].mxu1 }
 0x278   : > { %v2511_v55 = vadd.f32 %v2510_v52, %v2509_v49  ;;  %v2559_v56 = vadd.f32 %v2558_v54, %v2557_v50  ;;  %v2512_v57 = vpop.f32.mrb[10].mxu0  ;;  %v2560_v58 = vpop.f32.mrb[10].mxu1  ;;  %v1077_v49 = vld [vmem:[#allocation2 + $0xd0] sm:$0xff] }
 0x279   : > { %v2513_v60 = vpop.f32.mrb[11].mxu0  ;;  %v2561_v62 = vpop.f32.mrb[11].mxu1 }
 0x27a   : > { %v1568_v63 = vadd.f32 %v2511_v55, %v1055_v51  ;;  %v1584_v0 = vadd.f32 %v2559_v56, %v1071_v53  ;;  %v2514_v1 = vadd.f32 %v2513_v60, %v2512_v57  ;;  %v2562_v2 = vadd.f32 %v2561_v62, %v2560_v58  ;;  %v1062_v55 = vld [vmem:[#allocation2 + $0x58] sm:$0xff] }
 0x27b   : > { %v1078_v57 = vld [vmem:[#allocation2 + $0xd8] sm:$0xff] }
 0x27c   : > { %1600 = vst [vmem:[#allocation2 + $0x20] sm:$0xff] %v1568_v63  ;;  %1616 = vst [vmem:[#allocation2 + $0xa0] sm:$0xff] %v1584_v0  ;;  %v1569_v3 = vadd.f32 %v2514_v1, %v1056_v59  ;;  %v1585_v4 = vadd.f32 %v2562_v2, %v1072_v61 }
 0x27e   : > { %1601 = vst [vmem:[#allocation2 + $0x28] sm:$0xff] %v1569_v3  ;;  %1617 = vst [vmem:[#allocation2 + $0xa8] sm:$0xff] %v1585_v4  ;;  %v2515_v5 = vpop.f32.mrb[12].mxu0  ;;  %v2563_v6 = vpop.f32.mrb[12].mxu1  ;;  %v1063_v3 = vld [vmem:[#allocation2 + $0x60] sm:$0xff] }
 0x27f   : > { %v2516_v8 = vpop.f32.mrb[13].mxu0  ;;  %v2564_v10 = vpop.f32.mrb[13].mxu1 }
 0x280   : > { %v2517_v11 = vadd.f32 %v2516_v8, %v2515_v5  ;;  %v2565_v12 = vadd.f32 %v2564_v10, %v2563_v6  ;;  %v2518_v13 = vpop.f32.mrb[14].mxu0  ;;  %v2566_v14 = vpop.f32.mrb[14].mxu1  ;;  %v1079_v5 = vld [vmem:[#allocation2 + $0xe0] sm:$0xff] }
 0x281   : > { %v2519_v16 = vpop.f32.mrb[15].mxu0  ;;  %v2567_v18 = vpop.f32.mrb[15].mxu1 }
 0x282   : > { %v1570_v19 = vadd.f32 %v2517_v11, %v1057_v7  ;;  %v1586_v20 = vadd.f32 %v2565_v12, %v1073_v9  ;;  %v2520_v21 = vadd.f32 %v2519_v16, %v2518_v13  ;;  %v2568_v22 = vadd.f32 %v2567_v18, %v2566_v14  ;;  %v1064_v11 = vld [vmem:[#allocation2 + $0x68] sm:$0xff] }
 0x283   : > { %v1080_v13 = vld [vmem:[#allocation2 + $0xe8] sm:$0xff] }
 0x284   : > { %1602 = vst [vmem:[#allocation2 + $0x30] sm:$0xff] %v1570_v19  ;;  %1618 = vst [vmem:[#allocation2 + $0xb0] sm:$0xff] %v1586_v20  ;;  %v1571_v23 = vadd.f32 %v2520_v21, %v1058_v15  ;;  %v1587_v24 = vadd.f32 %v2568_v22, %v1074_v17 }
 0x286   : > { %1603 = vst [vmem:[#allocation2 + $0x38] sm:$0xff] %v1571_v23  ;;  %1619 = vst [vmem:[#allocation2 + $0xb8] sm:$0xff] %v1587_v24  ;;  %v2521_v25 = vpop.f32.mrb[16].mxu0  ;;  %v2569_v26 = vpop.f32.mrb[16].mxu1  ;;  %v1065_v23 = vld [vmem:[#allocation2 + $0x70] sm:$0xff] }
 0x287   : > { %v2522_v28 = vpop.f32.mrb[17].mxu0  ;;  %v2570_v30 = vpop.f32.mrb[17].mxu1 }
 0x288   : > { %v2523_v31 = vadd.f32 %v2522_v28, %v2521_v25  ;;  %v2571_v32 = vadd.f32 %v2570_v30, %v2569_v26  ;;  %v2524_v33 = vpop.f32.mrb[18].mxu0  ;;  %v2572_v34 = vpop.f32.mrb[18].mxu1  ;;  %v1081_v25 = vld [vmem:[#allocation2 + $0xf0] sm:$0xff] }
 0x289   : > { %v2525_v36 = vpop.f32.mrb[19].mxu0  ;;  %v2573_v38 = vpop.f32.mrb[19].mxu1 }
 0x28a   : > { %v1572_v39 = vadd.f32 %v2523_v31, %v1059_v27  ;;  %v1588_v40 = vadd.f32 %v2571_v32, %v1075_v29  ;;  %v2526_v41 = vadd.f32 %v2525_v36, %v2524_v33  ;;  %v2574_v42 = vadd.f32 %v2573_v38, %v2572_v34  ;;  %v1066_v31 = vld [vmem:[#allocation2 + $0x78] sm:$0xff] }
 0x28b   : > { %v1082_v33 = vld [vmem:[#allocation2 + $0xf8] sm:$0xff] }
 0x28c   : > { %1604 = vst [vmem:[#allocation2 + $0x40] sm:$0xff] %v1572_v39  ;;  %1620 = vst [vmem:[#allocation2 + $0xc0] sm:$0xff] %v1588_v40  ;;  %v1573_v43 = vadd.f32 %v2526_v41, %v1060_v35  ;;  %v1589_v44 = vadd.f32 %v2574_v42, %v1076_v37 }
 0x28e   : > { %1605 = vst [vmem:[#allocation2 + $0x48] sm:$0xff] %v1573_v43  ;;  %1621 = vst [vmem:[#allocation2 + $0xc8] sm:$0xff] %v1589_v44  ;;  %v2527_v45 = vpop.f32.mrb[20].mxu0  ;;  %v2575_v46 = vpop.f32.mrb[20].mxu1 }
 0x28f   : > { %v2528_v48 = vpop.f32.mrb[21].mxu0  ;;  %v2576_v50 = vpop.f32.mrb[21].mxu1 }
 0x290   : > { %v2529_v51 = vadd.f32 %v2528_v48, %v2527_v45  ;;  %v2577_v52 = vadd.f32 %v2576_v50, %v2575_v46  ;;  %v2530_v53 = vpop.f32.mrb[22].mxu0  ;;  %v2578_v54 = vpop.f32.mrb[22].mxu1 }
 0x291   : > { %v2531_v56 = vpop.f32.mrb[23].mxu0  ;;  %v2579_v58 = vpop.f32.mrb[23].mxu1 }
 0x292   : > { %v1574_v59 = vadd.f32 %v2529_v51, %v1061_v47  ;;  %v1590_v60 = vadd.f32 %v2577_v52, %v1077_v49  ;;  %v2532_v61 = vadd.f32 %v2531_v56, %v2530_v53  ;;  %v2580_v62 = vadd.f32 %v2579_v58, %v2578_v54 }
 0x294   : > { %1606 = vst [vmem:[#allocation2 + $0x50] sm:$0xff] %v1574_v59  ;;  %1622 = vst [vmem:[#allocation2 + $0xd0] sm:$0xff] %v1590_v60  ;;  %v1575_v63 = vadd.f32 %v2532_v61, %v1062_v55  ;;  %v1591_v0 = vadd.f32 %v2580_v62, %v1078_v57 }
 0x296   : > { %1607 = vst [vmem:[#allocation2 + $0x58] sm:$0xff] %v1575_v63  ;;  %1623 = vst [vmem:[#allocation2 + $0xd8] sm:$0xff] %v1591_v0  ;;  %v2533_v1 = vpop.f32.mrb[24].mxu0  ;;  %v2581_v2 = vpop.f32.mrb[24].mxu1 }
 0x297   : > { %v2534_v4 = vpop.f32.mrb[25].mxu0  ;;  %v2582_v6 = vpop.f32.mrb[25].mxu1 }
 0x298   : > { %v2535_v7 = vadd.f32 %v2534_v4, %v2533_v1  ;;  %v2583_v8 = vadd.f32 %v2582_v6, %v2581_v2  ;;  %v2536_v9 = vpop.f32.mrb[26].mxu0  ;;  %v2584_v10 = vpop.f32.mrb[26].mxu1 }
 0x299   : > { %v2537_v12 = vpop.f32.mrb[27].mxu0  ;;  %v2585_v14 = vpop.f32.mrb[27].mxu1 }
 0x29a   : > { %v1576_v15 = vadd.f32 %v2535_v7, %v1063_v3  ;;  %v1592_v16 = vadd.f32 %v2583_v8, %v1079_v5  ;;  %v2538_v17 = vadd.f32 %v2537_v12, %v2536_v9  ;;  %v2586_v18 = vadd.f32 %v2585_v14, %v2584_v10 }
 0x29c   : > { %1608 = vst [vmem:[#allocation2 + $0x60] sm:$0xff] %v1576_v15  ;;  %1624 = vst [vmem:[#allocation2 + $0xe0] sm:$0xff] %v1592_v16  ;;  %v1577_v19 = vadd.f32 %v2538_v17, %v1064_v11  ;;  %v1593_v20 = vadd.f32 %v2586_v18, %v1080_v13 }
 0x29e   : > { %1609 = vst [vmem:[#allocation2 + $0x68] sm:$0xff] %v1577_v19  ;;  %1625 = vst [vmem:[#allocation2 + $0xe8] sm:$0xff] %v1593_v20  ;;  %v2539_v21 = vpop.f32.mrb[28].mxu0  ;;  %v2587_v22 = vpop.f32.mrb[28].mxu1 }
 0x29f   : > { %v2540_v24 = vpop.f32.mrb[29].mxu0  ;;  %v2588_v26 = vpop.f32.mrb[29].mxu1 }
 0x2a0   : > { %v2541_v27 = vadd.f32 %v2540_v24, %v2539_v21  ;;  %v2589_v28 = vadd.f32 %v2588_v26, %v2587_v22  ;;  %v2542_v29 = vpop.f32.mrb[30].mxu0  ;;  %v2590_v30 = vpop.f32.mrb[30].mxu1 }
 0x2a1   : > { %v2543_v32 = vpop.f32.mrb[31].mxu0  ;;  %v2591_v34 = vpop.f32.mrb[31].mxu1 }
 0x2a2   : > { %v1578_v35 = vadd.f32 %v2541_v27, %v1065_v23  ;;  %v1594_v36 = vadd.f32 %v2589_v28, %v1081_v25  ;;  %v2544_v37 = vadd.f32 %v2543_v32, %v2542_v29  ;;  %v2592_v38 = vadd.f32 %v2591_v34, %v2590_v30 }
 0x2a4   : > { %1610 = vst [vmem:[#allocation2 + $0x70] sm:$0xff] %v1578_v35  ;;  %1626 = vst [vmem:[#allocation2 + $0xf0] sm:$0xff] %v1594_v36  ;;  %v1579_v39 = vadd.f32 %v2544_v37, %v1066_v31  ;;  %v1595_v40 = vadd.f32 %v2592_v38, %v1082_v33 }
 0x2a6   : > { %1611 = vst [vmem:[#allocation2 + $0x78] sm:$0xff] %v1579_v39  ;;  %1627 = vst [vmem:[#allocation2 + $0xf8] sm:$0xff] %v1595_v40 }
 0x2a7 PF: > { %p2444_p10 = scmp.ne.s32.totalorder %s2983_s19, 1 }
 0x2a8   : > { %v1680_v41 = vld [vmem:[%s3207_s1 + $0x80] sm:$0xff] (!%p2444_p10)  ;;  %v3004_v43 = vmov (!%p2444_p10), 0   ;;  %v1681_v44 = vld [vmem:[%s3207_s1 + $0x88] sm:$0xff] (!%p2444_p10)  ;;  %v1667_v46 = vld [vmem:[%s3207_s1 + $0x18] sm:$0xff] (!%p2444_p10) }
 0x2a9   : > { %1631 = sbr.rel (%p2444_p10) target bundleno = 1094 (0x446), region = 98  ;;  %v1664_v42 = vld [vmem:[%s3207_s1] sm:$0xff] (!%p2444_p10)  ;;  %2910 = vset.pattern.permute.xlu1 (!%p2444_p10), %v3004_v43  ;;  %2909 = vset.pattern.permute.xlu0 (!%p2444_p10), %v3004_v43  ;;  %v1665_v45 = vld [vmem:[%s3207_s1 + $0x8] sm:$0xff] (!%p2444_p10)  ;;  %v1666_v47 = vld [vmem:[%s3207_s1 + $0x10] sm:$0xff] (!%p2444_p10) }
 0x2aa   : > { %1778 = vperm.xlu1 (!%p2444_p10), %2910, %v1680_v41   ;;  %1698 = vperm.xlu0 (!%p2444_p10), %2909, %v1664_v42   ;;  %v1683_v48 = vld [vmem:[%s3207_s1 + $0x98] sm:$0xff] (!%p2444_p10)  ;;  %v1682_v49 = vld [vmem:[%s3207_s1 + $0x90] sm:$0xff] (!%p2444_p10)  ;;  %v2911_v50 = vld [vmem:[%s3464_s6] sm:$0xff] (!%p2444_p10)  }
 0x2ab   : > { %v2912_v51 = vld [vmem:[%s3464_s6 + $0x8] sm:$0xff] (!%p2444_p10)   ;;  %2665 = vmatprep.subr.bf16.mxu0 (!%p2444_p10), %v2911_v50  ;;  %2745 = vmatprep.subr.bf16.mxu1 (!%p2444_p10), %v2911_v50  ;;  %v1668_v53 = vld [vmem:[%s3207_s1 + $0x20] sm:$0xff] (!%p2444_p10)  ;;  %v2913_v54 = vld [vmem:[%s3464_s6 + $0x10] sm:$0xff] (!%p2444_p10)  }
 0x2ac   : > { %v1669_v52 = vld [vmem:[%s3207_s1 + $0x28] sm:$0xff] (!%p2444_p10)  ;;  %2666 = vmatpush3.bf16.msra.mxu0 (!%p2444_p10), %v2911_v50  ;;  %2753 = vmatpush3.bf16.msra.mxu1 (!%p2444_p10), %v2911_v50  ;;  %v1684_v56 = vld [vmem:[%s3207_s1 + $0xa0] sm:$0xff] (!%p2444_p10)  ;;  %v2914_v57 = vld [vmem:[%s3464_s6 + $0x18] sm:$0xff] (!%p2444_p10)  }
 0x2ad   : > { %2667 = vmatprep.subr.bf16.mxu0 (!%p2444_p10), %v2912_v51  ;;  %2746 = vmatprep.subr.bf16.mxu1 (!%p2444_p10), %v2912_v51  ;;  %v1685_v55 = vld [vmem:[%s3207_s1 + $0xa8] sm:$0xff] (!%p2444_p10)  ;;  %v1671_v58 = vld [vmem:[%s3207_s1 + $0x38] sm:$0xff] (!%p2444_p10)  ;;  %v1670_v59 = vld [vmem:[%s3207_s1 + $0x30] sm:$0xff] (!%p2444_p10) }
 0x2ae   : > { %1783 = vperm.xlu1 (!%p2444_p10), %2910, %v1681_v44   ;;  %1703 = vperm.xlu0 (!%p2444_p10), %2909, %v1665_v45   ;;  %v2915_v60 = vld [vmem:[%s3464_s6 + $0x20] sm:$0xff] (!%p2444_p10)   ;;  %v1687_v61 = vld [vmem:[%s3207_s1 + $0xb8] sm:$0xff] (!%p2444_p10)  ;;  %v1686_v62 = vld [vmem:[%s3207_s1 + $0xb0] sm:$0xff] (!%p2444_p10) }
 0x2af   : > { %v2916_v63 = vld [vmem:[%s3464_s6 + $0x28] sm:$0xff] (!%p2444_p10)   ;;  %v1672_v1 = vld [vmem:[%s3207_s1 + $0x40] sm:$0xff] (!%p2444_p10)  ;;  %v2917_v2 = vld [vmem:[%s3464_s6 + $0x30] sm:$0xff] (!%p2444_p10)  }
 0x2b0   : > { %2668 = vmatpush3.bf16.msra.mxu0 %v2912_v51  ;;  %2754 = vmatpush3.bf16.msra.mxu1 %v2912_v51  ;;  %v1673_v0 = vld [vmem:[%s3207_s1 + $0x48] sm:$0xff]  ;;  %v1688_v4 = vld [vmem:[%s3207_s1 + $0xc0] sm:$0xff]  ;;  %v2918_v5 = vld [vmem:[%s3464_s6 + $0x38] sm:$0xff]  }
 0x2b1   : > { %2669 = vmatprep.subr.bf16.mxu0 %v2913_v54  ;;  %2747 = vmatprep.subr.bf16.mxu1 %v2913_v54  ;;  %v1689_v3 = vld [vmem:[%s3207_s1 + $0xc8] sm:$0xff]  ;;  %v1675_v6 = vld [vmem:[%s3207_s1 + $0x58] sm:$0xff]  ;;  %v1674_v7 = vld [vmem:[%s3207_s1 + $0x50] sm:$0xff] }
 0x2b2   : > { %1713 = vperm.xlu1 %2910, %v1667_v46   ;;  %1708 = vperm.xlu0 %2909, %v1666_v47   ;;  %v1691_v8 = vld [vmem:[%s3207_s1 + $0xd8] sm:$0xff]  ;;  %v1690_v9 = vld [vmem:[%s3207_s1 + $0xd0] sm:$0xff]  ;;  %v1677_v10 = vld [vmem:[%s3207_s1 + $0x68] sm:$0xff] }
 0x2b3   : > { %v1676_v11 = vld [vmem:[%s3207_s1 + $0x60] sm:$0xff]  ;;  %v1693_v12 = vld [vmem:[%s3207_s1 + $0xe8] sm:$0xff]  ;;  %v1679_v14 = vld [vmem:[%s3207_s1 + $0x78] sm:$0xff] }
 0x2b4   : > { %2670 = vmatpush3.bf16.msra.mxu0 %v2913_v54  ;;  %2755 = vmatpush3.bf16.msra.mxu1 %v2913_v54  ;;  %v1692_v13 = vld [vmem:[%s3207_s1 + $0xe0] sm:$0xff]  ;;  %v1678_v15 = vld [vmem:[%s3207_s1 + $0x70] sm:$0xff]  ;;  %v1695_v16 = vld [vmem:[%s3207_s1 + $0xf8] sm:$0xff] }
 0x2b5   : > { %2671 = vmatprep.subr.bf16.mxu0 %v2914_v57  ;;  %2748 = vmatprep.subr.bf16.mxu1 %v2914_v57  ;;  %v1694_v17 = vld [vmem:[%s3207_s1 + $0xf0] sm:$0xff]  ;;  %v1648_v20 = vld [vmem:[#allocation2 + $0x80] sm:$0xff]  ;;  %v1649_v22 = vld [vmem:[#allocation2 + $0x88] sm:$0xff] }
 0x2b6   : > { %1793 = vperm.xlu1 %2910, %v1683_v48   ;;  %1788 = vperm.xlu0 %2909, %v1682_v49   ;;  %v1632_v21 = vld [vmem:[#allocation2] sm:$0xff]  ;;  %v1633_v23 = vld [vmem:[#allocation2 + $0x8] sm:$0xff]  ;;  %v1635_v30 = vld [vmem:[#allocation2 + $0x18] sm:$0xff] }
 0x2b7   : > { %v1634_v31 = vld [vmem:[#allocation2 + $0x10] sm:$0xff]  ;;  %v1651_v38 = vld [vmem:[#allocation2 + $0x98] sm:$0xff]  ;;  %v1637_v45 = vld [vmem:[#allocation2 + $0x28] sm:$0xff] }
 0x2b8   : > { %2672 = vmatpush3.bf16.msra.mxu0 %v2914_v57  ;;  %2756 = vmatpush3.bf16.msra.mxu1 %v2914_v57  ;;  %v1650_v39 = vld [vmem:[#allocation2 + $0x90] sm:$0xff]  ;;  %v1636_v46 = vld [vmem:[#allocation2 + $0x20] sm:$0xff] }
 0x2b9   : > { %2673 = vmatprep.subr.bf16.mxu0 %v2915_v60  ;;  %2749 = vmatprep.subr.bf16.mxu1 %v2915_v60 }
 0x2ba   : > { %1723 = vperm.xlu1 %2910, %v1669_v52   ;;  %1718 = vperm.xlu0 %2909, %v1668_v53   ;;  %v1653_v52 = vld [vmem:[#allocation2 + $0xa8] sm:$0xff]  ;;  %v1652_v53 = vld [vmem:[#allocation2 + $0xa0] sm:$0xff] }
 0x2bc   : > { %2674 = vmatpush3.bf16.msra.mxu0 %v2915_v60  ;;  %2757 = vmatpush3.bf16.msra.mxu1 %v2915_v60  ;;  %v1638_v60 = vld [vmem:[#allocation2 + $0x30] sm:$0xff] }
 0x2bd   : > { %2675 = vmatprep.subr.bf16.mxu0 %v2916_v63  ;;  %2750 = vmatprep.subr.bf16.mxu1 %v2916_v63 }
 0x2be   : > { %1803 = vperm.xlu1 %2910, %v1685_v55   ;;  %1798 = vperm.xlu0 %2909, %v1684_v56  }
 0x2c0   : > { %2676 = vmatpush3.bf16.msra.mxu0 %v2916_v63  ;;  %2758 = vmatpush3.bf16.msra.mxu1 %v2916_v63 }
 0x2c1   : > { %2677 = vmatprep.subr.bf16.mxu0 %v2917_v2  ;;  %2751 = vmatprep.subr.bf16.mxu1 %v2917_v2 }
 0x2c2   : > { %1733 = vperm.xlu1 %2910, %v1671_v58   ;;  %1728 = vperm.xlu0 %2909, %v1670_v59   ;;  %v1639_v59 = vld [vmem:[#allocation2 + $0x38] sm:$0xff] }
 0x2c4   : > { %2678 = vmatpush3.bf16.msra.mxu0 %v2917_v2  ;;  %2759 = vmatpush3.bf16.msra.mxu1 %v2917_v2  ;;  %v1655_v2 = vld [vmem:[#allocation2 + $0xb8] sm:$0xff] }
 0x2c5   : > { %2679 = vmatprep.subr.bf16.mxu0 %v2918_v5  ;;  %2752 = vmatprep.subr.bf16.mxu1 %v2918_v5 }
 0x2c6   : > { %1813 = vperm.xlu1 %2910, %v1687_v61   ;;  %1808 = vperm.xlu0 %2909, %v1686_v62  }
 0x2c8   : > { %2680 = vmatpush3.bf16.msra.mxu0 %v2918_v5  ;;  %2760 = vmatpush3.bf16.msra.mxu1 %v2918_v5 }
 0x2ca   : > { %1743 = vperm.xlu1 %2910, %v1673_v0   ;;  %1738 = vperm.xlu0 %2909, %v1672_v1  }
 0x2ce   : > { %1823 = vperm.xlu1 %2910, %v1689_v3   ;;  %1818 = vperm.xlu0 %2909, %v1688_v4   ;;  %v1654_v3 = vld [vmem:[#allocation2 + $0xb0] sm:$0xff] }
 0x2d2   : > { %1753 = vperm.xlu1 %2910, %v1675_v6   ;;  %1748 = vperm.xlu0 %2909, %v1674_v7  }
 0x2d6   : > { %1833 = vperm.xlu1 %2910, %v1691_v8   ;;  %1828 = vperm.xlu0 %2909, %v1690_v9   ;;  %v1641_v9 = vld [vmem:[#allocation2 + $0x48] sm:$0xff] }
 0x2da   : > { %1763 = vperm.xlu1 %2910, %v1677_v10   ;;  %1758 = vperm.xlu0 %2909, %v1676_v11   ;;  %v1640_v10 = vld [vmem:[#allocation2 + $0x40] sm:$0xff] }
 0x2de   : > { %1843 = vperm.xlu1 %2910, %v1693_v12   ;;  %1838 = vperm.xlu0 %2909, %v1692_v13  }
 0x2e2   : > { %1773 = vperm.xlu1 %2910, %v1679_v14   ;;  %1768 = vperm.xlu0 %2909, %v1678_v15  }
 0x2e6   : > { %1853 = vperm.xlu1 %2910, %v1695_v16   ;;  %1848 = vperm.xlu0 %2909, %v1694_v17   ;;  %v1657_v16 = vld [vmem:[#allocation2 + $0xc8] sm:$0xff]  ;;  %v1656_v17 = vld [vmem:[#allocation2 + $0xc0] sm:$0xff] }
 0x329   : > { %v1779_v18 = vpop.permute.xlu1 %1778  ;;  %v1699_v19 = vpop.permute.xlu0 %1698 }
 0x32a   : > { %v1872_v26 = vmul.f32 %v1779_v18, %v1648_v20  ;;  %v1856_v27 = vmul.f32 %v1699_v19, %v1632_v21 }
 0x32d   : > { %v1784_v24 = vpop.permute.xlu1 %1783  ;;  %v1704_v25 = vpop.permute.xlu0 %1703 }
 0x32e   : > { %v1873_v28 = vmul.f32 %v1784_v24, %v1649_v22  ;;  %v1857_v29 = vmul.f32 %v1704_v25, %v1633_v23  ;;  %v1643_v23 = vld [vmem:[#allocation2 + $0x58] sm:$0xff]  ;;  %v1642_v24 = vld [vmem:[#allocation2 + $0x50] sm:$0xff] }
 0x330   : > { %v1888_v32 = vpack.c.bf16 %v1857_v29, %v1856_v27  ;;  %v1896_v33 = vpack.c.bf16 %v1873_v28, %v1872_v26 }
 0x331   : > { %v1714_v34 = vpop.permute.xlu1 %1713  ;;  %v1709_v35 = vpop.permute.xlu0 %1708 }
 0x332   : > { %v1859_v36 = vmul.f32 %v1714_v34, %v1635_v30  ;;  %v1858_v37 = vmul.f32 %v1709_v35, %v1634_v31  ;;  %2681 = vmatprep.mubr.bf16.mxu0 %v1888_v32  ;;  %2697 = vmatprep.mubr.bf16.mxu1 %v1896_v33  ;;  %v1659_v30 = vld [vmem:[#allocation2 + $0xd8] sm:$0xff]  ;;  %v1658_v31 = vld [vmem:[#allocation2 + $0xd0] sm:$0xff] }
 0x334   : > { %v1889_v40 = vpack.c.bf16 %v1859_v36, %v1858_v37  ;;  %v1645_v37 = vld [vmem:[#allocation2 + $0x68] sm:$0xff] }
 0x335   : > { %v1794_v41 = vpop.permute.xlu1 %1793  ;;  %v1789_v42 = vpop.permute.xlu0 %1788 }
 0x336   : > { %v1875_v43 = vmul.f32 %v1794_v41, %v1651_v38  ;;  %v1874_v44 = vmul.f32 %v1789_v42, %v1650_v39  ;;  %2682 = vmatmul.mubr.bf16.vlgmr.msra.gmra.mrb[0].mxu0 %v1889_v40  ;;  %v1644_v38 = vld [vmem:[#allocation2 + $0x60] sm:$0xff] }
 0x338   : > { %v1897_v47 = vpack.c.bf16 %v1875_v43, %v1874_v44  ;;  %v1661_v44 = vld [vmem:[#allocation2 + $0xe8] sm:$0xff] }
 0x339   : > { %v1724_v48 = vpop.permute.xlu1 %1723  ;;  %v1719_v49 = vpop.permute.xlu0 %1718 }
 0x33a   : > { %v1861_v50 = vmul.f32 %v1724_v48, %v1637_v45  ;;  %v1860_v51 = vmul.f32 %v1719_v49, %v1636_v46  ;;  %2698 = vmatmul.mubr.bf16.vlgmr.msra.gmra.mrb[0].mxu1 %v1897_v47  ;;  %v1660_v45 = vld [vmem:[#allocation2 + $0xe0] sm:$0xff] }
 0x33c   : > { %v1890_v54 = vpack.c.bf16 %v1861_v50, %v1860_v51  ;;  %v1647_v51 = vld [vmem:[#allocation2 + $0x78] sm:$0xff] }
 0x33d   : > { %v1804_v55 = vpop.permute.xlu1 %1803  ;;  %v1799_v56 = vpop.permute.xlu0 %1798 }
 0x33e   : > { %v1877_v57 = vmul.f32 %v1804_v55, %v1653_v52  ;;  %v1876_v58 = vmul.f32 %v1799_v56, %v1652_v53  ;;  %2685 = vmatprep.mubr.bf16.mxu0 %v1890_v54  ;;  %v1646_v52 = vld [vmem:[#allocation2 + $0x70] sm:$0xff] }
 0x340   : > { %v1898_v61 = vpack.c.bf16 %v1877_v57, %v1876_v58  ;;  %v1663_v58 = vld [vmem:[#allocation2 + $0xf8] sm:$0xff] }
 0x341   : > { %v1734_v62 = vpop.permute.xlu1 %1733  ;;  %v1729_v63 = vpop.permute.xlu0 %1728 }
 0x342   : > { %v1863_v0 = vmul.f32 %v1734_v62, %v1639_v59  ;;  %v1862_v1 = vmul.f32 %v1729_v63, %v1638_v60  ;;  %2701 = vmatprep.mubr.bf16.mxu1 %v1898_v61  ;;  %v1662_v59 = vld [vmem:[#allocation2 + $0xf0] sm:$0xff] }
 0x344   : > { %v1891_v4 = vpack.c.bf16 %v1863_v0, %v1862_v1 }
 0x345   : > { %v1814_v5 = vpop.permute.xlu1 %1813  ;;  %v1809_v6 = vpop.permute.xlu0 %1808 }
 0x346   : > { %v1879_v7 = vmul.f32 %v1814_v5, %v1655_v2  ;;  %v1878_v8 = vmul.f32 %v1809_v6, %v1654_v3  ;;  %2686 = vmatmul.mubr.bf16.gmra.mrb[4].mxu0 %v1891_v4  ;;  %v1922_v2 = vld [vmem:[#allocation3 + $0x10] sm:$0xff]  ;;  %v1920_v3 = vld [vmem:[#allocation3] sm:$0xff]  ;;  %v1923_v6 = vld [vmem:[#allocation3 + $0x18] sm:$0xff] }
 0x347   : > { %v3372_v5 = vld [vmem:[%s3466_s8] ss:$0 sm:$0xff] }
 0x348   : > { %v1899_v11 = vpack.c.bf16 %v1879_v7, %v1878_v8 }
 0x349   : > { %v1744_v12 = vpop.permute.xlu1 %1743  ;;  %v1739_v13 = vpop.permute.xlu0 %1738 }
 0x34a   : > { %v1865_v14 = vmul.f32 %v1744_v12, %v1641_v9  ;;  %v1864_v15 = vmul.f32 %v1739_v13, %v1640_v10  ;;  %2702 = vmatmul.mubr.bf16.gmra.mrb[4].mxu1 %v1899_v11  ;;  %v1921_v9 = vld [vmem:[#allocation3 + $0x8] sm:$0xff]  ;;  %v1938_v12 = vld [vmem:[#allocation3 + $0x90] sm:$0xff] }
 0x34c   : > { %v1892_v18 = vpack.c.bf16 %v1865_v14, %v1864_v15 }
 0x34d   : > { %v1824_v19 = vpop.permute.xlu1 %1823  ;;  %v1819_v20 = vpop.permute.xlu0 %1818 }
 0x34e   : > { %v1881_v21 = vmul.f32 %v1824_v19, %v1657_v16  ;;  %v1880_v22 = vmul.f32 %v1819_v20, %v1656_v17  ;;  %2689 = vmatprep.mubr.bf16.mxu0 %v1892_v18  ;;  %v1936_v16 = vld [vmem:[#allocation3 + $0x80] sm:$0xff]  ;;  %v1939_v20 = vld [vmem:[#allocation3 + $0x98] sm:$0xff] }
 0x350   : > { %v1900_v25 = vpack.c.bf16 %v1881_v21, %v1880_v22 }
 0x351   : > { %v1754_v26 = vpop.permute.xlu1 %1753  ;;  %v1749_v27 = vpop.permute.xlu0 %1748 }
 0x352   : > { %v1867_v28 = vmul.f32 %v1754_v26, %v1643_v23  ;;  %v1866_v29 = vmul.f32 %v1749_v27, %v1642_v24  ;;  %2705 = vmatprep.mubr.bf16.mxu1 %v1900_v25  ;;  %v1937_v24 = vld [vmem:[#allocation3 + $0x88] sm:$0xff] }
 0x354   : > { %v1893_v32 = vpack.c.bf16 %v1867_v28, %v1866_v29 }
 0x355   : > { %v1834_v33 = vpop.permute.xlu1 %1833  ;;  %v1829_v34 = vpop.permute.xlu0 %1828 }
 0x356   : > { %v1883_v35 = vmul.f32 %v1834_v33, %v1659_v30  ;;  %v1882_v36 = vmul.f32 %v1829_v34, %v1658_v31  ;;  %2690 = vmatmul.mubr.bf16.gmra.mrb[8].mxu0 %v1893_v32 }
 0x358   : > { %v1901_v39 = vpack.c.bf16 %v1883_v35, %v1882_v36  ;;  %v1926_v35 = vld [vmem:[#allocation3 + $0x30] sm:$0xff]  ;;  %v1924_v36 = vld [vmem:[#allocation3 + $0x20] sm:$0xff] }
 0x359   : > { %v1764_v40 = vpop.permute.xlu1 %1763  ;;  %v1759_v41 = vpop.permute.xlu0 %1758 }
 0x35a   : > { %v1869_v42 = vmul.f32 %v1764_v40, %v1645_v37  ;;  %v1868_v43 = vmul.f32 %v1759_v41, %v1644_v38  ;;  %2706 = vmatmul.mubr.bf16.gmra.mrb[8].mxu1 %v1901_v39  ;;  %v1927_v38 = vld [vmem:[#allocation3 + $0x38] sm:$0xff]  ;;  %v1925_v41 = vld [vmem:[#allocation3 + $0x28] sm:$0xff] }
 0x35c   : > { %v1894_v46 = vpack.c.bf16 %v1869_v42, %v1868_v43 }
 0x35d   : > { %v1844_v47 = vpop.permute.xlu1 %1843  ;;  %v1839_v48 = vpop.permute.xlu0 %1838 }
 0x35e   : > { %v1885_v49 = vmul.f32 %v1844_v47, %v1661_v44  ;;  %v1884_v50 = vmul.f32 %v1839_v48, %v1660_v45  ;;  %2693 = vmatprep.mubr.bf16.mxu0 %v1894_v46  ;;  %v1942_v44 = vld [vmem:[#allocation3 + $0xb0] sm:$0xff]  ;;  %v1940_v48 = vld [vmem:[#allocation3 + $0xa0] sm:$0xff] }
 0x360   : > { %v1902_v53 = vpack.c.bf16 %v1885_v49, %v1884_v50 }
 0x361   : > { %v1774_v54 = vpop.permute.xlu1 %1773  ;;  %v1769_v55 = vpop.permute.xlu0 %1768 }
 0x362   : > { %v1871_v56 = vmul.f32 %v1774_v54, %v1647_v51  ;;  %v1870_v57 = vmul.f32 %v1769_v55, %v1646_v52  ;;  %2709 = vmatprep.mubr.bf16.mxu1 %v1902_v53  ;;  %v1943_v52 = vld [vmem:[#allocation3 + $0xb8] sm:$0xff] }
 0x364   : > { %v1895_v60 = vpack.c.bf16 %v1871_v56, %v1870_v57  ;;  %v1941_v56 = vld [vmem:[#allocation3 + $0xa8] sm:$0xff] }
 0x365   : > { %v1854_v61 = vpop.permute.xlu1 %1853  ;;  %v1849_v62 = vpop.permute.xlu0 %1848 }
 0x366   : > { %v1887_v63 = vmul.f32 %v1854_v61, %v1663_v58  ;;  %v1886_v0 = vmul.f32 %v1849_v62, %v1662_v59  ;;  %2694 = vmatmul.mubr.bf16.gmra.mrb[12].mxu0 %v1895_v60 }
 0x368   : > { %v1903_v1 = vpack.c.bf16 %v1887_v63, %v1886_v0 }
 0x36a   : > { %2710 = vmatmul.mubr.bf16.gmra.mrb[12].mxu1 %v1903_v1 }
 0x409   : > { %v2683_v4 = vpop.f32.mrb[0].mxu0 }
 0x40a   : > { %v2043_v7 = vadd.f32 %v2683_v4, %v1922_v2  ;;  %v2034_v8 = vpop.f32.mrb[1].mxu0  ;;  %v1928_v4 = vld [vmem:[#allocation3 + $0x40] sm:$0xff] }
 0x40b   : > { %v2035_v10 = vadd.f32 %v2034_v8, %v1920_v3  ;;  %v2684_v11 = vpop.f32.mrb[2].mxu0  ;;  %v1930_v3 = vld [vmem:[#allocation3 + $0x50] sm:$0xff] }
 0x40c   : > { %v2170_v13 = vadd.f32 %v3372_v5, %v2043_v7  ;;  %v2046_v14 = vadd.f32 %v2684_v11, %v1923_v6  ;;  %v2037_v15 = vpop.f32.mrb[3].mxu0  ;;  %v1931_v7 = vld [vmem:[#allocation3 + $0x58] sm:$0xff] }
 0x40d   : > { %v2168_v17 = vadd.f32 %v3372_v5, %v2035_v10  ;;  %v2038_v18 = vadd.f32 %v2037_v15, %v1921_v9  ;;  %v2699_v19 = vpop.f32.mrb[0].mxu1  ;;  %v1929_v10 = vld [vmem:[#allocation3 + $0x48] sm:$0xff] }
 0x40e   : > { %2202 = vst [vmem:[%s3212_s0 + $0x10] sm:$0xff] %v2170_v13  ;;  %v2171_v21 = vadd.f32 %v3372_v5, %v2046_v14  ;;  %v2107_v22 = vadd.f32 %v2699_v19, %v1938_v12  ;;  %v2098_v23 = vpop.f32.mrb[1].mxu1  ;;  %v1946_v13 = vld [vmem:[#allocation3 + $0xd0] sm:$0xff] }
 0x40f   : > { %2200 = vst [vmem:[%s3212_s0] sm:$0xff] %v2168_v17  ;;  %v2169_v25 = vadd.f32 %v3372_v5, %v2038_v18  ;;  %v2099_v26 = vadd.f32 %v2098_v23, %v1936_v16  ;;  %v2700_v27 = vpop.f32.mrb[2].mxu1  ;;  %v1944_v17 = vld [vmem:[#allocation3 + $0xc0] sm:$0xff] }
 0x410   : > { %2203 = vst [vmem:[%s3212_s0 + $0x18] sm:$0xff] %v2171_v21  ;;  %v2186_v28 = vadd.f32 %v3372_v5, %v2107_v22  ;;  %v2110_v29 = vadd.f32 %v2700_v27, %v1939_v20  ;;  %v2101_v30 = vpop.f32.mrb[3].mxu1  ;;  %v1947_v21 = vld [vmem:[#allocation3 + $0xd8] sm:$0xff] }
 0x411   : > { %2201 = vst [vmem:[%s3212_s0 + $0x8] sm:$0xff] %v2169_v25  ;;  %v2184_v31 = vadd.f32 %v3372_v5, %v2099_v26  ;;  %v2102_v32 = vadd.f32 %v2101_v30, %v1937_v24  ;;  %v1945_v25 = vld [vmem:[#allocation3 + $0xc8] sm:$0xff] }
 0x412   : > { %2218 = vst [vmem:[%s3212_s0 + $0x90] sm:$0xff] %v2186_v28  ;;  %v2187_v33 = vadd.f32 %v3372_v5, %v2110_v29 }
 0x413   : > { %2216 = vst [vmem:[%s3212_s0 + $0x80] sm:$0xff] %v2184_v31  ;;  %v2185_v34 = vadd.f32 %v3372_v5, %v2102_v32 }
 0x414   : > { %2219 = vst [vmem:[%s3212_s0 + $0x98] sm:$0xff] %v2187_v33 }
 0x415   : > { %2217 = vst [vmem:[%s3212_s0 + $0x88] sm:$0xff] %v2185_v34 }
 0x419   : > { %v2687_v37 = vpop.f32.mrb[4].mxu0 }
 0x41a   : > { %v2059_v39 = vadd.f32 %v2687_v37, %v1926_v35  ;;  %v2050_v40 = vpop.f32.mrb[5].mxu0  ;;  %v1932_v37 = vld [vmem:[#allocation3 + $0x60] sm:$0xff] }
 0x41b   : > { %v2051_v42 = vadd.f32 %v2050_v40, %v1924_v36  ;;  %v2688_v43 = vpop.f32.mrb[6].mxu0  ;;  %v1934_v36 = vld [vmem:[#allocation3 + $0x70] sm:$0xff] }
 0x41c   : > { %v2174_v45 = vadd.f32 %v3372_v5, %v2059_v39  ;;  %v2062_v46 = vadd.f32 %v2688_v43, %v1927_v38  ;;  %v2053_v47 = vpop.f32.mrb[7].mxu0  ;;  %v1935_v39 = vld [vmem:[#allocation3 + $0x78] sm:$0xff] }
 0x41d   : > { %v2172_v49 = vadd.f32 %v3372_v5, %v2051_v42  ;;  %v2054_v50 = vadd.f32 %v2053_v47, %v1925_v41  ;;  %v2703_v51 = vpop.f32.mrb[4].mxu1  ;;  %v1933_v42 = vld [vmem:[#allocation3 + $0x68] sm:$0xff] }
 0x41e   : > { %2206 = vst [vmem:[%s3212_s0 + $0x30] sm:$0xff] %v2174_v45  ;;  %v2175_v53 = vadd.f32 %v3372_v5, %v2062_v46  ;;  %v2123_v54 = vadd.f32 %v2703_v51, %v1942_v44  ;;  %v2114_v55 = vpop.f32.mrb[5].mxu1  ;;  %v1950_v45 = vld [vmem:[#allocation3 + $0xf0] sm:$0xff] }
 0x41f   : > { %2204 = vst [vmem:[%s3212_s0 + $0x20] sm:$0xff] %v2172_v49  ;;  %v2173_v57 = vadd.f32 %v3372_v5, %v2054_v50  ;;  %v2115_v58 = vadd.f32 %v2114_v55, %v1940_v48  ;;  %v2704_v59 = vpop.f32.mrb[6].mxu1  ;;  %v1948_v49 = vld [vmem:[#allocation3 + $0xe0] sm:$0xff] }
 0x420   : > { %2207 = vst [vmem:[%s3212_s0 + $0x38] sm:$0xff] %v2175_v53  ;;  %v2190_v60 = vadd.f32 %v3372_v5, %v2123_v54  ;;  %v2126_v61 = vadd.f32 %v2704_v59, %v1943_v52  ;;  %v2117_v62 = vpop.f32.mrb[7].mxu1  ;;  %v1951_v53 = vld [vmem:[#allocation3 + $0xf8] sm:$0xff] }
 0x421   : > { %2205 = vst [vmem:[%s3212_s0 + $0x28] sm:$0xff] %v2173_v57  ;;  %v2188_v63 = vadd.f32 %v3372_v5, %v2115_v58  ;;  %v2118_v0 = vadd.f32 %v2117_v62, %v1941_v56  ;;  %v1949_v57 = vld [vmem:[#allocation3 + $0xe8] sm:$0xff] }
 0x422   : > { %2222 = vst [vmem:[%s3212_s0 + $0xb0] sm:$0xff] %v2190_v60  ;;  %v2191_v1 = vadd.f32 %v3372_v5, %v2126_v61 }
 0x423   : > { %2220 = vst [vmem:[%s3212_s0 + $0xa0] sm:$0xff] %v2188_v63  ;;  %v2189_v2 = vadd.f32 %v3372_v5, %v2118_v0 }
 0x424   : > { %2223 = vst [vmem:[%s3212_s0 + $0xb8] sm:$0xff] %v2191_v1 }
 0x425   : > { %2221 = vst [vmem:[%s3212_s0 + $0xa8] sm:$0xff] %v2189_v2 }
 0x429   : > { %v2691_v6 = vpop.f32.mrb[8].mxu0 }
 0x42a   : > { %v2075_v8 = vadd.f32 %v2691_v6, %v1930_v3  ;;  %v2066_v9 = vpop.f32.mrb[9].mxu0 }
 0x42b   : > { %v2067_v11 = vadd.f32 %v2066_v9, %v1928_v4  ;;  %v2692_v12 = vpop.f32.mrb[10].mxu0 }
 0x42c   : > { %v2178_v14 = vadd.f32 %v3372_v5, %v2075_v8  ;;  %v2078_v15 = vadd.f32 %v2692_v12, %v1931_v7  ;;  %v2069_v16 = vpop.f32.mrb[11].mxu0 }
 0x42d   : > { %v2176_v18 = vadd.f32 %v3372_v5, %v2067_v11  ;;  %v2070_v19 = vadd.f32 %v2069_v16, %v1929_v10  ;;  %v2707_v20 = vpop.f32.mrb[8].mxu1 }
 0x42e   : > { %2210 = vst [vmem:[%s3212_s0 + $0x50] sm:$0xff] %v2178_v14  ;;  %v2179_v22 = vadd.f32 %v3372_v5, %v2078_v15  ;;  %v2139_v23 = vadd.f32 %v2707_v20, %v1946_v13  ;;  %v2130_v24 = vpop.f32.mrb[9].mxu1 }
 0x42f   : > { %2208 = vst [vmem:[%s3212_s0 + $0x40] sm:$0xff] %v2176_v18  ;;  %v2177_v26 = vadd.f32 %v3372_v5, %v2070_v19  ;;  %v2131_v27 = vadd.f32 %v2130_v24, %v1944_v17  ;;  %v2708_v28 = vpop.f32.mrb[10].mxu1 }
 0x430   : > { %2211 = vst [vmem:[%s3212_s0 + $0x58] sm:$0xff] %v2179_v22  ;;  %v2194_v29 = vadd.f32 %v3372_v5, %v2139_v23  ;;  %v2142_v30 = vadd.f32 %v2708_v28, %v1947_v21  ;;  %v2133_v31 = vpop.f32.mrb[11].mxu1 }
 0x431   : > { %2209 = vst [vmem:[%s3212_s0 + $0x48] sm:$0xff] %v2177_v26  ;;  %v2192_v32 = vadd.f32 %v3372_v5, %v2131_v27  ;;  %v2134_v33 = vadd.f32 %v2133_v31, %v1945_v25 }
 0x432   : > { %2226 = vst [vmem:[%s3212_s0 + $0xd0] sm:$0xff] %v2194_v29  ;;  %v2195_v34 = vadd.f32 %v3372_v5, %v2142_v30 }
 0x433   : > { %2224 = vst [vmem:[%s3212_s0 + $0xc0] sm:$0xff] %v2192_v32  ;;  %v2193_v35 = vadd.f32 %v3372_v5, %v2134_v33 }
 0x434   : > { %2227 = vst [vmem:[%s3212_s0 + $0xd8] sm:$0xff] %v2195_v34 }
 0x435   : > { %2225 = vst [vmem:[%s3212_s0 + $0xc8] sm:$0xff] %v2193_v35 }
 0x439   : > { %v2695_v38 = vpop.f32.mrb[12].mxu0 }
 0x43a   : > { %v2091_v40 = vadd.f32 %v2695_v38, %v1934_v36  ;;  %v2082_v41 = vpop.f32.mrb[13].mxu0 }
 0x43b   : > { %v2083_v43 = vadd.f32 %v2082_v41, %v1932_v37  ;;  %v2696_v44 = vpop.f32.mrb[14].mxu0 }
 0x43c   : > { %v2182_v46 = vadd.f32 %v3372_v5, %v2091_v40  ;;  %v2094_v47 = vadd.f32 %v2696_v44, %v1935_v39  ;;  %v2085_v48 = vpop.f32.mrb[15].mxu0 }
 0x43d   : > { %v2180_v50 = vadd.f32 %v3372_v5, %v2083_v43  ;;  %v2086_v51 = vadd.f32 %v2085_v48, %v1933_v42  ;;  %v2711_v52 = vpop.f32.mrb[12].mxu1 }
 0x43e   : > { %2214 = vst [vmem:[%s3212_s0 + $0x70] sm:$0xff] %v2182_v46  ;;  %v2183_v54 = vadd.f32 %v3372_v5, %v2094_v47  ;;  %v2155_v55 = vadd.f32 %v2711_v52, %v1950_v45  ;;  %v2146_v56 = vpop.f32.mrb[13].mxu1 }
 0x43f   : > { %2212 = vst [vmem:[%s3212_s0 + $0x60] sm:$0xff] %v2180_v50  ;;  %v2181_v58 = vadd.f32 %v3372_v5, %v2086_v51  ;;  %v2147_v59 = vadd.f32 %v2146_v56, %v1948_v49  ;;  %v2712_v60 = vpop.f32.mrb[14].mxu1 }
 0x440   : > { %2215 = vst [vmem:[%s3212_s0 + $0x78] sm:$0xff] %v2183_v54  ;;  %v2198_v61 = vadd.f32 %v3372_v5, %v2155_v55  ;;  %v2158_v62 = vadd.f32 %v2712_v60, %v1951_v53  ;;  %v2149_v63 = vpop.f32.mrb[15].mxu1 }
 0x441   : > { %2213 = vst [vmem:[%s3212_s0 + $0x68] sm:$0xff] %v2181_v58  ;;  %v2196_v0 = vadd.f32 %v3372_v5, %v2147_v59  ;;  %v2150_v1 = vadd.f32 %v2149_v63, %v1949_v57 }
 0x442   : > { %2230 = vst [vmem:[%s3212_s0 + $0xf0] sm:$0xff] %v2198_v61  ;;  %v2199_v2 = vadd.f32 %v3372_v5, %v2158_v62 }
 0x443   : > { %2228 = vst [vmem:[%s3212_s0 + $0xe0] sm:$0xff] %v2196_v0  ;;  %v2197_v3 = vadd.f32 %v3372_v5, %v2150_v1 }
 0x444   : > { %2231 = vst [vmem:[%s3212_s0 + $0xf8] sm:$0xff] %v2199_v2 }
 0x445   : > { %2229 = vst [vmem:[%s3212_s0 + $0xe8] sm:$0xff] %v2197_v3 }
 0x446 PF: > { %s29_s23 = sadd.s32 1, %s2999_s23   ;;  %s3475_s15 = sld [smem:[#allocation9_spill]] }
 0x447   : > { %p26_p11 = scmp.ge.s32.totalorder %s29_s23, 6   ;;  %s3476_s11 = sld [smem:[#allocation10_spill]] }
 0x448   : > { %s3477_s1 = smov %s2979_s18  ;;  %s3478_s18 = smov %s3116_s28 }
 0x449   : > { %s3479_s19 = smov %s2991_s21  ;;  %s3480_s20 = smov %s2995_s22 }
 0x44a   :  { %28 = sbr.rel (!%p26_p11) target bundleno = 30 (0x1e), region = 142 }
 0x44c   : > { %s3481_s21 = smov %s3475_s15 }
 0x44d   : > { %s3482_s22 = smov %s3476_s11 }

// kernel: graphsage_forward.3
= control target key start
LH: loop header
LB: loop body
LE: loop exit
PB: predicated region body
PF: predicated region fallthrough
CT: control target
= control target key end

     0   :  { %s3762_s0 = inlined_call_operand.vmem [shape: s32[2,2], index: 0, kind: input, shape index: {}]   ;;  %s3763_s2 = inlined_call_operand.vmem [shape: bf16[512,512], index: 2, kind: input, shape index: {}]   ;;  %s3764_s3 = inlined_call_operand.vmem [shape: bf16[512,128], index: 3, kind: input, shape index: {}, may-alias: {3,4}]   ;;  %s3765_s4 = inlined_call_operand.vmem [shape: bf16[512,128], index: 4, kind: input, shape index: {}, may-alias: {3,4}]   ;;  %s3766_s5 = inlined_call_operand.vmem [shape: f32[512,1], index: 5, kind: input, shape index: {}]   ;;  %s3767_s6 = inlined_call_operand.vmem [shape: bf16[128,128], index: 6, kind: input, shape index: {}]   ;;  %s3768_s7 = inlined_call_operand.vmem [shape: bf16[128,128], index: 7, kind: input, shape index: {}]   ;;  %s3769_s8 = inlined_call_operand.vmem [shape: f32[1,128], index: 8, kind: input, shape index: {}]   ;;  %s3770_s9 = inlined_call_operand.vmem [shape: bf16[512,128], index: 9, kind: output, shape index: {}]   ;;  %s3771_s1 = inlined_call_operand.vmem [shape: s32[2], index: 1, kind: input, shape index: {}]  }
   0x1   :  { %3774 = sst [smem:[#allocation11_spill]] %s3763_s2  ;;  %s14_s11 = sshll.u32 %s3762_s0, 4  ;;  %s15_s11 = int_to_ptr.vmem [resolvable:$true] %s14_s11 }
   0x2   :  { %s18_s14 = sshll.u32 %s3771_s1, 4  ;;  %s3238_s15 = scalar_lea.vmem %s15_s11, 32  ;;  %s19_s14 = int_to_ptr.vmem [resolvable:$true] %s18_s14 }
   0x3   :  { %p3239_p0 = scmp.ne.s32.totalorder %s15_s11, %s3238_s15  ;;  %p3243_p1 = scmp.lt.s32.totalorder %s15_s11, %s15_s11 }
   0x4   :  { %p3244_p2 = scmp.lt.s32.totalorder %s3238_s15, %s3238_s15 }
   0x6   :  { %p3245_p3 = por %p3244_p2, %p3243_p1 }
   0x8   :  { %p3246_p4 = pnand %p3245_p3, %p3239_p0 }
   0xa   :  { %3249 = shalt.err (!%p3246_p4)  }
   0xb   :  { %s3320_s16 = smov [#allocation5]   ;;  %s3250_s17 = scalar_lea.vmem %s19_s14, 16 }
   0xc   :  { %17 = dma.vmem_to_smem %s15_s11, 32, %s3320_s16, [#allocation4] }
   0xd   :  { %p3251_p5 = scmp.ne.s32.totalorder %s19_s14, %s3250_s17  ;;  %p3255_p6 = scmp.lt.s32.totalorder %s19_s14, %s19_s14 }
   0xe   :  { %p3256_p7 = scmp.lt.s32.totalorder %s3250_s17, %s3250_s17 }
  0x10   :  { %p3257_p8 = por %p3256_p7, %p3255_p6 }
  0x12   :  { %p3258_p9 = pnand %p3257_p8, %p3251_p5 }
  0x14   :  { %3261 = shalt.err (!%p3258_p9)  }
  0x15   :  { %s3321_s0 = smov [#allocation6]  }
  0x16   :  { %21 = dma.vmem_to_smem %s19_s14, 16, %s3321_s0, [#allocation4] }
  0x17   :  { %3290 = dma.done.wait [#allocation4], 48 }
  0x18   :  { %3291 = vsyncadd [#allocation4], 4294967248 }
  0x19   :  { %23 = sfence }
  0x1a   :  { %s3380_s1 = smov 0   ;;  %s3382_s18 = smov 0  }
  0x1b   :  { %s3384_s19 = smov 0   ;;  %s3386_s20 = smov 0  }
  0x1c   :  { %s3388_s21 = smov 0   ;;  %s3390_s22 = smov 0  }
  0x1d   :  { %s3392_s23 = smov 0  }
  0x1e LB: > { %s38_s24 = sadd.s32 1, %s3310_s21  ;;  %s41_s25 = sadd.s32 1, %s3314_s22  ;;  %s3318_s23 = sphi %s3392_s23, %s29_s23   ;;  %s3314_s22 = sphi %s3390_s22, %s3785_s22   ;;  %s3310_s21 = sphi %s3388_s21, %s3784_s21   ;;  %s3306_s20 = sphi %s3386_s20, %s3783_s20   ;;  %s3302_s19 = sphi %s3384_s19, %s3782_s19   ;;  %s3298_s18 = sphi %s3382_s18, %s3781_s18   ;;  %s3294_s1 = sphi %s3380_s1, %s3780_s1  }
  0x1f   : > { %p39_p10 = scmp.ge.s32.totalorder %s38_s24, 2  ;;  %s45_s26 = sshra.s32 %s3310_s21, 7 }
  0x20   : > { %s47_s27 = sadd.s32 %s3314_s22, %s45_s26  ;;  %s50_s28 = sand.u32 127, %s3310_s21 }
  0x21   : > { %s3787_s24 = smov (%p39_p10, %s38_s24), 0  ;;  %s3789_s25 = smov (!%p39_p10, %s41_s25), %s3314_s22 }
  0x22   : > { %3775 = sst [smem:[#allocation9_spill]] %s3787_s24  ;;  %s2507_s29 = sshll.u32 %s47_s27, 7 }
  0x23   : > { %p43_p11 = scmp.ge.s32.totalorder %s3789_s25, 2  ;;  %s51_s30 = sadd.s32 %s2507_s29, %s50_s28 }
  0x24   : > { %s53_s10 = sshra.s32 %s3787_s24, 7  ;;  %s58_s11 = sand.u32 127, %s3787_s24 }
  0x25   : > { %s3791_s25 = smov (%p43_p11, %s3789_s25), 0  ;;  %p73_p12 = scmp.ne.s32.totalorder %s3298_s18, %s3294_s1 }
  0x26   : > { %3776 = sst [smem:[#allocation10_spill]] %s3791_s25  ;;  %s55_s13 = sadd.s32 %s53_s10, %s3791_s25 }
  0x27   : > { %s52_s12 = sld [smem:[#allocation5 + %s51_s30]]  ;;  %s2508_s14 = sshll.u32 %s55_s13, 7 }
  0x28   : > { %p74_p13 = scmp.eq.s32.totalorder %s3318_s23, 0  ;;  %s59_s15 = sadd.s32 %s2508_s14, %s58_s11 }
  0x29   : > { %s60_s16 = sld [smem:[#allocation5 + %s59_s15]]  ;;  %s61_s17 = ssub.s32 %s3314_s22, %s3791_s25 }
  0x2a   : > { %p75_p0 = por %p74_p13, %p73_p12  ;;  %s66_s27 = sadd.s32 1, %s3298_s18 }
  0x2b   : > { %p2512_p2 = scmp.ge.s32.totalorder %s3318_s23, 4 }
  0x2d   : > { %291 = sbr.rel (%p2512_p2) target bundleno = 79 (0x4f), region = 28 }
  0x2f   : > { %s62_s0 = ssub.s32 %s52_s12, %s60_s16 }
  0x30   : > { %s63_s26 = sor.u32 %s62_s0, %s61_s17 }
  0x31   : > { %p64_p1 = scmp.eq.s32.totalorder %s63_s26, 0 }
  0x33   : > { %s3435_s28 = scalar_select %p64_p1, %s3298_s18, %s66_s27  }
  0x34   : > { %294 = sbr.rel (!%p75_p0) target bundleno = 79 (0x4f), region = 32  ;;  %s306_s29 = sld [smem:[#allocation5 + %s51_s30]] (%p75_p0) }
  0x35   : > { %s296_s10 = sand.u32 (%p75_p0), 1, %s3298_s18   ;;  %s2648_s13 = sshll.u32 (%p75_p0), %s3314_s22, 7 }
  0x36   : > { %s2513_s24 = sshll.u32 (%p75_p0), %s296_s10, 8  ;;  %s3777_s2 = sld [smem:[#allocation11_spill]] (%p75_p0) }
  0x37   : > { %s3448_s30 = scalar_lea.vmem (%p75_p0), [#allocation7], %s2513_s24 }
  0x3a   : > { %s2516_s11 = sshll.u32 (%p75_p0), %s306_s29, 1 }
  0x3b   : > { %s310_s14 = sadd.s32 %s2648_s13, %s2516_s11 }
  0x3c   : > { %s2518_s15 = sshll.u32 %s310_s14, 2 }
  0x3d   : > { %s3443_s16 = scalar_lea.vmem %s3777_s2, %s2518_s15 }
  0x3e   : > { %v402_v0 = vld [vmem:[%s3443_s16] sm:$0xff]  ;;  %v404_v1 = vld [vmem:[%s3443_s16 + $0x10] sm:$0xff] }
  0x3f   : > { %v406_v2 = vld [vmem:[%s3443_s16 + $0x20] sm:$0xff]  ;;  %403 = vst [vmem:[%s3448_s30] sm:$0xff] %v402_v0  ;;  %405 = vst [vmem:[%s3448_s30 + $0x8] sm:$0xff] %v404_v1  ;;  %v408_v3 = vld [vmem:[%s3443_s16 + $0x30] sm:$0xff] }
  0x40   : > { %407 = vst [vmem:[%s3448_s30 + $0x10] sm:$0xff] %v406_v2  ;;  %v410_v4 = vld [vmem:[%s3443_s16 + $0x40] sm:$0xff]  ;;  %v412_v5 = vld [vmem:[%s3443_s16 + $0x50] sm:$0xff]  ;;  %409 = vst [vmem:[%s3448_s30 + $0x18] sm:$0xff] %v408_v3 }
  0x41   : > { %411 = vst [vmem:[%s3448_s30 + $0x20] sm:$0xff] %v410_v4  ;;  %413 = vst [vmem:[%s3448_s30 + $0x28] sm:$0xff] %v412_v5  ;;  %v414_v6 = vld [vmem:[%s3443_s16 + $0x60] sm:$0xff]  ;;  %v416_v7 = vld [vmem:[%s3443_s16 + $0x70] sm:$0xff] }
  0x42   : > { %v418_v8 = vld [vmem:[%s3443_s16 + $0x80] sm:$0xff]  ;;  %415 = vst [vmem:[%s3448_s30 + $0x30] sm:$0xff] %v414_v6  ;;  %417 = vst [vmem:[%s3448_s30 + $0x38] sm:$0xff] %v416_v7  ;;  %v420_v9 = vld [vmem:[%s3443_s16 + $0x90] sm:$0xff] }
  0x43   : > { %419 = vst [vmem:[%s3448_s30 + $0x40] sm:$0xff] %v418_v8  ;;  %v422_v10 = vld [vmem:[%s3443_s16 + $0xa0] sm:$0xff]  ;;  %v424_v11 = vld [vmem:[%s3443_s16 + $0xb0] sm:$0xff]  ;;  %421 = vst [vmem:[%s3448_s30 + $0x48] sm:$0xff] %v420_v9 }
  0x44   : > { %423 = vst [vmem:[%s3448_s30 + $0x50] sm:$0xff] %v422_v10  ;;  %425 = vst [vmem:[%s3448_s30 + $0x58] sm:$0xff] %v424_v11  ;;  %v426_v12 = vld [vmem:[%s3443_s16 + $0xc0] sm:$0xff]  ;;  %v428_v13 = vld [vmem:[%s3443_s16 + $0xd0] sm:$0xff] }
  0x45   : > { %v430_v14 = vld [vmem:[%s3443_s16 + $0xe0] sm:$0xff]  ;;  %427 = vst [vmem:[%s3448_s30 + $0x60] sm:$0xff] %v426_v12  ;;  %429 = vst [vmem:[%s3448_s30 + $0x68] sm:$0xff] %v428_v13  ;;  %v432_v15 = vld [vmem:[%s3443_s16 + $0xf0] sm:$0xff] }
  0x46   : > { %431 = vst [vmem:[%s3448_s30 + $0x70] sm:$0xff] %v430_v14  ;;  %v434_v16 = vld [vmem:[%s3443_s16 + $0x100] sm:$0xff]  ;;  %v436_v17 = vld [vmem:[%s3443_s16 + $0x110] sm:$0xff]  ;;  %433 = vst [vmem:[%s3448_s30 + $0x78] sm:$0xff] %v432_v15 }
  0x47   : > { %435 = vst [vmem:[%s3448_s30 + $0x80] sm:$0xff] %v434_v16  ;;  %437 = vst [vmem:[%s3448_s30 + $0x88] sm:$0xff] %v436_v17  ;;  %v438_v18 = vld [vmem:[%s3443_s16 + $0x120] sm:$0xff]  ;;  %v440_v19 = vld [vmem:[%s3443_s16 + $0x130] sm:$0xff] }
  0x48   : > { %v442_v20 = vld [vmem:[%s3443_s16 + $0x140] sm:$0xff]  ;;  %439 = vst [vmem:[%s3448_s30 + $0x90] sm:$0xff] %v438_v18  ;;  %441 = vst [vmem:[%s3448_s30 + $0x98] sm:$0xff] %v440_v19  ;;  %v444_v21 = vld [vmem:[%s3443_s16 + $0x150] sm:$0xff] }
  0x49   : > { %443 = vst [vmem:[%s3448_s30 + $0xa0] sm:$0xff] %v442_v20  ;;  %v446_v22 = vld [vmem:[%s3443_s16 + $0x160] sm:$0xff]  ;;  %v448_v23 = vld [vmem:[%s3443_s16 + $0x170] sm:$0xff]  ;;  %445 = vst [vmem:[%s3448_s30 + $0xa8] sm:$0xff] %v444_v21 }
  0x4a   : > { %447 = vst [vmem:[%s3448_s30 + $0xb0] sm:$0xff] %v446_v22  ;;  %449 = vst [vmem:[%s3448_s30 + $0xb8] sm:$0xff] %v448_v23  ;;  %v450_v24 = vld [vmem:[%s3443_s16 + $0x180] sm:$0xff]  ;;  %v452_v25 = vld [vmem:[%s3443_s16 + $0x190] sm:$0xff] }
  0x4b   : > { %v454_v26 = vld [vmem:[%s3443_s16 + $0x1a0] sm:$0xff]  ;;  %451 = vst [vmem:[%s3448_s30 + $0xc0] sm:$0xff] %v450_v24  ;;  %453 = vst [vmem:[%s3448_s30 + $0xc8] sm:$0xff] %v452_v25  ;;  %v456_v27 = vld [vmem:[%s3443_s16 + $0x1b0] sm:$0xff] }
  0x4c   : > { %455 = vst [vmem:[%s3448_s30 + $0xd0] sm:$0xff] %v454_v26  ;;  %v458_v28 = vld [vmem:[%s3443_s16 + $0x1c0] sm:$0xff]  ;;  %v460_v29 = vld [vmem:[%s3443_s16 + $0x1d0] sm:$0xff]  ;;  %457 = vst [vmem:[%s3448_s30 + $0xd8] sm:$0xff] %v456_v27 }
  0x4d   : > { %459 = vst [vmem:[%s3448_s30 + $0xe0] sm:$0xff] %v458_v28  ;;  %461 = vst [vmem:[%s3448_s30 + $0xe8] sm:$0xff] %v460_v29  ;;  %v462_v30 = vld [vmem:[%s3443_s16 + $0x1e0] sm:$0xff]  ;;  %v464_v31 = vld [vmem:[%s3443_s16 + $0x1f0] sm:$0xff] }
  0x4e   : > { %463 = vst [vmem:[%s3448_s30 + $0xf0] sm:$0xff] %v462_v30  ;;  %465 = vst [vmem:[%s3448_s30 + $0xf8] sm:$0xff] %v464_v31 }
  0x4f PF: > { %p2519_p3 = scmp.ge.s32.totalorder %s3318_s23, 1  ;;  %p513_p4 = scmp.lt.s32.totalorder %s3318_s23, 5 }
  0x51   : > { %p514_p5 = pnand %p2519_p3, %p513_p4 }
  0x52   : > { %s520_s24 = sand.u32 (!%p514_p5), 1, %s3294_s1   ;;  %s584_s25 = sshra.s32 (!%p514_p5), %s3302_s19, 7 }
  0x53   : > { %517 = sbr.rel (%p514_p5) target bundleno = 1098 (0x44a), region = 82  ;;  %s2520_s17 = sshll.u32 (!%p514_p5), %s520_s24, 8 }
  0x54   : > { %s586_s0 = sadd.s32 (!%p514_p5), %s3306_s20, %s584_s25  ;;  %s589_s27 = sand.u32 (!%p514_p5), 127, %s3302_s19 }
  0x55   : > { %s2521_s26 = sshll.u32 (!%p514_p5), %s586_s0, 7  ;;  %s2524_s29 = sshll.u32 (!%p514_p5), %s3306_s20, 5 }
  0x56   : > { %s590_s10 = sadd.s32 (!%p514_p5), %s2521_s26, %s589_s27  ;;  %p607_p6 = scmp.lt.s32.totalorder (!%p514_p5), %s2524_s29, 63 }
  0x57   : > { %s591_s13 = sld [smem:[#allocation5 + %s590_s10]] (!%p514_p5)  ;;  %s3538_s12 = scalar_lea.vmem (!%p514_p5), [#allocation7], %s2520_s17 }
  0x58   : > { %p2530_p8 = scmp.ne.s32.totalorder (!%p514_p5), %s3302_s19, 0 }
  0x5a   : > { %s3793_s29 = smov (!%p607_p6, %s2524_s29), 63  ;;  %v3140_v32 = vld [vmem:[%s3768_s7] sm:$0xff] (!%p2530_p8)   ;;  %v3322_v33 = vmov (!%p2530_p8), 0.0   ;;  %v3141_v34 = vld [vmem:[%s3768_s7 + $0x8] sm:$0xff] (!%p2530_p8)   ;;  %v3142_v35 = vld [vmem:[%s3768_s7 + $0x10] sm:$0xff] (!%p2530_p8)  }
  0x5b   : > { %s2525_s11 = sshll.u32 %s3793_s29, 2  ;;  %s2527_s14 = sshll.u32 %s3793_s29, 3  ;;  %629 = vst [vmem:[#allocation2] sm:$0xff] (!%p2530_p8), %v3322_v33  ;;  %630 = vst [vmem:[#allocation2 + $0x8] sm:$0xff] (!%p2530_p8), %v3322_v33  ;;  %2936 = vmatprep.subr.bf16.mxu0 (!%p2530_p8), %v3140_v32  ;;  %3032 = vmatprep.subr.bf16.mxu1 (!%p2530_p8), %v3140_v32  ;;  %v3143_v36 = vld [vmem:[%s3768_s7 + $0x18] sm:$0xff] (!%p2530_p8)   ;;  %v3144_v39 = vld [vmem:[%s3768_s7 + $0x20] sm:$0xff] (!%p2530_p8)  }
  0x5c   : > { %s3521_s16 = scalar_lea.vmem %s3765_s4, %s2525_s11  ;;  %s3526_s1 = scalar_lea.vmem %s3766_s5, %s2527_s14  ;;  %631 = vst [vmem:[#allocation2 + $0x10] sm:$0xff] (!%p2530_p8), %v3322_v33  ;;  %632 = vst [vmem:[#allocation2 + $0x18] sm:$0xff] (!%p2530_p8), %v3322_v33  ;;  %2937 = vmatpush3.bf16.msra.mxu0 (!%p2530_p8), %v3140_v32  ;;  %3040 = vmatpush3.bf16.msra.mxu1 (!%p2530_p8), %v3140_v32  ;;  %v3145_v40 = vld [vmem:[%s3768_s7 + $0x28] sm:$0xff] (!%p2530_p8)   ;;  %v3146_v41 = vld [vmem:[%s3768_s7 + $0x30] sm:$0xff] (!%p2530_p8)  }
  0x5d   : > { %s3531_s0 = scalar_lea.vmem %s3770_s9, %s2525_s11  ;;  %s2522_s26 = sshll.u32 %s591_s13, 5  ;;  %633 = vst [vmem:[#allocation2 + $0x20] sm:$0xff] (!%p2530_p8), %v3322_v33  ;;  %634 = vst [vmem:[#allocation2 + $0x28] sm:$0xff] (!%p2530_p8), %v3322_v33  ;;  %2938 = vmatprep.subr.bf16.mxu0 (!%p2530_p8), %v3141_v34  ;;  %3033 = vmatprep.subr.bf16.mxu1 (!%p2530_p8), %v3141_v34  ;;  %v3148_v37 = vld [vmem:[%s3521_s16] sm:$0xff] (!%p2530_p8)   ;;  %v3147_v42 = vld [vmem:[%s3768_s7 + $0x38] sm:$0xff] (!%p2530_p8)  }
  0x5e   : > { %p593_p7 = scmp.lt.s32.totalorder %s2522_s26, 63  ;;  %628 = sbr.rel (%p2530_p8) target bundleno = 363 (0x16b), region = 90  ;;  %635 = vst [vmem:[#allocation2 + $0x30] sm:$0xff] (!%p2530_p8), %v3322_v33  ;;  %636 = vst [vmem:[#allocation2 + $0x38] sm:$0xff] (!%p2530_p8), %v3322_v33  ;;  %v3149_v38 = vld [vmem:[%s3521_s16 + $0x40] sm:$0xff] (!%p2530_p8)   ;;  %2952 = vmatprep.mubr.bf16.mxu0 (!%p2530_p8), %v3148_v37  ;;  %v3150_v43 = vld [vmem:[%s3521_s16 + $0x8] sm:$0xff] (!%p2530_p8)  }
  0x5f   : > { %637 = vst [vmem:[#allocation2 + $0x40] sm:$0xff] (!%p2530_p8), %v3322_v33  ;;  %638 = vst [vmem:[#allocation2 + $0x48] sm:$0xff] (!%p2530_p8), %v3322_v33  ;;  %2968 = vmatprep.mubr.bf16.mxu1 (!%p2530_p8), %v3149_v38  ;;  %v3151_v44 = vld [vmem:[%s3521_s16 + $0x48] sm:$0xff] (!%p2530_p8)   ;;  %v3152_v45 = vld [vmem:[%s3521_s16 + $0x10] sm:$0xff] (!%p2530_p8)  }
  0x60   : > { %s3795_s26 = smov (!%p593_p7, %s2522_s26), 63  ;;  %639 = vst [vmem:[#allocation2 + $0x50] sm:$0xff] (!%p2530_p8), %v3322_v33  ;;  %640 = vst [vmem:[#allocation2 + $0x58] sm:$0xff] (!%p2530_p8), %v3322_v33  ;;  %2939 = vmatpush3.bf16.msra.mxu0 (!%p2530_p8), %v3141_v34  ;;  %3041 = vmatpush3.bf16.msra.mxu1 (!%p2530_p8), %v3141_v34  ;;  %v3153_v46 = vld [vmem:[%s3521_s16 + $0x50] sm:$0xff] (!%p2530_p8)   ;;  %v3154_v47 = vld [vmem:[%s3521_s16 + $0x18] sm:$0xff] (!%p2530_p8)  }
  0x61   : > { %s2523_s27 = sshll.u32 %s3795_s26, 2  ;;  %641 = vst [vmem:[#allocation2 + $0x60] sm:$0xff] (!%p2530_p8), %v3322_v33  ;;  %642 = vst [vmem:[#allocation2 + $0x68] sm:$0xff] (!%p2530_p8), %v3322_v33  ;;  %2940 = vmatprep.subr.bf16.mxu0 (!%p2530_p8), %v3142_v35  ;;  %3034 = vmatprep.subr.bf16.mxu1 (!%p2530_p8), %v3142_v35  ;;  %v3155_v48 = vld [vmem:[%s3521_s16 + $0x58] sm:$0xff] (!%p2530_p8)   ;;  %v3156_v49 = vld [vmem:[%s3521_s16 + $0x20] sm:$0xff] (!%p2530_p8)  }
  0x62   : > { %s3536_s15 = scalar_lea.vmem %s3764_s3, %s2523_s27  ;;  %643 = vst [vmem:[#allocation2 + $0x70] sm:$0xff] (!%p2530_p8), %v3322_v33  ;;  %644 = vst [vmem:[#allocation2 + $0x78] sm:$0xff] (!%p2530_p8), %v3322_v33  ;;  %v3157_v50 = vld [vmem:[%s3521_s16 + $0x60] sm:$0xff] (!%p2530_p8)   ;;  %v3158_v51 = vld [vmem:[%s3521_s16 + $0x28] sm:$0xff] (!%p2530_p8)  }
  0x63   : > { %645 = vst [vmem:[#allocation2 + $0x80] sm:$0xff] (!%p2530_p8), %v3322_v33  ;;  %646 = vst [vmem:[#allocation2 + $0x88] sm:$0xff] (!%p2530_p8), %v3322_v33  ;;  %v3159_v52 = vld [vmem:[%s3521_s16 + $0x68] sm:$0xff] (!%p2530_p8)   ;;  %v3160_v53 = vld [vmem:[%s3521_s16 + $0x30] sm:$0xff] (!%p2530_p8)  }
  0x64   : > { %647 = vst [vmem:[#allocation2 + $0x90] sm:$0xff] (!%p2530_p8), %v3322_v33  ;;  %648 = vst [vmem:[#allocation2 + $0x98] sm:$0xff] (!%p2530_p8), %v3322_v33  ;;  %2941 = vmatpush3.bf16.msra.mxu0 (!%p2530_p8), %v3142_v35  ;;  %3042 = vmatpush3.bf16.msra.mxu1 (!%p2530_p8), %v3142_v35  ;;  %v3161_v54 = vld [vmem:[%s3521_s16 + $0x70] sm:$0xff] (!%p2530_p8)   ;;  %v3162_v55 = vld [vmem:[%s3521_s16 + $0x38] sm:$0xff] (!%p2530_p8)  }
  0x65   : > { %649 = vst [vmem:[#allocation2 + $0xa0] sm:$0xff] %v3322_v33  ;;  %650 = vst [vmem:[#allocation2 + $0xa8] sm:$0xff] %v3322_v33  ;;  %2942 = vmatprep.subr.bf16.mxu0 %v3143_v36  ;;  %3035 = vmatprep.subr.bf16.mxu1 %v3143_v36  ;;  %v3163_v56 = vld [vmem:[%s3521_s16 + $0x78] sm:$0xff]  }
  0x66   : > { %651 = vst [vmem:[#allocation2 + $0xb0] sm:$0xff] %v3322_v33  ;;  %652 = vst [vmem:[#allocation2 + $0xb8] sm:$0xff] %v3322_v33 }
  0x67   : > { %653 = vst [vmem:[#allocation2 + $0xc0] sm:$0xff] %v3322_v33  ;;  %654 = vst [vmem:[#allocation2 + $0xc8] sm:$0xff] %v3322_v33 }
  0x68   : > { %655 = vst [vmem:[#allocation2 + $0xd0] sm:$0xff] %v3322_v33  ;;  %656 = vst [vmem:[#allocation2 + $0xd8] sm:$0xff] %v3322_v33  ;;  %2943 = vmatpush3.bf16.msra.mxu0 %v3143_v36  ;;  %3043 = vmatpush3.bf16.msra.mxu1 %v3143_v36 }
  0x69   : > { %657 = vst [vmem:[#allocation2 + $0xe0] sm:$0xff] %v3322_v33  ;;  %658 = vst [vmem:[#allocation2 + $0xe8] sm:$0xff] %v3322_v33  ;;  %2944 = vmatprep.subr.bf16.mxu0 %v3144_v39  ;;  %3036 = vmatprep.subr.bf16.mxu1 %v3144_v39 }
  0x6a   : > { %659 = vst [vmem:[#allocation2 + $0xf0] sm:$0xff] %v3322_v33  ;;  %660 = vst [vmem:[#allocation2 + $0xf8] sm:$0xff] %v3322_v33 }
  0x6c   : > { %2945 = vmatpush3.bf16.msra.mxu0 %v3144_v39  ;;  %3044 = vmatpush3.bf16.msra.mxu1 %v3144_v39 }
  0x6d   : > { %2946 = vmatprep.subr.bf16.mxu0 %v3145_v40  ;;  %3037 = vmatprep.subr.bf16.mxu1 %v3145_v40 }
  0x70   : > { %2947 = vmatpush3.bf16.msra.mxu0 %v3145_v40  ;;  %3045 = vmatpush3.bf16.msra.mxu1 %v3145_v40 }
  0x71   : > { %2948 = vmatprep.subr.bf16.mxu0 %v3146_v41  ;;  %3038 = vmatprep.subr.bf16.mxu1 %v3146_v41 }
  0x74   : > { %2949 = vmatpush3.bf16.msra.mxu0 %v3146_v41  ;;  %3046 = vmatpush3.bf16.msra.mxu1 %v3146_v41 }
  0x75   : > { %2950 = vmatprep.subr.bf16.mxu0 %v3147_v42  ;;  %3039 = vmatprep.subr.bf16.mxu1 %v3147_v42 }
  0x78   : > { %2951 = vmatpush3.bf16.msra.mxu0 %v3147_v42  ;;  %3047 = vmatpush3.bf16.msra.mxu1 %v3147_v42 }
  0x7b   : > { %2953 = vmatmul.mubr.bf16.vlgmr.msra.gmra.mrb[0].mxu0 %v3150_v43  ;;  %2969 = vmatmul.mubr.bf16.vlgmr.msra.gmra.mrb[0].mxu1 %v3151_v44 }
  0x7c   : > { %2956 = vmatprep.mubr.bf16.mxu0 %v3152_v45  ;;  %2972 = vmatprep.mubr.bf16.mxu1 %v3153_v46 }
  0x83   : > { %2957 = vmatmul.mubr.bf16.gmra.mrb[4].mxu0 %v3154_v47  ;;  %2973 = vmatmul.mubr.bf16.gmra.mrb[4].mxu1 %v3155_v48 }
  0x84   : > { %2960 = vmatprep.mubr.bf16.mxu0 %v3156_v49  ;;  %2976 = vmatprep.mubr.bf16.mxu1 %v3157_v50 }
  0x8b   : > { %2961 = vmatmul.mubr.bf16.gmra.mrb[8].mxu0 %v3158_v51  ;;  %2977 = vmatmul.mubr.bf16.gmra.mrb[8].mxu1 %v3159_v52 }
  0x8c   : > { %2964 = vmatprep.mubr.bf16.mxu0 %v3160_v53  ;;  %2980 = vmatprep.mubr.bf16.mxu1 %v3161_v54 }
  0x93   : > { %2965 = vmatmul.mubr.bf16.gmra.mrb[12].mxu0 %v3162_v55  ;;  %2981 = vmatmul.mubr.bf16.gmra.mrb[12].mxu1 %v3163_v56 }
 0x14e   : > { %v2954_v57 = vpop.f32.mrb[0].mxu0  ;;  %v2970_v58 = vpop.f32.mrb[0].mxu1 }
 0x14f   : > { %1016 = vst [vmem:[#allocation3 + $0x10] sm:$0xff] %v2954_v57  ;;  %1032 = vst [vmem:[#allocation3 + $0x90] sm:$0xff] %v2970_v58  ;;  %v887_v59 = vpop.f32.mrb[1].mxu0  ;;  %v951_v60 = vpop.f32.mrb[1].mxu1 }
 0x150   : > { %1014 = vst [vmem:[#allocation3] sm:$0xff] %v887_v59  ;;  %1030 = vst [vmem:[#allocation3 + $0x80] sm:$0xff] %v951_v60  ;;  %v2955_v61 = vpop.f32.mrb[2].mxu0  ;;  %v2971_v62 = vpop.f32.mrb[2].mxu1 }
 0x151   : > { %1017 = vst [vmem:[#allocation3 + $0x18] sm:$0xff] %v2955_v61  ;;  %1033 = vst [vmem:[#allocation3 + $0x98] sm:$0xff] %v2971_v62  ;;  %v890_v63 = vpop.f32.mrb[3].mxu0  ;;  %v954_v0 = vpop.f32.mrb[3].mxu1 }
 0x152   : > { %1015 = vst [vmem:[#allocation3 + $0x8] sm:$0xff] %v890_v63  ;;  %1031 = vst [vmem:[#allocation3 + $0x88] sm:$0xff] %v954_v0 }
 0x156   : > { %v2958_v1 = vpop.f32.mrb[4].mxu0  ;;  %v2974_v2 = vpop.f32.mrb[4].mxu1 }
 0x157   : > { %1020 = vst [vmem:[#allocation3 + $0x30] sm:$0xff] %v2958_v1  ;;  %1036 = vst [vmem:[#allocation3 + $0xb0] sm:$0xff] %v2974_v2  ;;  %v903_v3 = vpop.f32.mrb[5].mxu0  ;;  %v967_v4 = vpop.f32.mrb[5].mxu1 }
 0x158   : > { %1018 = vst [vmem:[#allocation3 + $0x20] sm:$0xff] %v903_v3  ;;  %1034 = vst [vmem:[#allocation3 + $0xa0] sm:$0xff] %v967_v4  ;;  %v2959_v5 = vpop.f32.mrb[6].mxu0  ;;  %v2975_v6 = vpop.f32.mrb[6].mxu1 }
 0x159   : > { %1021 = vst [vmem:[#allocation3 + $0x38] sm:$0xff] %v2959_v5  ;;  %1037 = vst [vmem:[#allocation3 + $0xb8] sm:$0xff] %v2975_v6  ;;  %v906_v7 = vpop.f32.mrb[7].mxu0  ;;  %v970_v8 = vpop.f32.mrb[7].mxu1 }
 0x15a   : > { %1019 = vst [vmem:[#allocation3 + $0x28] sm:$0xff] %v906_v7  ;;  %1035 = vst [vmem:[#allocation3 + $0xa8] sm:$0xff] %v970_v8 }
 0x15e   : > { %v2962_v9 = vpop.f32.mrb[8].mxu0  ;;  %v2978_v10 = vpop.f32.mrb[8].mxu1 }
 0x15f   : > { %1024 = vst [vmem:[#allocation3 + $0x50] sm:$0xff] %v2962_v9  ;;  %1040 = vst [vmem:[#allocation3 + $0xd0] sm:$0xff] %v2978_v10  ;;  %v919_v11 = vpop.f32.mrb[9].mxu0  ;;  %v983_v12 = vpop.f32.mrb[9].mxu1 }
 0x160   : > { %1022 = vst [vmem:[#allocation3 + $0x40] sm:$0xff] %v919_v11  ;;  %1038 = vst [vmem:[#allocation3 + $0xc0] sm:$0xff] %v983_v12  ;;  %v2963_v13 = vpop.f32.mrb[10].mxu0  ;;  %v2979_v14 = vpop.f32.mrb[10].mxu1 }
 0x161   : > { %1025 = vst [vmem:[#allocation3 + $0x58] sm:$0xff] %v2963_v13  ;;  %1041 = vst [vmem:[#allocation3 + $0xd8] sm:$0xff] %v2979_v14  ;;  %v922_v15 = vpop.f32.mrb[11].mxu0  ;;  %v986_v16 = vpop.f32.mrb[11].mxu1 }
 0x162   : > { %1023 = vst [vmem:[#allocation3 + $0x48] sm:$0xff] %v922_v15  ;;  %1039 = vst [vmem:[#allocation3 + $0xc8] sm:$0xff] %v986_v16 }
 0x166   : > { %v2966_v17 = vpop.f32.mrb[12].mxu0  ;;  %v2982_v18 = vpop.f32.mrb[12].mxu1 }
 0x167   : > { %1028 = vst [vmem:[#allocation3 + $0x70] sm:$0xff] %v2966_v17  ;;  %1044 = vst [vmem:[#allocation3 + $0xf0] sm:$0xff] %v2982_v18  ;;  %v935_v19 = vpop.f32.mrb[13].mxu0  ;;  %v999_v20 = vpop.f32.mrb[13].mxu1 }
 0x168   : > { %1026 = vst [vmem:[#allocation3 + $0x60] sm:$0xff] %v935_v19  ;;  %1042 = vst [vmem:[#allocation3 + $0xe0] sm:$0xff] %v999_v20  ;;  %v2967_v21 = vpop.f32.mrb[14].mxu0  ;;  %v2983_v22 = vpop.f32.mrb[14].mxu1 }
 0x169   : > { %1029 = vst [vmem:[#allocation3 + $0x78] sm:$0xff] %v2967_v21  ;;  %1045 = vst [vmem:[#allocation3 + $0xf8] sm:$0xff] %v2983_v22  ;;  %v938_v23 = vpop.f32.mrb[15].mxu0  ;;  %v1002_v24 = vpop.f32.mrb[15].mxu1 }
 0x16a   : > { %1027 = vst [vmem:[#allocation3 + $0x68] sm:$0xff] %v938_v23  ;;  %1043 = vst [vmem:[#allocation3 + $0xe8] sm:$0xff] %v1002_v24 }
 0x16b PF: > { %s1046_s16 = sld [smem:[#allocation6 + %s3306_s20]] }
 0x171   : > { %p2555_p9 = scmp.ge.s32.totalorder %s3302_s19, %s1046_s16 }
 0x172   : > { %v3164_v25 = vld [vmem:[%s3536_s15 + $0x40] sm:$0xff] (!%p2555_p9)   ;;  %v3166_v27 = vld [vmem:[%s3536_s15 + $0x48] sm:$0xff] (!%p2555_p9)   ;;  %v3168_v29 = vld [vmem:[%s3536_s15 + $0x50] sm:$0xff] (!%p2555_p9)  }
 0x173   : > { %1050 = sbr.rel (%p2555_p9) target bundleno = 679 (0x2a7), region = 94  ;;  %v3165_v26 = vld [vmem:[%s3536_s15] sm:$0xff] (!%p2555_p9)   ;;  %2800 = vmatprep.subr.bf16.mxu0 (!%p2555_p9), %v3164_v25  ;;  %3048 = vmatprep.subr.bf16.mxu1 (!%p2555_p9), %v3164_v25  ;;  %v3167_v28 = vld [vmem:[%s3536_s15 + $0x8] sm:$0xff] (!%p2555_p9)   ;;  %v3169_v30 = vld [vmem:[%s3536_s15 + $0x10] sm:$0xff] (!%p2555_p9)  }
 0x174   : > { %2801 = vmatpush3.bf16.msra.mxu0 (!%p2555_p9), %v3165_v26  ;;  %3056 = vmatpush3.bf16.msra.mxu1 (!%p2555_p9), %v3165_v26  ;;  %v3170_v31 = vld [vmem:[%s3536_s15 + $0x58] sm:$0xff] (!%p2555_p9)   ;;  %v3172_v33 = vld [vmem:[%s3536_s15 + $0x60] sm:$0xff] (!%p2555_p9)   ;;  %v3174_v35 = vld [vmem:[%s3536_s15 + $0x68] sm:$0xff] (!%p2555_p9)  }
 0x175   : > { %2802 = vmatprep.subr.bf16.mxu0 (!%p2555_p9), %v3166_v27  ;;  %3049 = vmatprep.subr.bf16.mxu1 (!%p2555_p9), %v3166_v27  ;;  %v3171_v32 = vld [vmem:[%s3536_s15 + $0x18] sm:$0xff] (!%p2555_p9)   ;;  %v3173_v34 = vld [vmem:[%s3536_s15 + $0x20] sm:$0xff] (!%p2555_p9)   ;;  %v3175_v38 = vld [vmem:[%s3536_s15 + $0x28] sm:$0xff] (!%p2555_p9)  }
 0x176   : > { %v3182_v36 = vld [vmem:[%s3538_s12 + $0x4] ss:$8 sps:$4 sm:$0xff] (!%p2555_p9)   ;;  %v3176_v39 = vld [vmem:[%s3536_s15 + $0x70] sm:$0xff] (!%p2555_p9)   ;;  %v3178_v41 = vld [vmem:[%s3536_s15 + $0x78] sm:$0xff] (!%p2555_p9)  }
 0x177   : > { %v3185_v37 = vld [vmem:[%s3538_s12 + $0x84] ss:$8 sps:$4 sm:$0xff] (!%p2555_p9)   ;;  %1435 = vmatprep.mubr.bf16.mxu0 (!%p2555_p9), %v3182_v36  ;;  %v3177_v40 = vld [vmem:[%s3536_s15 + $0x30] sm:$0xff] (!%p2555_p9)   ;;  %v3179_v42 = vld [vmem:[%s3536_s15 + $0x38] sm:$0xff] (!%p2555_p9)  }
 0x178   : > { %2803 = vmatpush3.bf16.msra.mxu0 (!%p2555_p9), %v3167_v28  ;;  %3057 = vmatpush3.bf16.msra.mxu1 (!%p2555_p9), %v3167_v28  ;;  %v3180_v43 = vld [vmem:[%s3538_s12] ss:$8 sps:$4 sm:$0xff] (!%p2555_p9)   ;;  %v3186_v45 = vld [vmem:[%s3538_s12 + $0x14] ss:$8 sps:$4 sm:$0xff] (!%p2555_p9)   ;;  %v3190_v47 = vld [vmem:[%s3538_s12 + $0x10] ss:$8 sps:$4 sm:$0xff] (!%p2555_p9)  }
 0x179   : > { %2804 = vmatprep.subr.bf16.mxu0 (!%p2555_p9), %v3168_v29  ;;  %3050 = vmatprep.subr.bf16.mxu1 (!%p2555_p9), %v3168_v29  ;;  %v3183_v44 = vld [vmem:[%s3538_s12 + $0x80] ss:$8 sps:$4 sm:$0xff] (!%p2555_p9)   ;;  %v3188_v46 = vld [vmem:[%s3538_s12 + $0x94] ss:$8 sps:$4 sm:$0xff] (!%p2555_p9)   ;;  %v3191_v48 = vld [vmem:[%s3538_s12 + $0x90] ss:$8 sps:$4 sm:$0xff] (!%p2555_p9)  }
 0x17a   : > { %1499 = vmatprep.mubr.bf16.mxu1 %v3185_v37  ;;  %v3192_v49 = vld [vmem:[%s3538_s12 + $0x24] ss:$8 sps:$4 sm:$0xff]   ;;  %v3196_v51 = vld [vmem:[%s3538_s12 + $0x20] ss:$8 sps:$4 sm:$0xff]   ;;  %v3198_v53 = vld [vmem:[%s3538_s12 + $0x34] ss:$8 sps:$4 sm:$0xff]  }
 0x17b   : > { %v3194_v50 = vld [vmem:[%s3538_s12 + $0xa4] ss:$8 sps:$4 sm:$0xff]   ;;  %v3197_v52 = vld [vmem:[%s3538_s12 + $0xa0] ss:$8 sps:$4 sm:$0xff]   ;;  %v3200_v54 = vld [vmem:[%s3538_s12 + $0xb4] ss:$8 sps:$4 sm:$0xff]  }
 0x17c   : > { %2805 = vmatpush3.bf16.msra.mxu0 %v3169_v30  ;;  %3058 = vmatpush3.bf16.msra.mxu1 %v3169_v30  ;;  %v3202_v55 = vld [vmem:[%s3538_s12 + $0x30] ss:$8 sps:$4 sm:$0xff]   ;;  %v3204_v57 = vld [vmem:[%s3538_s12 + $0x44] ss:$8 sps:$4 sm:$0xff]   ;;  %v3208_v59 = vld [vmem:[%s3538_s12 + $0x40] ss:$8 sps:$4 sm:$0xff]  }
 0x17d   : > { %2806 = vmatprep.subr.bf16.mxu0 %v3170_v31  ;;  %3051 = vmatprep.subr.bf16.mxu1 %v3170_v31  ;;  %v3203_v56 = vld [vmem:[%s3538_s12 + $0xb0] ss:$8 sps:$4 sm:$0xff]   ;;  %v3206_v58 = vld [vmem:[%s3538_s12 + $0xc4] ss:$8 sps:$4 sm:$0xff]   ;;  %v3209_v60 = vld [vmem:[%s3538_s12 + $0xc0] ss:$8 sps:$4 sm:$0xff]  }
 0x17e   : > { %v3210_v61 = vld [vmem:[%s3538_s12 + $0x54] ss:$8 sps:$4 sm:$0xff]   ;;  %v3214_v63 = vld [vmem:[%s3538_s12 + $0x50] ss:$8 sps:$4 sm:$0xff]   ;;  %v3216_v1 = vld [vmem:[%s3538_s12 + $0x64] ss:$8 sps:$4 sm:$0xff]  }
 0x17f   : > { %v3212_v62 = vld [vmem:[%s3538_s12 + $0xd4] ss:$8 sps:$4 sm:$0xff]   ;;  %v3215_v0 = vld [vmem:[%s3538_s12 + $0xd0] ss:$8 sps:$4 sm:$0xff]   ;;  %v3218_v2 = vld [vmem:[%s3538_s12 + $0xe4] ss:$8 sps:$4 sm:$0xff]  }
 0x180   : > { %2807 = vmatpush3.bf16.msra.mxu0 %v3171_v32  ;;  %3059 = vmatpush3.bf16.msra.mxu1 %v3171_v32  ;;  %v3220_v3 = vld [vmem:[%s3538_s12 + $0x60] ss:$8 sps:$4 sm:$0xff]   ;;  %v3222_v5 = vld [vmem:[%s3538_s12 + $0x74] ss:$8 sps:$4 sm:$0xff]   ;;  %v3226_v7 = vld [vmem:[%s3538_s12 + $0x70] ss:$8 sps:$4 sm:$0xff]  }
 0x181   : > { %2808 = vmatprep.subr.bf16.mxu0 %v3172_v33  ;;  %3052 = vmatprep.subr.bf16.mxu1 %v3172_v33  ;;  %v3221_v4 = vld [vmem:[%s3538_s12 + $0xe0] ss:$8 sps:$4 sm:$0xff]   ;;  %v3224_v6 = vld [vmem:[%s3538_s12 + $0xf4] ss:$8 sps:$4 sm:$0xff]   ;;  %v3227_v8 = vld [vmem:[%s3538_s12 + $0xf0] ss:$8 sps:$4 sm:$0xff]  }
 0x182   : > { %v1051_v11 = vld [vmem:[#allocation2] sm:$0xff]  ;;  %v1052_v19 = vld [vmem:[#allocation2 + $0x8] sm:$0xff]  ;;  %v1053_v31 = vld [vmem:[#allocation2 + $0x10] sm:$0xff] }
 0x183   : > { %v1067_v13 = vld [vmem:[#allocation2 + $0x80] sm:$0xff]  ;;  %v1068_v21 = vld [vmem:[#allocation2 + $0x88] sm:$0xff]  ;;  %v1069_v33 = vld [vmem:[#allocation2 + $0x90] sm:$0xff] }
 0x184   : > { %2809 = vmatpush3.bf16.msra.mxu0 %v3173_v34  ;;  %3060 = vmatpush3.bf16.msra.mxu1 %v3173_v34 }
 0x185   : > { %2810 = vmatprep.subr.bf16.mxu0 %v3174_v35  ;;  %3053 = vmatprep.subr.bf16.mxu1 %v3174_v35 }
 0x188   : > { %2811 = vmatpush3.bf16.msra.mxu0 %v3175_v38  ;;  %3061 = vmatpush3.bf16.msra.mxu1 %v3175_v38 }
 0x189   : > { %2812 = vmatprep.subr.bf16.mxu0 %v3176_v39  ;;  %3054 = vmatprep.subr.bf16.mxu1 %v3176_v39  ;;  %v1054_v39 = vld [vmem:[#allocation2 + $0x18] sm:$0xff] }
 0x18c   : > { %2813 = vmatpush3.bf16.msra.mxu0 %v3177_v40  ;;  %3062 = vmatpush3.bf16.msra.mxu1 %v3177_v40 }
 0x18d   : > { %2814 = vmatprep.subr.bf16.mxu0 %v3178_v41  ;;  %3055 = vmatprep.subr.bf16.mxu1 %v3178_v41  ;;  %v1070_v41 = vld [vmem:[#allocation2 + $0x98] sm:$0xff] }
 0x190   : > { %2815 = vmatpush3.bf16.msra.mxu0 %v3179_v42  ;;  %3063 = vmatpush3.bf16.msra.mxu1 %v3179_v42 }
 0x193   : > { %1436 = vmatmul.mubr.bf16.vlgmr.msra.gmra.mrb[0].mxu0 %v3180_v43  ;;  %1500 = vmatmul.mubr.bf16.vlgmr.msra.gmra.mrb[0].mxu1 %v3183_v44 }
 0x194   : > { %1443 = vmatprep.mubr.bf16.mxu0 %v3186_v45  ;;  %1507 = vmatprep.mubr.bf16.mxu1 %v3188_v46 }
 0x19b   : > { %1444 = vmatmul.mubr.bf16.gmra.mrb[4].mxu0 %v3190_v47  ;;  %1508 = vmatmul.mubr.bf16.gmra.mrb[4].mxu1 %v3191_v48 }
 0x19c   : > { %1451 = vmatprep.mubr.bf16.mxu0 %v3192_v49  ;;  %1515 = vmatprep.mubr.bf16.mxu1 %v3194_v50 }
 0x1a3   : > { %1452 = vmatmul.mubr.bf16.gmra.mrb[8].mxu0 %v3196_v51  ;;  %1516 = vmatmul.mubr.bf16.gmra.mrb[8].mxu1 %v3197_v52  ;;  %v1055_v51 = vld [vmem:[#allocation2 + $0x20] sm:$0xff] }
 0x1a4   : > { %1459 = vmatprep.mubr.bf16.mxu0 %v3198_v53  ;;  %1523 = vmatprep.mubr.bf16.mxu1 %v3200_v54  ;;  %v1071_v53 = vld [vmem:[#allocation2 + $0xa0] sm:$0xff] }
 0x1ab   : > { %1460 = vmatmul.mubr.bf16.gmra.mrb[12].mxu0 %v3202_v55  ;;  %1524 = vmatmul.mubr.bf16.gmra.mrb[12].mxu1 %v3203_v56 }
 0x1ac   : > { %1467 = vmatprep.mubr.bf16.mxu0 %v3204_v57  ;;  %1531 = vmatprep.mubr.bf16.mxu1 %v3206_v58 }
 0x1b3   : > { %1468 = vmatmul.mubr.bf16.gmra.mrb[16].mxu0 %v3208_v59  ;;  %1532 = vmatmul.mubr.bf16.gmra.mrb[16].mxu1 %v3209_v60  ;;  %v1056_v59 = vld [vmem:[#allocation2 + $0x28] sm:$0xff] }
 0x1b4   : > { %1475 = vmatprep.mubr.bf16.mxu0 %v3210_v61  ;;  %1539 = vmatprep.mubr.bf16.mxu1 %v3212_v62  ;;  %v1072_v61 = vld [vmem:[#allocation2 + $0xa8] sm:$0xff] }
 0x1bb   : > { %1476 = vmatmul.mubr.bf16.gmra.mrb[20].mxu0 %v3214_v63  ;;  %1540 = vmatmul.mubr.bf16.gmra.mrb[20].mxu1 %v3215_v0 }
 0x1bc   : > { %1483 = vmatprep.mubr.bf16.mxu0 %v3216_v1  ;;  %1547 = vmatprep.mubr.bf16.mxu1 %v3218_v2 }
 0x1c3   : > { %1484 = vmatmul.mubr.bf16.gmra.mrb[24].mxu0 %v3220_v3  ;;  %1548 = vmatmul.mubr.bf16.gmra.mrb[24].mxu1 %v3221_v4 }
 0x1c4   : > { %1491 = vmatprep.mubr.bf16.mxu0 %v3222_v5  ;;  %1555 = vmatprep.mubr.bf16.mxu1 %v3224_v6 }
 0x1cb   : > { %1492 = vmatmul.mubr.bf16.gmra.mrb[28].mxu0 %v3226_v7  ;;  %1556 = vmatmul.mubr.bf16.gmra.mrb[28].mxu1 %v3227_v8  ;;  %v1057_v7 = vld [vmem:[#allocation2 + $0x30] sm:$0xff] }
 0x266   : > { %v2816_v9 = vpop.f32.mrb[0].mxu0  ;;  %v2864_v10 = vpop.f32.mrb[0].mxu1 }
 0x267   : > { %v2817_v12 = vpop.f32.mrb[1].mxu0  ;;  %v2865_v14 = vpop.f32.mrb[1].mxu1 }
 0x268   : > { %v2818_v15 = vadd.f32 %v2817_v12, %v2816_v9  ;;  %v2866_v16 = vadd.f32 %v2865_v14, %v2864_v10  ;;  %v2819_v17 = vpop.f32.mrb[2].mxu0  ;;  %v2867_v18 = vpop.f32.mrb[2].mxu1  ;;  %v1073_v9 = vld [vmem:[#allocation2 + $0xb0] sm:$0xff] }
 0x269   : > { %v2820_v20 = vpop.f32.mrb[3].mxu0  ;;  %v2868_v22 = vpop.f32.mrb[3].mxu1 }
 0x26a   : > { %v1564_v23 = vadd.f32 %v2818_v15, %v1051_v11  ;;  %v1580_v24 = vadd.f32 %v2866_v16, %v1067_v13  ;;  %v2821_v25 = vadd.f32 %v2820_v20, %v2819_v17  ;;  %v2869_v26 = vadd.f32 %v2868_v22, %v2867_v18  ;;  %v1058_v15 = vld [vmem:[#allocation2 + $0x38] sm:$0xff] }
 0x26b   : > { %v1074_v17 = vld [vmem:[#allocation2 + $0xb8] sm:$0xff] }
 0x26c   : > { %1596 = vst [vmem:[#allocation2] sm:$0xff] %v1564_v23  ;;  %1612 = vst [vmem:[#allocation2 + $0x80] sm:$0xff] %v1580_v24  ;;  %v1565_v27 = vadd.f32 %v2821_v25, %v1052_v19  ;;  %v1581_v28 = vadd.f32 %v2869_v26, %v1068_v21 }
 0x26e   : > { %1597 = vst [vmem:[#allocation2 + $0x8] sm:$0xff] %v1565_v27  ;;  %1613 = vst [vmem:[#allocation2 + $0x88] sm:$0xff] %v1581_v28  ;;  %v2822_v29 = vpop.f32.mrb[4].mxu0  ;;  %v2870_v30 = vpop.f32.mrb[4].mxu1  ;;  %v1059_v27 = vld [vmem:[#allocation2 + $0x40] sm:$0xff] }
 0x26f   : > { %v2823_v32 = vpop.f32.mrb[5].mxu0  ;;  %v2871_v34 = vpop.f32.mrb[5].mxu1 }
 0x270   : > { %v2824_v35 = vadd.f32 %v2823_v32, %v2822_v29  ;;  %v2872_v36 = vadd.f32 %v2871_v34, %v2870_v30  ;;  %v2825_v37 = vpop.f32.mrb[6].mxu0  ;;  %v2873_v38 = vpop.f32.mrb[6].mxu1  ;;  %v1075_v29 = vld [vmem:[#allocation2 + $0xc0] sm:$0xff] }
 0x271   : > { %v2826_v40 = vpop.f32.mrb[7].mxu0  ;;  %v2874_v42 = vpop.f32.mrb[7].mxu1 }
 0x272   : > { %v1566_v43 = vadd.f32 %v2824_v35, %v1053_v31  ;;  %v1582_v44 = vadd.f32 %v2872_v36, %v1069_v33  ;;  %v2827_v45 = vadd.f32 %v2826_v40, %v2825_v37  ;;  %v2875_v46 = vadd.f32 %v2874_v42, %v2873_v38  ;;  %v1060_v35 = vld [vmem:[#allocation2 + $0x48] sm:$0xff] }
 0x273   : > { %v1076_v37 = vld [vmem:[#allocation2 + $0xc8] sm:$0xff] }
 0x274   : > { %1598 = vst [vmem:[#allocation2 + $0x10] sm:$0xff] %v1566_v43  ;;  %1614 = vst [vmem:[#allocation2 + $0x90] sm:$0xff] %v1582_v44  ;;  %v1567_v47 = vadd.f32 %v2827_v45, %v1054_v39  ;;  %v1583_v48 = vadd.f32 %v2875_v46, %v1070_v41 }
 0x276   : > { %1599 = vst [vmem:[#allocation2 + $0x18] sm:$0xff] %v1567_v47  ;;  %1615 = vst [vmem:[#allocation2 + $0x98] sm:$0xff] %v1583_v48  ;;  %v2828_v49 = vpop.f32.mrb[8].mxu0  ;;  %v2876_v50 = vpop.f32.mrb[8].mxu1  ;;  %v1061_v47 = vld [vmem:[#allocation2 + $0x50] sm:$0xff] }
 0x277   : > { %v2829_v52 = vpop.f32.mrb[9].mxu0  ;;  %v2877_v54 = vpop.f32.mrb[9].mxu1 }
 0x278   : > { %v2830_v55 = vadd.f32 %v2829_v52, %v2828_v49  ;;  %v2878_v56 = vadd.f32 %v2877_v54, %v2876_v50  ;;  %v2831_v57 = vpop.f32.mrb[10].mxu0  ;;  %v2879_v58 = vpop.f32.mrb[10].mxu1  ;;  %v1077_v49 = vld [vmem:[#allocation2 + $0xd0] sm:$0xff] }
 0x279   : > { %v2832_v60 = vpop.f32.mrb[11].mxu0  ;;  %v2880_v62 = vpop.f32.mrb[11].mxu1 }
 0x27a   : > { %v1568_v63 = vadd.f32 %v2830_v55, %v1055_v51  ;;  %v1584_v0 = vadd.f32 %v2878_v56, %v1071_v53  ;;  %v2833_v1 = vadd.f32 %v2832_v60, %v2831_v57  ;;  %v2881_v2 = vadd.f32 %v2880_v62, %v2879_v58  ;;  %v1062_v55 = vld [vmem:[#allocation2 + $0x58] sm:$0xff] }
 0x27b   : > { %v1078_v57 = vld [vmem:[#allocation2 + $0xd8] sm:$0xff] }
 0x27c   : > { %1600 = vst [vmem:[#allocation2 + $0x20] sm:$0xff] %v1568_v63  ;;  %1616 = vst [vmem:[#allocation2 + $0xa0] sm:$0xff] %v1584_v0  ;;  %v1569_v3 = vadd.f32 %v2833_v1, %v1056_v59  ;;  %v1585_v4 = vadd.f32 %v2881_v2, %v1072_v61 }
 0x27e   : > { %1601 = vst [vmem:[#allocation2 + $0x28] sm:$0xff] %v1569_v3  ;;  %1617 = vst [vmem:[#allocation2 + $0xa8] sm:$0xff] %v1585_v4  ;;  %v2834_v5 = vpop.f32.mrb[12].mxu0  ;;  %v2882_v6 = vpop.f32.mrb[12].mxu1  ;;  %v1063_v3 = vld [vmem:[#allocation2 + $0x60] sm:$0xff] }
 0x27f   : > { %v2835_v8 = vpop.f32.mrb[13].mxu0  ;;  %v2883_v10 = vpop.f32.mrb[13].mxu1 }
 0x280   : > { %v2836_v11 = vadd.f32 %v2835_v8, %v2834_v5  ;;  %v2884_v12 = vadd.f32 %v2883_v10, %v2882_v6  ;;  %v2837_v13 = vpop.f32.mrb[14].mxu0  ;;  %v2885_v14 = vpop.f32.mrb[14].mxu1  ;;  %v1079_v5 = vld [vmem:[#allocation2 + $0xe0] sm:$0xff] }
 0x281   : > { %v2838_v16 = vpop.f32.mrb[15].mxu0  ;;  %v2886_v18 = vpop.f32.mrb[15].mxu1 }
 0x282   : > { %v1570_v19 = vadd.f32 %v2836_v11, %v1057_v7  ;;  %v1586_v20 = vadd.f32 %v2884_v12, %v1073_v9  ;;  %v2839_v21 = vadd.f32 %v2838_v16, %v2837_v13  ;;  %v2887_v22 = vadd.f32 %v2886_v18, %v2885_v14  ;;  %v1064_v11 = vld [vmem:[#allocation2 + $0x68] sm:$0xff] }
 0x283   : > { %v1080_v13 = vld [vmem:[#allocation2 + $0xe8] sm:$0xff] }
 0x284   : > { %1602 = vst [vmem:[#allocation2 + $0x30] sm:$0xff] %v1570_v19  ;;  %1618 = vst [vmem:[#allocation2 + $0xb0] sm:$0xff] %v1586_v20  ;;  %v1571_v23 = vadd.f32 %v2839_v21, %v1058_v15  ;;  %v1587_v24 = vadd.f32 %v2887_v22, %v1074_v17 }
 0x286   : > { %1603 = vst [vmem:[#allocation2 + $0x38] sm:$0xff] %v1571_v23  ;;  %1619 = vst [vmem:[#allocation2 + $0xb8] sm:$0xff] %v1587_v24  ;;  %v2840_v25 = vpop.f32.mrb[16].mxu0  ;;  %v2888_v26 = vpop.f32.mrb[16].mxu1  ;;  %v1065_v23 = vld [vmem:[#allocation2 + $0x70] sm:$0xff] }
 0x287   : > { %v2841_v28 = vpop.f32.mrb[17].mxu0  ;;  %v2889_v30 = vpop.f32.mrb[17].mxu1 }
 0x288   : > { %v2842_v31 = vadd.f32 %v2841_v28, %v2840_v25  ;;  %v2890_v32 = vadd.f32 %v2889_v30, %v2888_v26  ;;  %v2843_v33 = vpop.f32.mrb[18].mxu0  ;;  %v2891_v34 = vpop.f32.mrb[18].mxu1  ;;  %v1081_v25 = vld [vmem:[#allocation2 + $0xf0] sm:$0xff] }
 0x289   : > { %v2844_v36 = vpop.f32.mrb[19].mxu0  ;;  %v2892_v38 = vpop.f32.mrb[19].mxu1 }
 0x28a   : > { %v1572_v39 = vadd.f32 %v2842_v31, %v1059_v27  ;;  %v1588_v40 = vadd.f32 %v2890_v32, %v1075_v29  ;;  %v2845_v41 = vadd.f32 %v2844_v36, %v2843_v33  ;;  %v2893_v42 = vadd.f32 %v2892_v38, %v2891_v34  ;;  %v1066_v31 = vld [vmem:[#allocation2 + $0x78] sm:$0xff] }
 0x28b   : > { %v1082_v33 = vld [vmem:[#allocation2 + $0xf8] sm:$0xff] }
 0x28c   : > { %1604 = vst [vmem:[#allocation2 + $0x40] sm:$0xff] %v1572_v39  ;;  %1620 = vst [vmem:[#allocation2 + $0xc0] sm:$0xff] %v1588_v40  ;;  %v1573_v43 = vadd.f32 %v2845_v41, %v1060_v35  ;;  %v1589_v44 = vadd.f32 %v2893_v42, %v1076_v37 }
 0x28e   : > { %1605 = vst [vmem:[#allocation2 + $0x48] sm:$0xff] %v1573_v43  ;;  %1621 = vst [vmem:[#allocation2 + $0xc8] sm:$0xff] %v1589_v44  ;;  %v2846_v45 = vpop.f32.mrb[20].mxu0  ;;  %v2894_v46 = vpop.f32.mrb[20].mxu1 }
 0x28f   : > { %v2847_v48 = vpop.f32.mrb[21].mxu0  ;;  %v2895_v50 = vpop.f32.mrb[21].mxu1 }
 0x290   : > { %v2848_v51 = vadd.f32 %v2847_v48, %v2846_v45  ;;  %v2896_v52 = vadd.f32 %v2895_v50, %v2894_v46  ;;  %v2849_v53 = vpop.f32.mrb[22].mxu0  ;;  %v2897_v54 = vpop.f32.mrb[22].mxu1 }
 0x291   : > { %v2850_v56 = vpop.f32.mrb[23].mxu0  ;;  %v2898_v58 = vpop.f32.mrb[23].mxu1 }
 0x292   : > { %v1574_v59 = vadd.f32 %v2848_v51, %v1061_v47  ;;  %v1590_v60 = vadd.f32 %v2896_v52, %v1077_v49  ;;  %v2851_v61 = vadd.f32 %v2850_v56, %v2849_v53  ;;  %v2899_v62 = vadd.f32 %v2898_v58, %v2897_v54 }
 0x294   : > { %1606 = vst [vmem:[#allocation2 + $0x50] sm:$0xff] %v1574_v59  ;;  %1622 = vst [vmem:[#allocation2 + $0xd0] sm:$0xff] %v1590_v60  ;;  %v1575_v63 = vadd.f32 %v2851_v61, %v1062_v55  ;;  %v1591_v0 = vadd.f32 %v2899_v62, %v1078_v57 }
 0x296   : > { %1607 = vst [vmem:[#allocation2 + $0x58] sm:$0xff] %v1575_v63  ;;  %1623 = vst [vmem:[#allocation2 + $0xd8] sm:$0xff] %v1591_v0  ;;  %v2852_v1 = vpop.f32.mrb[24].mxu0  ;;  %v2900_v2 = vpop.f32.mrb[24].mxu1 }
 0x297   : > { %v2853_v4 = vpop.f32.mrb[25].mxu0  ;;  %v2901_v6 = vpop.f32.mrb[25].mxu1 }
 0x298   : > { %v2854_v7 = vadd.f32 %v2853_v4, %v2852_v1  ;;  %v2902_v8 = vadd.f32 %v2901_v6, %v2900_v2  ;;  %v2855_v9 = vpop.f32.mrb[26].mxu0  ;;  %v2903_v10 = vpop.f32.mrb[26].mxu1 }
 0x299   : > { %v2856_v12 = vpop.f32.mrb[27].mxu0  ;;  %v2904_v14 = vpop.f32.mrb[27].mxu1 }
 0x29a   : > { %v1576_v15 = vadd.f32 %v2854_v7, %v1063_v3  ;;  %v1592_v16 = vadd.f32 %v2902_v8, %v1079_v5  ;;  %v2857_v17 = vadd.f32 %v2856_v12, %v2855_v9  ;;  %v2905_v18 = vadd.f32 %v2904_v14, %v2903_v10 }
 0x29c   : > { %1608 = vst [vmem:[#allocation2 + $0x60] sm:$0xff] %v1576_v15  ;;  %1624 = vst [vmem:[#allocation2 + $0xe0] sm:$0xff] %v1592_v16  ;;  %v1577_v19 = vadd.f32 %v2857_v17, %v1064_v11  ;;  %v1593_v20 = vadd.f32 %v2905_v18, %v1080_v13 }
 0x29e   : > { %1609 = vst [vmem:[#allocation2 + $0x68] sm:$0xff] %v1577_v19  ;;  %1625 = vst [vmem:[#allocation2 + $0xe8] sm:$0xff] %v1593_v20  ;;  %v2858_v21 = vpop.f32.mrb[28].mxu0  ;;  %v2906_v22 = vpop.f32.mrb[28].mxu1 }
 0x29f   : > { %v2859_v24 = vpop.f32.mrb[29].mxu0  ;;  %v2907_v26 = vpop.f32.mrb[29].mxu1 }
 0x2a0   : > { %v2860_v27 = vadd.f32 %v2859_v24, %v2858_v21  ;;  %v2908_v28 = vadd.f32 %v2907_v26, %v2906_v22  ;;  %v2861_v29 = vpop.f32.mrb[30].mxu0  ;;  %v2909_v30 = vpop.f32.mrb[30].mxu1 }
 0x2a1   : > { %v2862_v32 = vpop.f32.mrb[31].mxu0  ;;  %v2910_v34 = vpop.f32.mrb[31].mxu1 }
 0x2a2   : > { %v1578_v35 = vadd.f32 %v2860_v27, %v1065_v23  ;;  %v1594_v36 = vadd.f32 %v2908_v28, %v1081_v25  ;;  %v2863_v37 = vadd.f32 %v2862_v32, %v2861_v29  ;;  %v2911_v38 = vadd.f32 %v2910_v34, %v2909_v30 }
 0x2a4   : > { %1610 = vst [vmem:[#allocation2 + $0x70] sm:$0xff] %v1578_v35  ;;  %1626 = vst [vmem:[#allocation2 + $0xf0] sm:$0xff] %v1594_v36  ;;  %v1579_v39 = vadd.f32 %v2863_v37, %v1066_v31  ;;  %v1595_v40 = vadd.f32 %v2911_v38, %v1082_v33 }
 0x2a6   : > { %1611 = vst [vmem:[#allocation2 + $0x78] sm:$0xff] %v1579_v39  ;;  %1627 = vst [vmem:[#allocation2 + $0xf8] sm:$0xff] %v1595_v40 }
 0x2a7 PF: > { %p2604_p10 = scmp.ne.s32.totalorder %s3302_s19, 1 }
 0x2a8   : > { %v1680_v41 = vld [vmem:[%s3526_s1 + $0x80] sm:$0xff] (!%p2604_p10)  ;;  %v3323_v43 = vmov (!%p2604_p10), 0   ;;  %v1681_v44 = vld [vmem:[%s3526_s1 + $0x88] sm:$0xff] (!%p2604_p10)  ;;  %v1667_v46 = vld [vmem:[%s3526_s1 + $0x18] sm:$0xff] (!%p2604_p10) }
 0x2a9   : > { %1631 = sbr.rel (%p2604_p10) target bundleno = 1098 (0x44a), region = 98  ;;  %v1664_v42 = vld [vmem:[%s3526_s1] sm:$0xff] (!%p2604_p10)  ;;  %3229 = vset.pattern.permute.xlu1 (!%p2604_p10), %v3323_v43  ;;  %3228 = vset.pattern.permute.xlu0 (!%p2604_p10), %v3323_v43  ;;  %v1665_v45 = vld [vmem:[%s3526_s1 + $0x8] sm:$0xff] (!%p2604_p10)  ;;  %v1666_v47 = vld [vmem:[%s3526_s1 + $0x10] sm:$0xff] (!%p2604_p10) }
 0x2aa   : > { %1778 = vperm.xlu1 (!%p2604_p10), %3229, %v1680_v41   ;;  %1698 = vperm.xlu0 (!%p2604_p10), %3228, %v1664_v42   ;;  %v1683_v48 = vld [vmem:[%s3526_s1 + $0x98] sm:$0xff] (!%p2604_p10)  ;;  %v1682_v49 = vld [vmem:[%s3526_s1 + $0x90] sm:$0xff] (!%p2604_p10)  ;;  %v3230_v50 = vld [vmem:[%s3767_s6] sm:$0xff] (!%p2604_p10)  }
 0x2ab   : > { %v3231_v51 = vld [vmem:[%s3767_s6 + $0x8] sm:$0xff] (!%p2604_p10)   ;;  %2984 = vmatprep.subr.bf16.mxu0 (!%p2604_p10), %v3230_v50  ;;  %3064 = vmatprep.subr.bf16.mxu1 (!%p2604_p10), %v3230_v50  ;;  %v1668_v53 = vld [vmem:[%s3526_s1 + $0x20] sm:$0xff] (!%p2604_p10)  ;;  %v3232_v54 = vld [vmem:[%s3767_s6 + $0x10] sm:$0xff] (!%p2604_p10)  }
 0x2ac   : > { %v1669_v52 = vld [vmem:[%s3526_s1 + $0x28] sm:$0xff] (!%p2604_p10)  ;;  %2985 = vmatpush3.bf16.msra.mxu0 (!%p2604_p10), %v3230_v50  ;;  %3072 = vmatpush3.bf16.msra.mxu1 (!%p2604_p10), %v3230_v50  ;;  %v1684_v56 = vld [vmem:[%s3526_s1 + $0xa0] sm:$0xff] (!%p2604_p10)  ;;  %v3233_v57 = vld [vmem:[%s3767_s6 + $0x18] sm:$0xff] (!%p2604_p10)  }
 0x2ad   : > { %2986 = vmatprep.subr.bf16.mxu0 (!%p2604_p10), %v3231_v51  ;;  %3065 = vmatprep.subr.bf16.mxu1 (!%p2604_p10), %v3231_v51  ;;  %v1685_v55 = vld [vmem:[%s3526_s1 + $0xa8] sm:$0xff] (!%p2604_p10)  ;;  %v1671_v58 = vld [vmem:[%s3526_s1 + $0x38] sm:$0xff] (!%p2604_p10)  ;;  %v1670_v59 = vld [vmem:[%s3526_s1 + $0x30] sm:$0xff] (!%p2604_p10) }
 0x2ae   : > { %1783 = vperm.xlu1 (!%p2604_p10), %3229, %v1681_v44   ;;  %1703 = vperm.xlu0 (!%p2604_p10), %3228, %v1665_v45   ;;  %v3234_v60 = vld [vmem:[%s3767_s6 + $0x20] sm:$0xff] (!%p2604_p10)   ;;  %v1687_v61 = vld [vmem:[%s3526_s1 + $0xb8] sm:$0xff] (!%p2604_p10)  ;;  %v1686_v62 = vld [vmem:[%s3526_s1 + $0xb0] sm:$0xff] (!%p2604_p10) }
 0x2af   : > { %v3235_v63 = vld [vmem:[%s3767_s6 + $0x28] sm:$0xff] (!%p2604_p10)   ;;  %v1672_v1 = vld [vmem:[%s3526_s1 + $0x40] sm:$0xff] (!%p2604_p10)  ;;  %v3236_v2 = vld [vmem:[%s3767_s6 + $0x30] sm:$0xff] (!%p2604_p10)  }
 0x2b0   : > { %2987 = vmatpush3.bf16.msra.mxu0 %v3231_v51  ;;  %3073 = vmatpush3.bf16.msra.mxu1 %v3231_v51  ;;  %v1673_v0 = vld [vmem:[%s3526_s1 + $0x48] sm:$0xff]  ;;  %v1688_v4 = vld [vmem:[%s3526_s1 + $0xc0] sm:$0xff]  ;;  %v3237_v5 = vld [vmem:[%s3767_s6 + $0x38] sm:$0xff]  }
 0x2b1   : > { %2988 = vmatprep.subr.bf16.mxu0 %v3232_v54  ;;  %3066 = vmatprep.subr.bf16.mxu1 %v3232_v54  ;;  %v1689_v3 = vld [vmem:[%s3526_s1 + $0xc8] sm:$0xff]  ;;  %v1675_v6 = vld [vmem:[%s3526_s1 + $0x58] sm:$0xff]  ;;  %v1674_v7 = vld [vmem:[%s3526_s1 + $0x50] sm:$0xff] }
 0x2b2   : > { %1713 = vperm.xlu1 %3229, %v1667_v46   ;;  %1708 = vperm.xlu0 %3228, %v1666_v47   ;;  %v1691_v8 = vld [vmem:[%s3526_s1 + $0xd8] sm:$0xff]  ;;  %v1690_v9 = vld [vmem:[%s3526_s1 + $0xd0] sm:$0xff]  ;;  %v1677_v10 = vld [vmem:[%s3526_s1 + $0x68] sm:$0xff] }
 0x2b3   : > { %v1676_v11 = vld [vmem:[%s3526_s1 + $0x60] sm:$0xff]  ;;  %v1693_v12 = vld [vmem:[%s3526_s1 + $0xe8] sm:$0xff]  ;;  %v1679_v14 = vld [vmem:[%s3526_s1 + $0x78] sm:$0xff] }
 0x2b4   : > { %2989 = vmatpush3.bf16.msra.mxu0 %v3232_v54  ;;  %3074 = vmatpush3.bf16.msra.mxu1 %v3232_v54  ;;  %v1692_v13 = vld [vmem:[%s3526_s1 + $0xe0] sm:$0xff]  ;;  %v1678_v15 = vld [vmem:[%s3526_s1 + $0x70] sm:$0xff]  ;;  %v1695_v16 = vld [vmem:[%s3526_s1 + $0xf8] sm:$0xff] }
 0x2b5   : > { %2990 = vmatprep.subr.bf16.mxu0 %v3233_v57  ;;  %3067 = vmatprep.subr.bf16.mxu1 %v3233_v57  ;;  %v1694_v17 = vld [vmem:[%s3526_s1 + $0xf0] sm:$0xff]  ;;  %v1648_v20 = vld [vmem:[#allocation2 + $0x80] sm:$0xff]  ;;  %v1649_v22 = vld [vmem:[#allocation2 + $0x88] sm:$0xff] }
 0x2b6   : > { %1793 = vperm.xlu1 %3229, %v1683_v48   ;;  %1788 = vperm.xlu0 %3228, %v1682_v49   ;;  %v1632_v21 = vld [vmem:[#allocation2] sm:$0xff]  ;;  %v1633_v23 = vld [vmem:[#allocation2 + $0x8] sm:$0xff]  ;;  %v1635_v30 = vld [vmem:[#allocation2 + $0x18] sm:$0xff] }
 0x2b7   : > { %v1634_v31 = vld [vmem:[#allocation2 + $0x10] sm:$0xff]  ;;  %v1651_v38 = vld [vmem:[#allocation2 + $0x98] sm:$0xff]  ;;  %v1637_v45 = vld [vmem:[#allocation2 + $0x28] sm:$0xff] }
 0x2b8   : > { %2991 = vmatpush3.bf16.msra.mxu0 %v3233_v57  ;;  %3075 = vmatpush3.bf16.msra.mxu1 %v3233_v57  ;;  %v1650_v39 = vld [vmem:[#allocation2 + $0x90] sm:$0xff]  ;;  %v1636_v46 = vld [vmem:[#allocation2 + $0x20] sm:$0xff] }
 0x2b9   : > { %2992 = vmatprep.subr.bf16.mxu0 %v3234_v60  ;;  %3068 = vmatprep.subr.bf16.mxu1 %v3234_v60 }
 0x2ba   : > { %1723 = vperm.xlu1 %3229, %v1669_v52   ;;  %1718 = vperm.xlu0 %3228, %v1668_v53   ;;  %v1653_v52 = vld [vmem:[#allocation2 + $0xa8] sm:$0xff]  ;;  %v1652_v53 = vld [vmem:[#allocation2 + $0xa0] sm:$0xff] }
 0x2bc   : > { %2993 = vmatpush3.bf16.msra.mxu0 %v3234_v60  ;;  %3076 = vmatpush3.bf16.msra.mxu1 %v3234_v60  ;;  %v1638_v60 = vld [vmem:[#allocation2 + $0x30] sm:$0xff] }
 0x2bd   : > { %2994 = vmatprep.subr.bf16.mxu0 %v3235_v63  ;;  %3069 = vmatprep.subr.bf16.mxu1 %v3235_v63 }
 0x2be   : > { %1803 = vperm.xlu1 %3229, %v1685_v55   ;;  %1798 = vperm.xlu0 %3228, %v1684_v56  }
 0x2c0   : > { %2995 = vmatpush3.bf16.msra.mxu0 %v3235_v63  ;;  %3077 = vmatpush3.bf16.msra.mxu1 %v3235_v63 }
 0x2c1   : > { %2996 = vmatprep.subr.bf16.mxu0 %v3236_v2  ;;  %3070 = vmatprep.subr.bf16.mxu1 %v3236_v2 }
 0x2c2   : > { %1733 = vperm.xlu1 %3229, %v1671_v58   ;;  %1728 = vperm.xlu0 %3228, %v1670_v59   ;;  %v1639_v59 = vld [vmem:[#allocation2 + $0x38] sm:$0xff] }
 0x2c4   : > { %2997 = vmatpush3.bf16.msra.mxu0 %v3236_v2  ;;  %3078 = vmatpush3.bf16.msra.mxu1 %v3236_v2  ;;  %v1655_v2 = vld [vmem:[#allocation2 + $0xb8] sm:$0xff] }
 0x2c5   : > { %2998 = vmatprep.subr.bf16.mxu0 %v3237_v5  ;;  %3071 = vmatprep.subr.bf16.mxu1 %v3237_v5 }
 0x2c6   : > { %1813 = vperm.xlu1 %3229, %v1687_v61   ;;  %1808 = vperm.xlu0 %3228, %v1686_v62  }
 0x2c8   : > { %2999 = vmatpush3.bf16.msra.mxu0 %v3237_v5  ;;  %3079 = vmatpush3.bf16.msra.mxu1 %v3237_v5 }
 0x2ca   : > { %1743 = vperm.xlu1 %3229, %v1673_v0   ;;  %1738 = vperm.xlu0 %3228, %v1672_v1  }
 0x2ce   : > { %1823 = vperm.xlu1 %3229, %v1689_v3   ;;  %1818 = vperm.xlu0 %3228, %v1688_v4   ;;  %v1654_v3 = vld [vmem:[#allocation2 + $0xb0] sm:$0xff] }
 0x2d2   : > { %1753 = vperm.xlu1 %3229, %v1675_v6   ;;  %1748 = vperm.xlu0 %3228, %v1674_v7  }
 0x2d6   : > { %1833 = vperm.xlu1 %3229, %v1691_v8   ;;  %1828 = vperm.xlu0 %3228, %v1690_v9   ;;  %v1641_v9 = vld [vmem:[#allocation2 + $0x48] sm:$0xff] }
 0x2da   : > { %1763 = vperm.xlu1 %3229, %v1677_v10   ;;  %1758 = vperm.xlu0 %3228, %v1676_v11   ;;  %v1640_v10 = vld [vmem:[#allocation2 + $0x40] sm:$0xff] }
 0x2de   : > { %1843 = vperm.xlu1 %3229, %v1693_v12   ;;  %1838 = vperm.xlu0 %3228, %v1692_v13  }
 0x2e2   : > { %1773 = vperm.xlu1 %3229, %v1679_v14   ;;  %1768 = vperm.xlu0 %3228, %v1678_v15  }
 0x2e6   : > { %1853 = vperm.xlu1 %3229, %v1695_v16   ;;  %1848 = vperm.xlu0 %3228, %v1694_v17   ;;  %v1657_v16 = vld [vmem:[#allocation2 + $0xc8] sm:$0xff]  ;;  %v1656_v17 = vld [vmem:[#allocation2 + $0xc0] sm:$0xff] }
 0x329   : > { %v1779_v18 = vpop.permute.xlu1 %1778  ;;  %v1699_v19 = vpop.permute.xlu0 %1698 }
 0x32a   : > { %v1872_v26 = vmul.f32 %v1779_v18, %v1648_v20  ;;  %v1856_v27 = vmul.f32 %v1699_v19, %v1632_v21 }
 0x32d   : > { %v1784_v24 = vpop.permute.xlu1 %1783  ;;  %v1704_v25 = vpop.permute.xlu0 %1703 }
 0x32e   : > { %v1873_v28 = vmul.f32 %v1784_v24, %v1649_v22  ;;  %v1857_v29 = vmul.f32 %v1704_v25, %v1633_v23  ;;  %v1643_v23 = vld [vmem:[#allocation2 + $0x58] sm:$0xff]  ;;  %v1642_v24 = vld [vmem:[#allocation2 + $0x50] sm:$0xff] }
 0x330   : > { %v1888_v32 = vpack.c.bf16 %v1857_v29, %v1856_v27  ;;  %v1896_v33 = vpack.c.bf16 %v1873_v28, %v1872_v26 }
 0x331   : > { %v1714_v34 = vpop.permute.xlu1 %1713  ;;  %v1709_v35 = vpop.permute.xlu0 %1708 }
 0x332   : > { %v1859_v36 = vmul.f32 %v1714_v34, %v1635_v30  ;;  %v1858_v37 = vmul.f32 %v1709_v35, %v1634_v31  ;;  %3000 = vmatprep.mubr.bf16.mxu0 %v1888_v32  ;;  %3016 = vmatprep.mubr.bf16.mxu1 %v1896_v33  ;;  %v1659_v30 = vld [vmem:[#allocation2 + $0xd8] sm:$0xff]  ;;  %v1658_v31 = vld [vmem:[#allocation2 + $0xd0] sm:$0xff] }
 0x334   : > { %v1889_v40 = vpack.c.bf16 %v1859_v36, %v1858_v37  ;;  %v1645_v37 = vld [vmem:[#allocation2 + $0x68] sm:$0xff] }
 0x335   : > { %v1794_v41 = vpop.permute.xlu1 %1793  ;;  %v1789_v42 = vpop.permute.xlu0 %1788 }
 0x336   : > { %v1875_v43 = vmul.f32 %v1794_v41, %v1651_v38  ;;  %v1874_v44 = vmul.f32 %v1789_v42, %v1650_v39  ;;  %3001 = vmatmul.mubr.bf16.vlgmr.msra.gmra.mrb[0].mxu0 %v1889_v40  ;;  %v1644_v38 = vld [vmem:[#allocation2 + $0x60] sm:$0xff] }
 0x338   : > { %v1897_v47 = vpack.c.bf16 %v1875_v43, %v1874_v44  ;;  %v1661_v44 = vld [vmem:[#allocation2 + $0xe8] sm:$0xff] }
 0x339   : > { %v1724_v48 = vpop.permute.xlu1 %1723  ;;  %v1719_v49 = vpop.permute.xlu0 %1718 }
 0x33a   : > { %v1861_v50 = vmul.f32 %v1724_v48, %v1637_v45  ;;  %v1860_v51 = vmul.f32 %v1719_v49, %v1636_v46  ;;  %3017 = vmatmul.mubr.bf16.vlgmr.msra.gmra.mrb[0].mxu1 %v1897_v47  ;;  %v1660_v45 = vld [vmem:[#allocation2 + $0xe0] sm:$0xff] }
 0x33c   : > { %v1890_v54 = vpack.c.bf16 %v1861_v50, %v1860_v51  ;;  %v1647_v51 = vld [vmem:[#allocation2 + $0x78] sm:$0xff] }
 0x33d   : > { %v1804_v55 = vpop.permute.xlu1 %1803  ;;  %v1799_v56 = vpop.permute.xlu0 %1798 }
 0x33e   : > { %v1877_v57 = vmul.f32 %v1804_v55, %v1653_v52  ;;  %v1876_v58 = vmul.f32 %v1799_v56, %v1652_v53  ;;  %3004 = vmatprep.mubr.bf16.mxu0 %v1890_v54  ;;  %v1646_v52 = vld [vmem:[#allocation2 + $0x70] sm:$0xff] }
 0x340   : > { %v1898_v61 = vpack.c.bf16 %v1877_v57, %v1876_v58  ;;  %v1663_v58 = vld [vmem:[#allocation2 + $0xf8] sm:$0xff] }
 0x341   : > { %v1734_v62 = vpop.permute.xlu1 %1733  ;;  %v1729_v63 = vpop.permute.xlu0 %1728 }
 0x342   : > { %v1863_v0 = vmul.f32 %v1734_v62, %v1639_v59  ;;  %v1862_v1 = vmul.f32 %v1729_v63, %v1638_v60  ;;  %3020 = vmatprep.mubr.bf16.mxu1 %v1898_v61  ;;  %v1662_v59 = vld [vmem:[#allocation2 + $0xf0] sm:$0xff] }
 0x344   : > { %v1891_v4 = vpack.c.bf16 %v1863_v0, %v1862_v1 }
 0x345   : > { %v1814_v5 = vpop.permute.xlu1 %1813  ;;  %v1809_v6 = vpop.permute.xlu0 %1808 }
 0x346   : > { %v1879_v7 = vmul.f32 %v1814_v5, %v1655_v2  ;;  %v1878_v8 = vmul.f32 %v1809_v6, %v1654_v3  ;;  %3005 = vmatmul.mubr.bf16.gmra.mrb[4].mxu0 %v1891_v4  ;;  %v1922_v2 = vld [vmem:[#allocation3 + $0x10] sm:$0xff]  ;;  %v1920_v3 = vld [vmem:[#allocation3] sm:$0xff]  ;;  %v1923_v6 = vld [vmem:[#allocation3 + $0x18] sm:$0xff] }
 0x347   : > { %v3691_v5 = vld [vmem:[%s3769_s8] ss:$0 sm:$0xff] }
 0x348   : > { %v1899_v11 = vpack.c.bf16 %v1879_v7, %v1878_v8 }
 0x349   : > { %v1744_v12 = vpop.permute.xlu1 %1743  ;;  %v1739_v13 = vpop.permute.xlu0 %1738 }
 0x34a   : > { %v1865_v14 = vmul.f32 %v1744_v12, %v1641_v9  ;;  %v1864_v15 = vmul.f32 %v1739_v13, %v1640_v10  ;;  %3021 = vmatmul.mubr.bf16.gmra.mrb[4].mxu1 %v1899_v11  ;;  %v1921_v9 = vld [vmem:[#allocation3 + $0x8] sm:$0xff]  ;;  %v1938_v12 = vld [vmem:[#allocation3 + $0x90] sm:$0xff] }
 0x34c   : > { %v1892_v18 = vpack.c.bf16 %v1865_v14, %v1864_v15 }
 0x34d   : > { %v1824_v19 = vpop.permute.xlu1 %1823  ;;  %v1819_v20 = vpop.permute.xlu0 %1818 }
 0x34e   : > { %v1881_v21 = vmul.f32 %v1824_v19, %v1657_v16  ;;  %v1880_v22 = vmul.f32 %v1819_v20, %v1656_v17  ;;  %3008 = vmatprep.mubr.bf16.mxu0 %v1892_v18  ;;  %v1936_v16 = vld [vmem:[#allocation3 + $0x80] sm:$0xff]  ;;  %v1939_v20 = vld [vmem:[#allocation3 + $0x98] sm:$0xff] }
 0x350   : > { %v1900_v25 = vpack.c.bf16 %v1881_v21, %v1880_v22 }
 0x351   : > { %v1754_v26 = vpop.permute.xlu1 %1753  ;;  %v1749_v27 = vpop.permute.xlu0 %1748 }
 0x352   : > { %v1867_v28 = vmul.f32 %v1754_v26, %v1643_v23  ;;  %v1866_v29 = vmul.f32 %v1749_v27, %v1642_v24  ;;  %3024 = vmatprep.mubr.bf16.mxu1 %v1900_v25  ;;  %v1937_v24 = vld [vmem:[#allocation3 + $0x88] sm:$0xff] }
 0x354   : > { %v1893_v32 = vpack.c.bf16 %v1867_v28, %v1866_v29 }
 0x355   : > { %v1834_v33 = vpop.permute.xlu1 %1833  ;;  %v1829_v34 = vpop.permute.xlu0 %1828 }
 0x356   : > { %v1883_v35 = vmul.f32 %v1834_v33, %v1659_v30  ;;  %v1882_v36 = vmul.f32 %v1829_v34, %v1658_v31  ;;  %3009 = vmatmul.mubr.bf16.gmra.mrb[8].mxu0 %v1893_v32 }
 0x358   : > { %v1901_v39 = vpack.c.bf16 %v1883_v35, %v1882_v36 }
 0x359   : > { %v1764_v40 = vpop.permute.xlu1 %1763  ;;  %v1759_v41 = vpop.permute.xlu0 %1758 }
 0x35a   : > { %v1869_v42 = vmul.f32 %v1764_v40, %v1645_v37  ;;  %v1868_v43 = vmul.f32 %v1759_v41, %v1644_v38  ;;  %3025 = vmatmul.mubr.bf16.gmra.mrb[8].mxu1 %v1901_v39 }
 0x35c   : > { %v1894_v46 = vpack.c.bf16 %v1869_v42, %v1868_v43 }
 0x35d   : > { %v1844_v47 = vpop.permute.xlu1 %1843  ;;  %v1839_v48 = vpop.permute.xlu0 %1838 }
 0x35e   : > { %v1885_v49 = vmul.f32 %v1844_v47, %v1661_v44  ;;  %v1884_v50 = vmul.f32 %v1839_v48, %v1660_v45  ;;  %3012 = vmatprep.mubr.bf16.mxu0 %v1894_v46  ;;  %v1926_v47 = vld [vmem:[#allocation3 + $0x30] sm:$0xff]  ;;  %v1924_v48 = vld [vmem:[#allocation3 + $0x20] sm:$0xff] }
 0x360   : > { %v1902_v53 = vpack.c.bf16 %v1885_v49, %v1884_v50  ;;  %v1927_v50 = vld [vmem:[#allocation3 + $0x38] sm:$0xff] }
 0x361   : > { %v1774_v54 = vpop.permute.xlu1 %1773  ;;  %v1769_v55 = vpop.permute.xlu0 %1768 }
 0x362   : > { %v1871_v56 = vmul.f32 %v1774_v54, %v1647_v51  ;;  %v1870_v57 = vmul.f32 %v1769_v55, %v1646_v52  ;;  %3028 = vmatprep.mubr.bf16.mxu1 %v1902_v53  ;;  %v1925_v53 = vld [vmem:[#allocation3 + $0x28] sm:$0xff] }
 0x364   : > { %v1895_v60 = vpack.c.bf16 %v1871_v56, %v1870_v57  ;;  %v1942_v56 = vld [vmem:[#allocation3 + $0xb0] sm:$0xff] }
 0x365   : > { %v1854_v61 = vpop.permute.xlu1 %1853  ;;  %v1849_v62 = vpop.permute.xlu0 %1848 }
 0x366   : > { %v1887_v63 = vmul.f32 %v1854_v61, %v1663_v58  ;;  %v1886_v0 = vmul.f32 %v1849_v62, %v1662_v59  ;;  %3013 = vmatmul.mubr.bf16.gmra.mrb[12].mxu0 %v1895_v60  ;;  %v1940_v60 = vld [vmem:[#allocation3 + $0xa0] sm:$0xff] }
 0x368   : > { %v1903_v1 = vpack.c.bf16 %v1887_v63, %v1886_v0  ;;  %v1943_v0 = vld [vmem:[#allocation3 + $0xb8] sm:$0xff] }
 0x36a   : > { %3029 = vmatmul.mubr.bf16.gmra.mrb[12].mxu1 %v1903_v1 }
 0x409   : > { %v3002_v4 = vpop.f32.mrb[0].mxu0 }
 0x40a   : > { %v2043_v7 = vadd.f32 %v3002_v4, %v1922_v2  ;;  %v2034_v8 = vpop.f32.mrb[1].mxu0  ;;  %v1941_v4 = vld [vmem:[#allocation3 + $0xa8] sm:$0xff] }
 0x40b   : > { %v2035_v10 = vadd.f32 %v2034_v8, %v1920_v3  ;;  %v3003_v11 = vpop.f32.mrb[2].mxu0 }
 0x40c   : > { %v2170_v13 = vadd.f32 %v3691_v5, %v2043_v7  ;;  %v2046_v14 = vadd.f32 %v3003_v11, %v1923_v6  ;;  %v2037_v15 = vpop.f32.mrb[3].mxu0 }
 0x40d   : > { %v2168_v17 = vadd.f32 %v3691_v5, %v2035_v10  ;;  %v2038_v18 = vadd.f32 %v2037_v15, %v1921_v9  ;;  %v3018_v19 = vpop.f32.mrb[0].mxu1 }
 0x40e   : > { %v2171_v21 = vadd.f32 %v3691_v5, %v2046_v14  ;;  %v2107_v22 = vadd.f32 %v3018_v19, %v1938_v12  ;;  %v2098_v23 = vpop.f32.mrb[1].mxu1  ;;  %v2202_v28 = vmax.f32 %v2170_v13, 0.0 }
 0x40f   : > { %v2169_v25 = vadd.f32 %v3691_v5, %v2038_v18  ;;  %v2099_v26 = vadd.f32 %v2098_v23, %v1936_v16  ;;  %v3019_v27 = vpop.f32.mrb[2].mxu1  ;;  %v2200_v33 = vmax.f32 %v2168_v17, 0.0 }
 0x410   : > { %v2203_v29 = vmax.f32 %v2171_v21, 0.0  ;;  %v2186_v30 = vadd.f32 %v3691_v5, %v2107_v22  ;;  %v2110_v31 = vadd.f32 %v3019_v27, %v1939_v20  ;;  %v2101_v32 = vpop.f32.mrb[3].mxu1 }
 0x411   : > { %v2201_v34 = vmax.f32 %v2169_v25, 0.0  ;;  %v2184_v35 = vadd.f32 %v3691_v5, %v2099_v26  ;;  %v2102_v36 = vadd.f32 %v2101_v32, %v1937_v24 }
 0x412   : > { %v2689_v37 = vpack.c.bf16 %v2203_v29, %v2202_v28  ;;  %v2187_v38 = vadd.f32 %v3691_v5, %v2110_v31  ;;  %v2218_v41 = vmax.f32 %v2186_v30, 0.0  ;;  %v1930_v28 = vld [vmem:[#allocation3 + $0x50] sm:$0xff]  ;;  %v1928_v29 = vld [vmem:[#allocation3 + $0x40] sm:$0xff]  ;;  %v1931_v31 = vld [vmem:[#allocation3 + $0x58] sm:$0xff] }
 0x413   : > { %v2684_v39 = vpack.c.bf16 %v2201_v34, %v2200_v33  ;;  %v2185_v40 = vadd.f32 %v3691_v5, %v2102_v36  ;;  %v2216_v43 = vmax.f32 %v2184_v35, 0.0  ;;  %v1929_v34 = vld [vmem:[#allocation3 + $0x48] sm:$0xff] }
 0x414   : > { %2761 = vst [vmem:[%s3531_s0 + $0x8] sm:$0xff] %v2689_v37   ;;  %v2219_v42 = vmax.f32 %v2187_v38, 0.0  ;;  %v1946_v37 = vld [vmem:[#allocation3 + $0xd0] sm:$0xff] }
 0x415   : > { %2685 = vst [vmem:[%s3531_s0] sm:$0xff] %v2684_v39   ;;  %v2217_v44 = vmax.f32 %v2185_v40, 0.0 }
 0x416   : > { %v2729_v45 = vpack.c.bf16 %v2219_v42, %v2218_v41  ;;  %v1944_v41 = vld [vmem:[#allocation3 + $0xc0] sm:$0xff] }
 0x417   : > { %v2724_v46 = vpack.c.bf16 %v2217_v44, %v2216_v43 }
 0x418   : > { %2769 = vst [vmem:[%s3531_s0 + $0x48] sm:$0xff] %v2729_v45   ;;  %v1947_v45 = vld [vmem:[#allocation3 + $0xd8] sm:$0xff] }
 0x419   : > { %2768 = vst [vmem:[%s3531_s0 + $0x40] sm:$0xff] %v2724_v46   ;;  %v3006_v49 = vpop.f32.mrb[4].mxu0 }
 0x41a   : > { %v2059_v51 = vadd.f32 %v3006_v49, %v1926_v47  ;;  %v2050_v52 = vpop.f32.mrb[5].mxu0  ;;  %v1945_v49 = vld [vmem:[#allocation3 + $0xc8] sm:$0xff] }
 0x41b   : > { %v2051_v54 = vadd.f32 %v2050_v52, %v1924_v48  ;;  %v3007_v55 = vpop.f32.mrb[6].mxu0 }
 0x41c   : > { %v2174_v57 = vadd.f32 %v3691_v5, %v2059_v51  ;;  %v2062_v58 = vadd.f32 %v3007_v55, %v1927_v50  ;;  %v2053_v59 = vpop.f32.mrb[7].mxu0 }
 0x41d   : > { %v2172_v61 = vadd.f32 %v3691_v5, %v2051_v54  ;;  %v2054_v62 = vadd.f32 %v2053_v59, %v1925_v53  ;;  %v3022_v63 = vpop.f32.mrb[4].mxu1 }
 0x41e   : > { %v2175_v1 = vadd.f32 %v3691_v5, %v2062_v58  ;;  %v2123_v2 = vadd.f32 %v3022_v63, %v1942_v56  ;;  %v2114_v3 = vpop.f32.mrb[5].mxu1  ;;  %v2206_v9 = vmax.f32 %v2174_v57, 0.0 }
 0x41f   : > { %v2173_v6 = vadd.f32 %v3691_v5, %v2054_v62  ;;  %v2115_v7 = vadd.f32 %v2114_v3, %v1940_v60  ;;  %v3023_v8 = vpop.f32.mrb[6].mxu1  ;;  %v2204_v14 = vmax.f32 %v2172_v61, 0.0 }
 0x420   : > { %v2207_v10 = vmax.f32 %v2175_v1, 0.0  ;;  %v2190_v11 = vadd.f32 %v3691_v5, %v2123_v2  ;;  %v2126_v12 = vadd.f32 %v3023_v8, %v1943_v0  ;;  %v2117_v13 = vpop.f32.mrb[7].mxu1 }
 0x421   : > { %v2205_v15 = vmax.f32 %v2173_v6, 0.0  ;;  %v2188_v16 = vadd.f32 %v3691_v5, %v2115_v7  ;;  %v2118_v17 = vadd.f32 %v2117_v13, %v1941_v4 }
 0x422   : > { %v2699_v18 = vpack.c.bf16 %v2207_v10, %v2206_v9  ;;  %v2191_v19 = vadd.f32 %v3691_v5, %v2126_v12  ;;  %v2222_v22 = vmax.f32 %v2190_v11, 0.0  ;;  %v1934_v9 = vld [vmem:[#allocation3 + $0x70] sm:$0xff]  ;;  %v1932_v10 = vld [vmem:[#allocation3 + $0x60] sm:$0xff]  ;;  %v1935_v12 = vld [vmem:[#allocation3 + $0x78] sm:$0xff] }
 0x423   : > { %v2694_v20 = vpack.c.bf16 %v2205_v15, %v2204_v14  ;;  %v2189_v21 = vadd.f32 %v3691_v5, %v2118_v17  ;;  %v2220_v24 = vmax.f32 %v2188_v16, 0.0  ;;  %v1933_v15 = vld [vmem:[#allocation3 + $0x68] sm:$0xff] }
 0x424   : > { %2763 = vst [vmem:[%s3531_s0 + $0x18] sm:$0xff] %v2699_v18   ;;  %v2223_v23 = vmax.f32 %v2191_v19, 0.0  ;;  %v1950_v18 = vld [vmem:[#allocation3 + $0xf0] sm:$0xff] }
 0x425   : > { %2762 = vst [vmem:[%s3531_s0 + $0x10] sm:$0xff] %v2694_v20   ;;  %v2221_v25 = vmax.f32 %v2189_v21, 0.0 }
 0x426   : > { %v2739_v26 = vpack.c.bf16 %v2223_v23, %v2222_v22  ;;  %v1948_v22 = vld [vmem:[#allocation3 + $0xe0] sm:$0xff] }
 0x427   : > { %v2734_v27 = vpack.c.bf16 %v2221_v25, %v2220_v24 }
 0x428   : > { %2771 = vst [vmem:[%s3531_s0 + $0x58] sm:$0xff] %v2739_v26   ;;  %v1951_v26 = vld [vmem:[#allocation3 + $0xf8] sm:$0xff] }
 0x429   : > { %2770 = vst [vmem:[%s3531_s0 + $0x50] sm:$0xff] %v2734_v27   ;;  %v3010_v30 = vpop.f32.mrb[8].mxu0 }
 0x42a   : > { %v2075_v32 = vadd.f32 %v3010_v30, %v1930_v28  ;;  %v2066_v33 = vpop.f32.mrb[9].mxu0  ;;  %v1949_v30 = vld [vmem:[#allocation3 + $0xe8] sm:$0xff] }
 0x42b   : > { %v2067_v35 = vadd.f32 %v2066_v33, %v1928_v29  ;;  %v3011_v36 = vpop.f32.mrb[10].mxu0 }
 0x42c   : > { %v2178_v38 = vadd.f32 %v3691_v5, %v2075_v32  ;;  %v2078_v39 = vadd.f32 %v3011_v36, %v1931_v31  ;;  %v2069_v40 = vpop.f32.mrb[11].mxu0 }
 0x42d   : > { %v2176_v42 = vadd.f32 %v3691_v5, %v2067_v35  ;;  %v2070_v43 = vadd.f32 %v2069_v40, %v1929_v34  ;;  %v3026_v44 = vpop.f32.mrb[8].mxu1 }
 0x42e   : > { %v2179_v46 = vadd.f32 %v3691_v5, %v2078_v39  ;;  %v2139_v47 = vadd.f32 %v3026_v44, %v1946_v37  ;;  %v2130_v48 = vpop.f32.mrb[9].mxu1  ;;  %v2210_v53 = vmax.f32 %v2178_v38, 0.0 }
 0x42f   : > { %v2177_v50 = vadd.f32 %v3691_v5, %v2070_v43  ;;  %v2131_v51 = vadd.f32 %v2130_v48, %v1944_v41  ;;  %v3027_v52 = vpop.f32.mrb[10].mxu1  ;;  %v2208_v58 = vmax.f32 %v2176_v42, 0.0 }
 0x430   : > { %v2211_v54 = vmax.f32 %v2179_v46, 0.0  ;;  %v2194_v55 = vadd.f32 %v3691_v5, %v2139_v47  ;;  %v2142_v56 = vadd.f32 %v3027_v52, %v1947_v45  ;;  %v2133_v57 = vpop.f32.mrb[11].mxu1 }
 0x431   : > { %v2209_v59 = vmax.f32 %v2177_v50, 0.0  ;;  %v2192_v60 = vadd.f32 %v3691_v5, %v2131_v51  ;;  %v2134_v61 = vadd.f32 %v2133_v57, %v1945_v49 }
 0x432   : > { %v2709_v62 = vpack.c.bf16 %v2211_v54, %v2210_v53  ;;  %v2195_v63 = vadd.f32 %v3691_v5, %v2142_v56  ;;  %v2226_v2 = vmax.f32 %v2194_v55, 0.0 }
 0x433   : > { %v2704_v0 = vpack.c.bf16 %v2209_v59, %v2208_v58  ;;  %v2193_v1 = vadd.f32 %v3691_v5, %v2134_v61  ;;  %v2224_v4 = vmax.f32 %v2192_v60, 0.0 }
 0x434   : > { %2765 = vst [vmem:[%s3531_s0 + $0x28] sm:$0xff] %v2709_v62   ;;  %v2227_v3 = vmax.f32 %v2195_v63, 0.0 }
 0x435   : > { %2764 = vst [vmem:[%s3531_s0 + $0x20] sm:$0xff] %v2704_v0   ;;  %v2225_v6 = vmax.f32 %v2193_v1, 0.0 }
 0x436   : > { %v2749_v7 = vpack.c.bf16 %v2227_v3, %v2226_v2 }
 0x437   : > { %v2744_v8 = vpack.c.bf16 %v2225_v6, %v2224_v4 }
 0x438   : > { %2773 = vst [vmem:[%s3531_s0 + $0x68] sm:$0xff] %v2749_v7  }
 0x439   : > { %2772 = vst [vmem:[%s3531_s0 + $0x60] sm:$0xff] %v2744_v8   ;;  %v3014_v11 = vpop.f32.mrb[12].mxu0 }
 0x43a   : > { %v2091_v13 = vadd.f32 %v3014_v11, %v1934_v9  ;;  %v2082_v14 = vpop.f32.mrb[13].mxu0 }
 0x43b   : > { %v2083_v16 = vadd.f32 %v2082_v14, %v1932_v10  ;;  %v3015_v17 = vpop.f32.mrb[14].mxu0 }
 0x43c   : > { %v2182_v19 = vadd.f32 %v3691_v5, %v2091_v13  ;;  %v2094_v20 = vadd.f32 %v3015_v17, %v1935_v12  ;;  %v2085_v21 = vpop.f32.mrb[15].mxu0 }
 0x43d   : > { %v2180_v23 = vadd.f32 %v3691_v5, %v2083_v16  ;;  %v2086_v24 = vadd.f32 %v2085_v21, %v1933_v15  ;;  %v3030_v25 = vpop.f32.mrb[12].mxu1 }
 0x43e   : > { %v2183_v27 = vadd.f32 %v3691_v5, %v2094_v20  ;;  %v2155_v28 = vadd.f32 %v3030_v25, %v1950_v18  ;;  %v2146_v29 = vpop.f32.mrb[13].mxu1  ;;  %v2214_v34 = vmax.f32 %v2182_v19, 0.0 }
 0x43f   : > { %v2181_v31 = vadd.f32 %v3691_v5, %v2086_v24  ;;  %v2147_v32 = vadd.f32 %v2146_v29, %v1948_v22  ;;  %v3031_v33 = vpop.f32.mrb[14].mxu1  ;;  %v2212_v39 = vmax.f32 %v2180_v23, 0.0 }
 0x440   : > { %v2215_v35 = vmax.f32 %v2183_v27, 0.0  ;;  %v2198_v36 = vadd.f32 %v3691_v5, %v2155_v28  ;;  %v2158_v37 = vadd.f32 %v3031_v33, %v1951_v26  ;;  %v2149_v38 = vpop.f32.mrb[15].mxu1 }
 0x441   : > { %v2213_v40 = vmax.f32 %v2181_v31, 0.0  ;;  %v2196_v41 = vadd.f32 %v3691_v5, %v2147_v32  ;;  %v2150_v42 = vadd.f32 %v2149_v38, %v1949_v30 }
 0x442   : > { %v2719_v43 = vpack.c.bf16 %v2215_v35, %v2214_v34  ;;  %v2199_v44 = vadd.f32 %v3691_v5, %v2158_v37  ;;  %v2230_v47 = vmax.f32 %v2198_v36, 0.0 }
 0x443   : > { %v2714_v45 = vpack.c.bf16 %v2213_v40, %v2212_v39  ;;  %v2197_v46 = vadd.f32 %v3691_v5, %v2150_v42  ;;  %v2228_v49 = vmax.f32 %v2196_v41, 0.0 }
 0x444   : > { %2767 = vst [vmem:[%s3531_s0 + $0x38] sm:$0xff] %v2719_v43   ;;  %v2231_v48 = vmax.f32 %v2199_v44, 0.0 }
 0x445   : > { %2766 = vst [vmem:[%s3531_s0 + $0x30] sm:$0xff] %v2714_v45   ;;  %v2229_v50 = vmax.f32 %v2197_v46, 0.0 }
 0x446   : > { %v2759_v51 = vpack.c.bf16 %v2231_v48, %v2230_v47 }
 0x447   : > { %v2754_v52 = vpack.c.bf16 %v2229_v50, %v2228_v49 }
 0x448   : > { %2775 = vst [vmem:[%s3531_s0 + $0x78] sm:$0xff] %v2759_v51  }
 0x449   : > { %2774 = vst [vmem:[%s3531_s0 + $0x70] sm:$0xff] %v2754_v52  }
 0x44a PF: > { %s29_s23 = sadd.s32 1, %s3318_s23   ;;  %s3778_s15 = sld [smem:[#allocation9_spill]] }
 0x44b   : > { %p26_p11 = scmp.ge.s32.totalorder %s29_s23, 6   ;;  %s3779_s12 = sld [smem:[#allocation10_spill]] }
 0x44c   : > { %s3780_s1 = smov %s3298_s18  ;;  %s3781_s18 = smov %s3435_s28 }
 0x44d   : > { %s3782_s19 = smov %s3310_s21  ;;  %s3783_s20 = smov %s3314_s22 }
 0x44e   :  { %28 = sbr.rel (!%p26_p11) target bundleno = 30 (0x1e), region = 142 }
 0x450   : > { %s3784_s21 = smov %s3778_s15 }
 0x451   : > { %s3785_s22 = smov %s3779_s12 }

</bundles_post_ra>
